<compile_context>
chip_gen: v7x
topology: tpu7x:2x2x1
jax: 0.10.0
libtpu: 0.0.40
codegen_flags: <defaults>
</compile_context>

<pallas_src>
import functools

import jax
import jax.numpy as jnp
from jax import lax
from jax.experimental import pallas as pl
from jax.experimental.pallas import tpu as pltpu

EPS = 1e-5                      # nn.GroupNorm default eps
GROUPS = 4                      # Block() default
VMEM_LIMIT = 48 * 1024 * 1024   # safe on v5e/v6e (128 MiB) and v7x (64 MiB)


# -----------------------------------------------------------------------------
# Kernel A: GroupNorm statistics of (x + t_add), tiled over depth planes.
# Emits a per-(batch, channel) affine (scale, shift) such that
#     GroupNorm(x + t) * gamma + beta == x * scale + shift
# -----------------------------------------------------------------------------
def _gn_stats_kernel(x_ref, t_ref, gamma_ref, beta_ref, gmat_ref, gmatT_ref,
                     scale_ref, shift_ref, mean_sc, m2_sc, *, n_tile, n_total):
    d = pl.program_id(1)
    nd = pl.num_programs(1)

    x = x_ref[0, 0] + t_ref[0]                               # (HW, C) f32

    # Per-tile, per-group mean and centered second moment (two-pass in-tile).
    sum_c = jnp.sum(x, axis=0, keepdims=True)                # (1, C)
    sum_g = jnp.dot(sum_c, gmat_ref[...],
                    preferred_element_type=jnp.float32)      # (1, G)
    mean_t = sum_g * (1.0 / n_tile)
    mean_t_c = jnp.dot(mean_t, gmatT_ref[...],
                       preferred_element_type=jnp.float32)   # (1, C)
    xc = x - mean_t_c
    m2_c = jnp.sum(xc * xc, axis=0, keepdims=True)           # (1, C)
    m2_t = jnp.dot(m2_c, gmat_ref[...],
                   preferred_element_type=jnp.float32)       # (1, G)

    @pl.when(d == 0)
    def _():
        mean_sc[...] = mean_t
        m2_sc[...] = m2_t

    @pl.when(d > 0)
    def _():
        # Chan parallel combine of running stats (n_prev) with the tile (n_tile).
        n_prev = (d * n_tile).astype(jnp.float32)
        w_new = n_tile / (n_prev + n_tile)
        delta = mean_t - mean_sc[...]
        mean_sc[...] = mean_sc[...] + delta * w_new
        m2_sc[...] = m2_sc[...] + m2_t + delta * delta * (n_prev * w_new)

    @pl.when(d == nd - 1)
    def _():
        var_g = m2_sc[...] * (1.0 / n_total)                 # biased var (torch)
        inv_g = lax.rsqrt(var_g + EPS)
        inv_c = jnp.dot(inv_g, gmatT_ref[...],
                        preferred_element_type=jnp.float32)  # (1, C)
        mean_c = jnp.dot(mean_sc[...], gmatT_ref[...],
                         preferred_element_type=jnp.float32)
        scl = gamma_ref[...] * inv_c                         # (1, C)
        scale_ref[0] = scl
        shift_ref[0] = (t_ref[0] - mean_c) * scl + beta_ref[...]


def gn_stats(x_flat, t_add, gamma, beta, groups):
    """x_flat: (B, D, HW, C), t_add: (B, 1, C). Returns (scale, shift) (B,1,C)."""
    b, d, n, c = x_flat.shape
    g = groups
    # One-hot channel->group matrix, built once per call (constant under jit).
    gmat = jnp.repeat(jnp.eye(g, dtype=jnp.float32), c // g, axis=0)   # (C, G)
    gmat_t = jnp.transpose(gmat)                                       # (G, C)
    n_tile = n * (c // g)
    kern = functools.partial(_gn_stats_kernel, n_tile=n_tile,
                             n_total=d * n_tile)
    return pl.pallas_call(
        kern,
        out_shape=(jax.ShapeDtypeStruct((b, 1, c), jnp.float32),
                   jax.ShapeDtypeStruct((b, 1, c), jnp.float32)),
        grid=(b, d),
        in_specs=[
            pl.BlockSpec((1, 1, n, c), lambda i, j: (i, j, 0, 0)),
            pl.BlockSpec((1, 1, c), lambda i, j: (i, 0, 0)),
            pl.BlockSpec((1, c), lambda i, j: (0, 0)),
            pl.BlockSpec((1, c), lambda i, j: (0, 0)),
            pl.BlockSpec((c, g), lambda i, j: (0, 0)),
            pl.BlockSpec((g, c), lambda i, j: (0, 0)),
        ],
        out_specs=(pl.BlockSpec((1, 1, c), lambda i, j: (i, 0, 0)),
                   pl.BlockSpec((1, 1, c), lambda i, j: (i, 0, 0))),
        scratch_shapes=[pltpu.VMEM((1, g), jnp.float32),
                        pltpu.VMEM((1, g), jnp.float32)],
        compiler_params=pltpu.CompilerParams(
            dimension_semantics=("parallel", "arbitrary"),
            vmem_limit_bytes=VMEM_LIMIT),
    )(x_flat, t_add, gamma, beta, gmat, gmat_t)


# -----------------------------------------------------------------------------
# Kernel B: fused normalize(+Swish) -> 3x3x3 conv [-> + 1x1x1 residual conv],
# one depth plane per grid step.  Depth taps are folded into the contraction
# dim (K = 3*Cin); halos live in a small padded VMEM scratch.
# -----------------------------------------------------------------------------
def _fused_block_kernel(*refs, has_res):
    if has_res:
        (scale_ref, shift_ref, xm_ref, x0_ref, xp_ref, w_ref, b_ref,
         xr_ref, rw_ref, rb_ref, o_ref, apad_ref, acc_ref) = refs
    else:
        (scale_ref, shift_ref, xm_ref, x0_ref, xp_ref, w_ref, b_ref,
         o_ref, apad_ref, acc_ref) = refs

    _, _, H, W, C = x0_ref.shape

    d = pl.program_id(1)
    nd = pl.num_programs(1)
    f_prev = (d > 0).astype(jnp.float32)        # zero the clamped plane at d==0
    f_next = (d < nd - 1).astype(jnp.float32)   # zero the clamped plane at d==D-1

    scale = scale_ref[...]                      # (1, 1, C) -> broadcasts (H,W,C)
    shift = shift_ref[...]

    def norm_swish(plane):
        y = plane * scale + shift               # fused GroupNorm affine
        return y * jax.nn.sigmoid(y)            # Swish

    # Zero-padded, depth-concatenated tile: channel layout [kd=0 | kd=1 | kd=2].
    apad_ref[...] = jnp.zeros_like(apad_ref)
    apad_ref[1:H + 1, 1:W + 1, 0:C] = norm_swish(xm_ref[0, 0]) * f_prev
    apad_ref[1:H + 1, 1:W + 1, C:2 * C] = norm_swish(x0_ref[0, 0])
    apad_ref[1:H + 1, 1:W + 1, 2 * C:3 * C] = norm_swish(xp_ref[0, 0]) * f_next

    # 9 MXU issues with K = 3*Cin (bf16 inputs, f32 VMEM accumulator).
    acc_ref[...] = jnp.zeros_like(acc_ref)
    for kh in range(3):
        for kw in range(3):
            patch = apad_ref[kh:kh + H, kw:kw + W, :]          # (H, W, 3C)
            patch = patch.reshape(H * W, 3 * C).astype(jnp.bfloat16)
            acc_ref[...] += jnp.dot(patch, w_ref[kh, kw],
                                    preferred_element_type=jnp.float32)

    out = acc_ref[...] + b_ref[...]
    if has_res:
        # Residual 1x1x1 conv epilogue (kept f32; exact for the identity case).
        out = out + jnp.dot(xr_ref[0, 0], rw_ref[...],
                            preferred_element_type=jnp.float32) + rb_ref[...]
    o_ref[0, 0] = out


def fused_block(x, scale, shift, w_folded, bias, x_res=None, res_w=None,
                res_b=None):
    """x: (B,D,H,W,C); scale/shift: (B,1,C); w_folded: (3,3,3C,Cout) bf16.

    Optional residual: x_res (B,D,H*W,Cin), res_w (Cin,Cout), res_b (1,Cout).
    Returns (B, D, H*W, Cout) f32.
    """
    b, d, h, w, c = x.shape
    cout = w_folded.shape[-1]
    n = h * w
    has_res = x_res is not None

    in_specs = [
        pl.BlockSpec((1, 1, c), lambda i, j: (i, 0, 0)),             # scale
        pl.BlockSpec((1, 1, c), lambda i, j: (i, 0, 0)),             # shift
        pl.BlockSpec((1, 1, h, w, c),                                # plane d-1
                     lambda i, j: (i, jnp.maximum(j - 1, 0), 0, 0, 0)),
        pl.BlockSpec((1, 1, h, w, c),                                # plane d
                     lambda i, j: (i, j, 0, 0, 0)),
        pl.BlockSpec((1, 1, h, w, c),                                # plane d+1
                     lambda i, j, _dm=d - 1: (i, jnp.minimum(j + 1, _dm),
                                              0, 0, 0)),
        pl.BlockSpec((3, 3, 3 * c, cout), lambda i, j: (0, 0, 0, 0)),  # weights
        pl.BlockSpec((1, cout), lambda i, j: (0, 0)),                # bias
    ]
    args = [scale, shift, x, x, x, w_folded, bias]
    if has_res:
        cin_r = x_res.shape[-1]
        in_specs += [
            pl.BlockSpec((1, 1, n, cin_r), lambda i, j: (i, j, 0, 0)),
            pl.BlockSpec((cin_r, cout), lambda i, j: (0, 0)),
            pl.BlockSpec((1, cout), lambda i, j: (0, 0)),
        ]
        args += [x_res, res_w, res_b]

    return pl.pallas_call(
        functools.partial(_fused_block_kernel, has_res=has_res),
        out_shape=jax.ShapeDtypeStruct((b, d, n, cout), jnp.float32),
        grid=(b, d),
        in_specs=in_specs,
        out_specs=pl.BlockSpec((1, 1, n, cout), lambda i, j: (i, j, 0, 0)),
        scratch_shapes=[pltpu.VMEM((h + 2, w + 2, 3 * c), jnp.float32),
                        pltpu.VMEM((n, cout), jnp.float32)],
        compiler_params=pltpu.CompilerParams(
            dimension_semantics=("parallel", "parallel"),
            vmem_limit_bytes=VMEM_LIMIT),
    )(*args)


# -----------------------------------------------------------------------------
# Time-embedding MLP: Swish(t) @ W + b   (tiny, single-step kernel)
# -----------------------------------------------------------------------------
def _time_mlp_kernel(t_ref, w_ref, b_ref, o_ref):
    t = t_ref[...]
    s = t * jax.nn.sigmoid(t)
    o_ref[...] = jnp.dot(s, w_ref[...],
                         preferred_element_type=jnp.float32) + b_ref[...]


def time_mlp(time_emb, w, bias):
    b, t = time_emb.shape
    cout = w.shape[-1]
    return pl.pallas_call(
        _time_mlp_kernel,
        out_shape=jax.ShapeDtypeStruct((b, cout), jnp.float32),
        grid=(1,),
        in_specs=[pl.BlockSpec((b, t), lambda i: (0, 0)),
                  pl.BlockSpec((t, cout), lambda i: (0, 0)),
                  pl.BlockSpec((1, cout), lambda i: (0, 0))],
        out_specs=pl.BlockSpec((b, cout), lambda i: (0, 0)),
        compiler_params=pltpu.CompilerParams(vmem_limit_bytes=VMEM_LIMIT),
    )(time_emb, w, bias)


# -----------------------------------------------------------------------------
# ResnetBlock forward (Pallas)
# -----------------------------------------------------------------------------
def fold_conv_weight(w_dhwio):
    """(3,3,3,Cin,Cout) DHWIO -> (kh, kw, 3*Cin, Cout) bf16 (kd folded into K)."""
    kd, kh, kw, cin, cout = w_dhwio.shape
    w2 = jnp.transpose(w_dhwio, (1, 2, 0, 3, 4)).reshape(kh, kw, kd * cin, cout)
    return w2.astype(jnp.bfloat16)


def resnet_block_forward(x_ncdhw, time_emb, p):
    """x_ncdhw: (B, C, D, H, W), time_emb: (B, T).  Returns (B, Cout, D, H, W)."""
    b, c, d, h, w = x_ncdhw.shape
    x = jnp.transpose(x_ncdhw, (0, 2, 3, 4, 1))          # (B, D, H, W, C)
    x_flat = x.reshape(b, d, h * w, c)                   # layout-preserving view

    cout = p["conv1_w"].shape[-1]
    w1 = fold_conv_weight(p["conv1_w"])
    w2 = fold_conv_weight(p["conv2_w"])

    # ---- block1: GroupNorm -> Swish -> Conv3d(3, pad=1) -------------------
    zeros_t = jnp.zeros((b, 1, c), jnp.float32)
    s1, sh1 = gn_stats(x_flat, zeros_t, p["gn1_g"], p["gn1_b"], GROUPS)
    h1_flat = fused_block(x, s1, sh1, w1, p["conv1_b"])          # (B,D,HW,Cout)
    h1 = h1_flat.reshape(b, d, h, w, cout)

    # ---- h += mlp(time_emb)[:, :, None, None, None] ------------------------
    # The broadcast add is folded into block2's GN stats / shift, so it never
    # touches the full activation in HBM.
    t_add = time_mlp(time_emb, p["mlp_w"], p["mlp_b"]).reshape(b, 1, cout)

    # ---- block2: GroupNorm -> Swish -> Conv3d(3, pad=1), fused residual ---
    s2, sh2 = gn_stats(h1_flat, t_add, p["gn2_g"], p["gn2_b"], GROUPS)
    if p.get("res_w") is not None:
        res_w, res_b = p["res_w"], p["res_b"]
    else:                                                # nn.Identity path
        assert c == cout, "identity residual requires dim == dim_out"
        res_w = jnp.eye(c, dtype=jnp.float32)
        res_b = jnp.zeros((1, cout), jnp.float32)
    out_flat = fused_block(h1, s2, sh2, w2, p["conv2_b"],
                           x_res=x_flat, res_w=res_w, res_b=res_b)
    out = out_flat.reshape(b, d, h, w, cout)
    return jnp.transpose(out, (0, 4, 1, 2, 3))           # back to NCDHW


# -----------------------------------------------------------------------------
# Pure-JAX reference (for correctness checking)
# -----------------------------------------------------------------------------
def _ref_forward(x_ncdhw, time_emb, p):
    x = jnp.transpose(x_ncdhw, (0, 2, 3, 4, 1))

    def gn_swish_ref(xr, g, bta, groups):
        b_, d_, h_, w_, c_ = xr.shape
        xf = xr.reshape(b_, -1, groups, c_ // groups)
        mean = xf.mean(axis=(1, 3), keepdims=True)
        var = xf.var(axis=(1, 3), keepdims=True)
        y = (xf - mean) / jnp.sqrt(var + EPS)
        y = y.reshape(b_, d_, h_, w_, c_) * g.reshape(1, 1, 1, 1, -1) \
            + bta.reshape(1, 1, 1, 1, -1)
        return y * jax.nn.sigmoid(y)

    def conv_ref(xr, w, bias):
        y = lax.conv_general_dilated(
            xr, w, (1, 1, 1), "SAME",
            dimension_numbers=("NDHWC", "DHWIO", "NDHWC"))
        return y + bias.reshape(1, 1, 1, 1, -1)

    h = conv_ref(gn_swish_ref(x, p["gn1_g"], p["gn1_b"], GROUPS),
                 p["conv1_w"], p["conv1_b"])
    temb = time_emb * jax.nn.sigmoid(time_emb)
    tproj = temb @ p["mlp_w"] + p["mlp_b"]
    h = h + tproj[:, None, None, None, :]
    h = conv_ref(gn_swish_ref(h, p["gn2_g"], p["gn2_b"], GROUPS),
                 p["conv2_w"], p["conv2_b"])
    res = jnp.einsum("bdhwc,co->bdhwo", x, p["res_w"]) \
        + p["res_b"].reshape(1, 1, 1, 1, -1)
    out = h + res
    return jnp.transpose(out, (0, 4, 1, 2, 3))


# -----------------------------------------------------------------------------
if __name__ == "__main__":
    B, dim, dim_out, temb_dim = 2, 4, 8, 16
    D = H = W = 8

    key = jax.random.PRNGKey(0)
    ks = jax.random.split(key, 14)
    f32 = jnp.float32
    params = {
        "gn1_g":  1.0 + 0.2 * jax.random.normal(ks[0], (1, dim), f32),
        "gn1_b":  0.1 * jax.random.normal(ks[1], (1, dim), f32),
        "conv1_w": 0.1 * jax.random.normal(ks[2], (3, 3, 3, dim, dim_out), f32),
        "conv1_b": 0.1 * jax.random.normal(ks[3], (1, dim_out), f32),
        "mlp_w":   0.2 * jax.random.normal(ks[4], (temb_dim, dim_out), f32),
        "mlp_b":   0.1 * jax.random.normal(ks[5], (1, dim_out), f32),
        "gn2_g":  1.0 + 0.2 * jax.random.normal(ks[6], (1, dim_out), f32),
        "gn2_b":  0.1 * jax.random.normal(ks[7], (1, dim_out), f32),
        "conv2_w": 0.1 * jax.random.normal(ks[8], (3, 3, 3, dim_out, dim_out), f32),
        "conv2_b": 0.1 * jax.random.normal(ks[9], (1, dim_out), f32),
        "res_w":   0.3 * jax.random.normal(ks[10], (dim, dim_out), f32),
        "res_b":   0.1 * jax.random.normal(ks[11], (1, dim_out), f32),
    }

    x = jax.random.normal(ks[12], (B, dim, D, H, W), f32)       # NCDHW like torch
    time_emb = jax.random.normal(ks[13], (B, temb_dim), f32)

    fwd = jax.jit(resnet_block_forward)
    out = jax.block_until_ready(fwd(x, time_emb, params))
    assert out.shape == (B, dim_out, D, H, W), out.shape

    ref = jax.block_until_ready(_ref_forward(x, time_emb, params))
    max_err = float(jnp.max(jnp.abs(out - ref)))
    # Conv matmuls feed the MXU bf16 inputs (f32 accumulation), so allow a
    # slightly looser absolute tolerance than a pure-f32 implementation.
    assert max_err < 0.15, f"max abs error {max_err}"

    print("KERNEL_OK")
</pallas_src>

<mosaic_0001>
module attributes {stable_mosaic.version = 11 : i64} {
  func.func @_time_mlp_kernel(%arg0: i32, %arg1: memref<2x16xf32, #tpu.memory_space<vmem>>, %arg2: memref<16x8xf32, #tpu.memory_space<vmem>>, %arg3: memref<1x8xf32, #tpu.memory_space<vmem>>, %arg4: memref<2x8xf32, #tpu.memory_space<vmem>>) attributes {dimension_semantics = [#tpu.dimension_semantics<arbitrary>], iteration_bounds = array<i64: 1>, scalar_prefetch = 0 : i64, scratch_operands = 0 : i64, tpu.core_type = #tpu.core_type<tc>, window_params = [{pipeline_mode = #tpu.pipeline_mode<synchronous>, transform_indices = @transform_0, window_bounds = array<i64: 2, 16>}, {pipeline_mode = #tpu.pipeline_mode<synchronous>, transform_indices = @transform_1, window_bounds = array<i64: 16, 8>}, {pipeline_mode = #tpu.pipeline_mode<synchronous>, transform_indices = @transform_2, window_bounds = array<i64: 1, 8>}, {pipeline_mode = #tpu.pipeline_mode<synchronous>, transform_indices = @transform_3, window_bounds = array<i64: 2, 8>}]} {
    %c0 = arith.constant 0 : index
    %c0_0 = arith.constant 0 : index
    %0 = vector.load %arg1[%c0, %c0_0] : memref<2x16xf32, #tpu.memory_space<vmem>>, vector<2x16xf32>
    %1 = arith.negf %0 : vector<2x16xf32>
    %2 = math.exp %1 : vector<2x16xf32>
    %cst = arith.constant 1.000000e+00 : f32
    %3 = vector.broadcast %cst : f32 to vector<2x16xf32>
    %4 = arith.addf %3, %2 : vector<2x16xf32>
    %5 = arith.divf %3, %4 : vector<2x16xf32>
    %6 = arith.mulf %0, %5 : vector<2x16xf32>
    %c0_1 = arith.constant 0 : index
    %c0_2 = arith.constant 0 : index
    %7 = vector.load %arg2[%c0_1, %c0_2] : memref<16x8xf32, #tpu.memory_space<vmem>>, vector<16x8xf32>
    %cst_3 = arith.constant dense<0.000000e+00> : vector<2x8xf32>
    %8 = tpu.matmul %6, %7, %cst_3 {dimension_numbers = #tpu.dot_dimension_numbers<[1], [0], [0], [1], [0, 0, 1, 1], [], []>} : vector<2x16xf32>, vector<16x8xf32>, vector<2x8xf32> -> vector<2x8xf32>
    %c0_4 = arith.constant 0 : index
    %c0_5 = arith.constant 0 : index
    %9 = vector.load %arg3[%c0_4, %c0_5] : memref<1x8xf32, #tpu.memory_space<vmem>>, vector<1x8xf32>
    %10 = vector.broadcast %9 : vector<1x8xf32> to vector<2x8xf32>
    %11 = arith.addf %8, %10 : vector<2x8xf32>
    %c0_6 = arith.constant 0 : index
    %c0_7 = arith.constant 0 : index
    %12 = vector.load %arg4[%c0_6, %c0_7] : memref<2x8xf32, #tpu.memory_space<vmem>>, vector<2x8xf32>
    tpu.vector_store %arg4[%c0_6, %c0_7], %11 {strides = array<i32>} : memref<2x8xf32, #tpu.memory_space<vmem>>, vector<2x8xf32>,
    return
  }
  func.func @transform_0(%arg0: i32) -> (i32, i32) {
    %c0_i32 = arith.constant 0 : i32
    %c0_i32_0 = arith.constant 0 : i32
    %c0_i32_1 = arith.constant 0 : i32
    return %c0_i32, %c0_i32_0 : i32, i32
  }
  func.func @transform_1(%arg0: i32) -> (i32, i32) {
    %c0_i32 = arith.constant 0 : i32
    %c0_i32_0 = arith.constant 0 : i32
    %c0_i32_1 = arith.constant 0 : i32
    return %c0_i32, %c0_i32_0 : i32, i32
  }
  func.func @transform_2(%arg0: i32) -> (i32, i32) {
    %c0_i32 = arith.constant 0 : i32
    %c0_i32_0 = arith.constant 0 : i32
    %c0_i32_1 = arith.constant 0 : i32
    return %c0_i32, %c0_i32_0 : i32, i32
  }
  func.func @transform_3(%arg0: i32) -> (i32, i32) {
    %c0_i32 = arith.constant 0 : i32
    %c0_i32_0 = arith.constant 0 : i32
    %c0_i32_1 = arith.constant 0 : i32
    return %c0_i32, %c0_i32_0 : i32, i32
  }
}

module attributes {stable_mosaic.version = 11 : i64} {
  func.func @_gn_stats_kernel(%arg0: i32, %arg1: i32, %arg2: memref<1x1x64x4xf32, #tpu.memory_space<vmem>>, %arg3: memref<1x1x4xf32, #tpu.memory_space<vmem>>, %arg4: memref<1x4xf32, #tpu.memory_space<vmem>>, %arg5: memref<1x4xf32, #tpu.memory_space<vmem>>, %arg6: memref<4x4xf32, #tpu.memory_space<vmem>>, %arg7: memref<4x4xf32, #tpu.memory_space<vmem>>, %arg8: memref<1x1x4xf32, #tpu.memory_space<vmem>>, %arg9: memref<1x1x4xf32, #tpu.memory_space<vmem>>, %arg10: memref<1x4xf32, #tpu.memory_space<vmem>>, %arg11: memref<1x4xf32, #tpu.memory_space<vmem>>) attributes {dimension_semantics = [#tpu.dimension_semantics<parallel>, #tpu.dimension_semantics<arbitrary>], iteration_bounds = array<i64: 2, 8>, scalar_prefetch = 0 : i64, scratch_operands = 2 : i64, tpu.core_type = #tpu.core_type<tc>, window_params = [{transform_indices = @transform_0, window_bounds = array<i64: 1, 1, 64, 4>}, {transform_indices = @transform_1, window_bounds = array<i64: 1, 1, 4>}, {pipeline_mode = #tpu.pipeline_mode<synchronous>, transform_indices = @transform_2, window_bounds = array<i64: 1, 4>}, {pipeline_mode = #tpu.pipeline_mode<synchronous>, transform_indices = @transform_3, window_bounds = array<i64: 1, 4>}, {pipeline_mode = #tpu.pipeline_mode<synchronous>, transform_indices = @transform_4, window_bounds = array<i64: 4, 4>}, {pipeline_mode = #tpu.pipeline_mode<synchronous>, transform_indices = @transform_5, window_bounds = array<i64: 4, 4>}, {transform_indices = @transform_6, window_bounds = array<i64: 1, 1, 4>}, {transform_indices = @transform_7, window_bounds = array<i64: 1, 1, 4>}]} {
    %c0 = arith.constant 0 : index
    %c0_0 = arith.constant 0 : index
    %c0_1 = arith.constant 0 : index
    %c0_2 = arith.constant 0 : index
    %0 = vector.load %arg2[%c0, %c0_0, %c0_1, %c0_2] : memref<1x1x64x4xf32, #tpu.memory_space<vmem>>, vector<1x1x64x4xf32>
    %1 = vector.shape_cast %0 : vector<1x1x64x4xf32> to vector<64x4xf32>
    %c0_3 = arith.constant 0 : index
    %c0_4 = arith.constant 0 : index
    %c0_5 = arith.constant 0 : index
    %2 = vector.load %arg3[%c0_3, %c0_4, %c0_5] : memref<1x1x4xf32, #tpu.memory_space<vmem>>, vector<1x1x4xf32>
    %3 = vector.shape_cast %2 : vector<1x1x4xf32> to vector<1x4xf32>
    %4 = vector.broadcast %3 : vector<1x4xf32> to vector<64x4xf32>
    %5 = arith.addf %1, %4 : vector<64x4xf32>
    %cst = arith.constant dense<0.000000e+00> : vector<4xf32>
    %6 = vector.multi_reduction <add>, %5, %cst [0] : vector<64x4xf32> to vector<4xf32>
    %7 = vector.shape_cast %6 : vector<4xf32> to vector<1x4xf32>
    %c0_6 = arith.constant 0 : index
    %c0_7 = arith.constant 0 : index
    %8 = vector.load %arg6[%c0_6, %c0_7] : memref<4x4xf32, #tpu.memory_space<vmem>>, vector<4x4xf32>
    %cst_8 = arith.constant dense<0.000000e+00> : vector<1x4xf32>
    %9 = tpu.matmul %7, %8, %cst_8 {dimension_numbers = #tpu.dot_dimension_numbers<[1], [0], [0], [1], [0, 0, 1, 1], [], []>} : vector<1x4xf32>, vector<4x4xf32>, vector<1x4xf32> -> vector<1x4xf32>
    %cst_9 = arith.constant 1.562500e-02 : f32
    %10 = vector.broadcast %cst_9 : f32 to vector<1x4xf32>
    %11 = arith.mulf %9, %10 : vector<1x4xf32>
    %c0_10 = arith.constant 0 : index
    %c0_11 = arith.constant 0 : index
    %12 = vector.load %arg7[%c0_10, %c0_11] : memref<4x4xf32, #tpu.memory_space<vmem>>, vector<4x4xf32>
    %cst_12 = arith.constant dense<0.000000e+00> : vector<1x4xf32>
    %13 = tpu.matmul %11, %12, %cst_12 {dimension_numbers = #tpu.dot_dimension_numbers<[1], [0], [0], [1], [0, 0, 1, 1], [], []>} : vector<1x4xf32>, vector<4x4xf32>, vector<1x4xf32> -> vector<1x4xf32>
    %14 = vector.broadcast %13 : vector<1x4xf32> to vector<64x4xf32>
    %15 = arith.subf %5, %14 : vector<64x4xf32>
    %16 = arith.mulf %15, %15 : vector<64x4xf32>
    %cst_13 = arith.constant dense<0.000000e+00> : vector<4xf32>
    %17 = vector.multi_reduction <add>, %16, %cst_13 [0] : vector<64x4xf32> to vector<4xf32>
    %18 = vector.shape_cast %17 : vector<4xf32> to vector<1x4xf32>
    %c0_14 = arith.constant 0 : index
    %c0_15 = arith.constant 0 : index
    %19 = vector.load %arg6[%c0_14, %c0_15] : memref<4x4xf32, #tpu.memory_space<vmem>>, vector<4x4xf32>
    %cst_16 = arith.constant dense<0.000000e+00> : vector<1x4xf32>
    %20 = tpu.matmul %18, %19, %cst_16 {dimension_numbers = #tpu.dot_dimension_numbers<[1], [0], [0], [1], [0, 0, 1, 1], [], []>} : vector<1x4xf32>, vector<4x4xf32>, vector<1x4xf32> -> vector<1x4xf32>
    %c0_i32 = arith.constant 0 : i32
    %21 = arith.cmpi eq, %arg1, %c0_i32 : i32
    %22 = arith.extui %21 : i1 to i32
    %c0_i32_17 = arith.constant 0 : i32
    %23 = arith.cmpi ne, %22, %c0_i32_17 : i32
    scf.if %23 {
      %c0_21 = arith.constant 0 : index
      %c0_22 = arith.constant 0 : index
      %30 = vector.load %arg10[%c0_21, %c0_22] : memref<1x4xf32, #tpu.memory_space<vmem>>, vector<1x4xf32>
      tpu.vector_store %arg10[%c0_21, %c0_22], %11 {strides = array<i32>} : memref<1x4xf32, #tpu.memory_space<vmem>>, vector<1x4xf32>,
      %c0_23 = arith.constant 0 : index
      %c0_24 = arith.constant 0 : index
      %31 = vector.load %arg11[%c0_23, %c0_24] : memref<1x4xf32, #tpu.memory_space<vmem>>, vector<1x4xf32>
      tpu.vector_store %arg11[%c0_23, %c0_24], %20 {strides = array<i32>} : memref<1x4xf32, #tpu.memory_space<vmem>>, vector<1x4xf32>,
    } else {
    }
    %c0_i32_18 = arith.constant 0 : i32
    %24 = arith.cmpi sgt, %arg1, %c0_i32_18 : i32
    %25 = arith.extui %24 : i1 to i32
    %c0_i32_19 = arith.constant 0 : i32
    %26 = arith.cmpi ne, %25, %c0_i32_19 : i32
    scf.if %26 {
      %c64_i32 = arith.constant 64 : i32
      %30 = arith.muli %arg1, %c64_i32 : i32
      %31 = arith.sitofp %30 : i32 to f32
      %cst_21 = arith.constant 6.400000e+01 : f32
      %32 = arith.addf %31, %cst_21 : f32
      %cst_22 = arith.constant 6.400000e+01 : f32
      %33 = arith.divf %cst_22, %32 : f32
      %c0_23 = arith.constant 0 : index
      %c0_24 = arith.constant 0 : index
      %34 = vector.load %arg10[%c0_23, %c0_24] : memref<1x4xf32, #tpu.memory_space<vmem>>, vector<1x4xf32>
      %35 = arith.subf %11, %34 : vector<1x4xf32>
      %c0_25 = arith.constant 0 : index
      %c0_26 = arith.constant 0 : index
      %36 = vector.load %arg10[%c0_25, %c0_26] : memref<1x4xf32, #tpu.memory_space<vmem>>, vector<1x4xf32>
      %37 = vector.broadcast %33 : f32 to vector<1x4xf32>
      %38 = arith.mulf %35, %37 : vector<1x4xf32>
      %39 = arith.addf %36, %38 : vector<1x4xf32>
      %c0_27 = arith.constant 0 : index
      %c0_28 = arith.constant 0 : index
      %40 = vector.load %arg10[%c0_27, %c0_28] : memref<1x4xf32, #tpu.memory_space<vmem>>, vector<1x4xf32>
      tpu.vector_store %arg10[%c0_27, %c0_28], %39 {strides = array<i32>} : memref<1x4xf32, #tpu.memory_space<vmem>>, vector<1x4xf32>,
      %c0_29 = arith.constant 0 : index
      %c0_30 = arith.constant 0 : index
      %41 = vector.load %arg11[%c0_29, %c0_30] : memref<1x4xf32, #tpu.memory_space<vmem>>, vector<1x4xf32>
      %42 = arith.addf %41, %20 : vector<1x4xf32>
      %43 = arith.mulf %35, %35 : vector<1x4xf32>
      %44 = arith.mulf %31, %33 : f32
      %45 = vector.broadcast %44 : f32 to vector<1x4xf32>
      %46 = arith.mulf %43, %45 : vector<1x4xf32>
      %47 = arith.addf %42, %46 : vector<1x4xf32>
      %c0_31 = arith.constant 0 : index
      %c0_32 = arith.constant 0 : index
      %48 = vector.load %arg11[%c0_31, %c0_32] : memref<1x4xf32, #tpu.memory_space<vmem>>, vector<1x4xf32>
      tpu.vector_store %arg11[%c0_31, %c0_32], %47 {strides = array<i32>} : memref<1x4xf32, #tpu.memory_space<vmem>>, vector<1x4xf32>,
    } else {
    }
    %c7_i32 = arith.constant 7 : i32
    %27 = arith.cmpi eq, %arg1, %c7_i32 : i32
    %28 = arith.extui %27 : i1 to i32
    %c0_i32_20 = arith.constant 0 : i32
    %29 = arith.cmpi ne, %28, %c0_i32_20 : i32
    scf.if %29 {
      %c0_21 = arith.constant 0 : index
      %c0_22 = arith.constant 0 : index
      %30 = vector.load %arg11[%c0_21, %c0_22] : memref<1x4xf32, #tpu.memory_space<vmem>>, vector<1x4xf32>
      %cst_23 = arith.constant 0.001953125 : f32
      %31 = vector.broadcast %cst_23 : f32 to vector<1x4xf32>
      %32 = arith.mulf %30, %31 : vector<1x4xf32>
      %cst_24 = arith.constant 9.99999974E-6 : f32
      %33 = vector.broadcast %cst_24 : f32 to vector<1x4xf32>
      %34 = arith.addf %32, %33 : vector<1x4xf32>
      %35 = math.rsqrt %34 : vector<1x4xf32>
      %c0_25 = arith.constant 0 : index
      %c0_26 = arith.constant 0 : index
      %36 = vector.load %arg7[%c0_25, %c0_26] : memref<4x4xf32, #tpu.memory_space<vmem>>, vector<4x4xf32>
      %cst_27 = arith.constant dense<0.000000e+00> : vector<1x4xf32>
      %37 = tpu.matmul %35, %36, %cst_27 {dimension_numbers = #tpu.dot_dimension_numbers<[1], [0], [0], [1], [0, 0, 1, 1], [], []>} : vector<1x4xf32>, vector<4x4xf32>, vector<1x4xf32> -> vector<1x4xf32>
      %c0_28 = arith.constant 0 : index
      %c0_29 = arith.constant 0 : index
      %38 = vector.load %arg10[%c0_28, %c0_29] : memref<1x4xf32, #tpu.memory_space<vmem>>, vector<1x4xf32>
      %c0_30 = arith.constant 0 : index
      %c0_31 = arith.constant 0 : index
      %39 = vector.load %arg7[%c0_30, %c0_31] : memref<4x4xf32, #tpu.memory_space<vmem>>, vector<4x4xf32>
      %cst_32 = arith.constant dense<0.000000e+00> : vector<1x4xf32>
      %40 = tpu.matmul %38, %39, %cst_32 {dimension_numbers = #tpu.dot_dimension_numbers<[1], [0], [0], [1], [0, 0, 1, 1], [], []>} : vector<1x4xf32>, vector<4x4xf32>, vector<1x4xf32> -> vector<1x4xf32>
      %c0_33 = arith.constant 0 : index
      %c0_34 = arith.constant 0 : index
      %41 = vector.load %arg4[%c0_33, %c0_34] : memref<1x4xf32, #tpu.memory_space<vmem>>, vector<1x4xf32>
      %42 = arith.mulf %41, %37 : vector<1x4xf32>
      %c0_35 = arith.constant 0 : index
      %c0_36 = arith.constant 0 : index
      %c0_37 = arith.constant 0 : index
      %43 = vector.load %arg8[%c0_35, %c0_36, %c0_37] : memref<1x1x4xf32, #tpu.memory_space<vmem>>, vector<1x1x4xf32>
      %44 = vector.shape_cast %43 : vector<1x1x4xf32> to vector<1x4xf32>
      %45 = vector.shape_cast %42 : vector<1x4xf32> to vector<1x1x4xf32>
      tpu.vector_store %arg8[%c0_35, %c0_36, %c0_37], %45 {strides = array<i32>} : memref<1x1x4xf32, #tpu.memory_space<vmem>>, vector<1x1x4xf32>,
      %c0_38 = arith.constant 0 : index
      %c0_39 = arith.constant 0 : index
      %c0_40 = arith.constant 0 : index
      %46 = vector.load %arg3[%c0_38, %c0_39, %c0_40] : memref<1x1x4xf32, #tpu.memory_space<vmem>>, vector<1x1x4xf32>
      %47 = vector.shape_cast %46 : vector<1x1x4xf32> to vector<1x4xf32>
      %48 = arith.subf %47, %40 : vector<1x4xf32>
      %49 = arith.mulf %48, %42 : vector<1x4xf32>
      %c0_41 = arith.constant 0 : index
      %c0_42 = arith.constant 0 : index
      %50 = vector.load %arg5[%c0_41, %c0_42] : memref<1x4xf32, #tpu.memory_space<vmem>>, vector<1x4xf32>
      %51 = arith.addf %49, %50 : vector<1x4xf32>
      %c0_43 = arith.constant 0 : index
      %c0_44 = arith.constant 0 : index
      %c0_45 = arith.constant 0 : index
      %52 = vector.load %arg9[%c0_43, %c0_44, %c0_45] : memref<1x1x4xf32, #tpu.memory_space<vmem>>, vector<1x1x4xf32>
      %53 = vector.shape_cast %52 : vector<1x1x4xf32> to vector<1x4xf32>
      %54 = vector.shape_cast %51 : vector<1x4xf32> to vector<1x1x4xf32>
      tpu.vector_store %arg9[%c0_43, %c0_44, %c0_45], %54 {strides = array<i32>} : memref<1x1x4xf32, #tpu.memory_space<vmem>>, vector<1x1x4xf32>,
    } else {
    }
    return
  }
  func.func @transform_0(%arg0: i32, %arg1: i32) -> (i32, i32, i32, i32) {
    %c0_i32 = arith.constant 0 : i32
    %c0_i32_0 = arith.constant 0 : i32
    %c0_i32_1 = arith.constant 0 : i32
    return %arg0, %arg1, %c0_i32, %c0_i32_0 : i32, i32, i32, i32
  }
  func.func @transform_1(%arg0: i32, %arg1: i32) -> (i32, i32, i32) {
    %c0_i32 = arith.constant 0 : i32
    %c0_i32_0 = arith.constant 0 : i32
    %c0_i32_1 = arith.constant 0 : i32
    return %arg0, %c0_i32, %c0_i32_0 : i32, i32, i32
  }
  func.func @transform_2(%arg0: i32, %arg1: i32) -> (i32, i32) {
    %c0_i32 = arith.constant 0 : i32
    %c0_i32_0 = arith.constant 0 : i32
    %c0_i32_1 = arith.constant 0 : i32
    return %c0_i32, %c0_i32_0 : i32, i32
  }
  func.func @transform_3(%arg0: i32, %arg1: i32) -> (i32, i32) {
    %c0_i32 = arith.constant 0 : i32
    %c0_i32_0 = arith.constant 0 : i32
    %c0_i32_1 = arith.constant 0 : i32
    return %c0_i32, %c0_i32_0 : i32, i32
  }
  func.func @transform_4(%arg0: i32, %arg1: i32) -> (i32, i32) {
    %c0_i32 = arith.constant 0 : i32
    %c0_i32_0 = arith.constant 0 : i32
    %c0_i32_1 = arith.constant 0 : i32
    return %c0_i32, %c0_i32_0 : i32, i32
  }
  func.func @transform_5(%arg0: i32, %arg1: i32) -> (i32, i32) {
    %c0_i32 = arith.constant 0 : i32
    %c0_i32_0 = arith.constant 0 : i32
    %c0_i32_1 = arith.constant 0 : i32
    return %c0_i32, %c0_i32_0 : i32, i32
  }
  func.func @transform_6(%arg0: i32, %arg1: i32) -> (i32, i32, i32) {
    %c0_i32 = arith.constant 0 : i32
    %c0_i32_0 = arith.constant 0 : i32
    %c0_i32_1 = arith.constant 0 : i32
    return %arg0, %c0_i32, %c0_i32_0 : i32, i32, i32
  }
  func.func @transform_7(%arg0: i32, %arg1: i32) -> (i32, i32, i32) {
    %c0_i32 = arith.constant 0 : i32
    %c0_i32_0 = arith.constant 0 : i32
    %c0_i32_1 = arith.constant 0 : i32
    return %arg0, %c0_i32, %c0_i32_0 : i32, i32, i32
  }
}

module attributes {stable_mosaic.version = 11 : i64} {
  func.func @_fused_block_kernel(%arg0: i32, %arg1: i32, %arg2: memref<1x1x4xf32, #tpu.memory_space<vmem>>, %arg3: memref<1x1x4xf32, #tpu.memory_space<vmem>>, %arg4: memref<1x1x8x8x4xf32, #tpu.memory_space<vmem>>, %arg5: memref<1x1x8x8x4xf32, #tpu.memory_space<vmem>>, %arg6: memref<1x1x8x8x4xf32, #tpu.memory_space<vmem>>, %arg7: memref<3x3x12x8xbf16, #tpu.memory_space<vmem>>, %arg8: memref<1x8xf32, #tpu.memory_space<vmem>>, %arg9: memref<1x1x64x8xf32, #tpu.memory_space<vmem>>, %arg10: memref<10x10x12xf32, #tpu.memory_space<vmem>>, %arg11: memref<64x8xf32, #tpu.memory_space<vmem>>) attributes {dimension_semantics = [#tpu.dimension_semantics<parallel>, #tpu.dimension_semantics<parallel>], iteration_bounds = array<i64: 2, 8>, scalar_prefetch = 0 : i64, scratch_operands = 2 : i64, tpu.core_type = #tpu.core_type<tc>, window_params = [{transform_indices = @transform_0, window_bounds = array<i64: 1, 1, 4>}, {transform_indices = @transform_1, window_bounds = array<i64: 1, 1, 4>}, {transform_indices = @transform_2, window_bounds = array<i64: 1, 1, 8, 8, 4>}, {transform_indices = @transform_3, window_bounds = array<i64: 1, 1, 8, 8, 4>}, {transform_indices = @transform_4, window_bounds = array<i64: 1, 1, 8, 8, 4>}, {pipeline_mode = #tpu.pipeline_mode<synchronous>, transform_indices = @transform_5, window_bounds = array<i64: 3, 3, 12, 8>}, {pipeline_mode = #tpu.pipeline_mode<synchronous>, transform_indices = @transform_6, window_bounds = array<i64: 1, 8>}, {transform_indices = @transform_7, window_bounds = array<i64: 1, 1, 64, 8>}]} {
    %c0_i32 = arith.constant 0 : i32
    %0 = arith.cmpi sgt, %arg1, %c0_i32 : i32
    %1 = arith.extui %0 : i1 to i32
    %2 = arith.sitofp %1 : i32 to f32
    %c7_i32 = arith.constant 7 : i32
    %3 = arith.cmpi slt, %arg1, %c7_i32 : i32
    %4 = arith.extui %3 : i1 to i32
    %5 = arith.sitofp %4 : i32 to f32
    %c0 = arith.constant 0 : index
    %c0_0 = arith.constant 0 : index
    %c0_1 = arith.constant 0 : index
    %6 = vector.load %arg2[%c0, %c0_0, %c0_1] : memref<1x1x4xf32, #tpu.memory_space<vmem>>, vector<1x1x4xf32>
    %c0_2 = arith.constant 0 : index
    %c0_3 = arith.constant 0 : index
    %c0_4 = arith.constant 0 : index
    %7 = vector.load %arg3[%c0_2, %c0_3, %c0_4] : memref<1x1x4xf32, #tpu.memory_space<vmem>>, vector<1x1x4xf32>
    %cst = arith.constant 0.000000e+00 : f32
    %8 = vector.broadcast %cst : f32 to vector<10x10x12xf32>
    %c0_5 = arith.constant 0 : index
    %c0_6 = arith.constant 0 : index
    %c0_7 = arith.constant 0 : index
    %9 = vector.load %arg10[%c0_5, %c0_6, %c0_7] : memref<10x10x12xf32, #tpu.memory_space<vmem>>, vector<10x10x12xf32>
    tpu.vector_store %arg10[%c0_5, %c0_6, %c0_7], %8 {strides = array<i32>} : memref<10x10x12xf32, #tpu.memory_space<vmem>>, vector<10x10x12xf32>,
    %c0_8 = arith.constant 0 : index
    %c0_9 = arith.constant 0 : index
    %c0_10 = arith.constant 0 : index
    %c0_11 = arith.constant 0 : index
    %c0_12 = arith.constant 0 : index
    %10 = vector.load %arg4[%c0_8, %c0_9, %c0_10, %c0_11, %c0_12] : memref<1x1x8x8x4xf32, #tpu.memory_space<vmem>>, vector<1x1x8x8x4xf32>
    %11 = vector.shape_cast %10 : vector<1x1x8x8x4xf32> to vector<8x8x4xf32>
    %12 = vector.broadcast %6 : vector<1x1x4xf32> to vector<8x8x4xf32>
    %13 = arith.mulf %11, %12 : vector<8x8x4xf32>
    %14 = vector.broadcast %7 : vector<1x1x4xf32> to vector<8x8x4xf32>
    %15 = arith.addf %13, %14 : vector<8x8x4xf32>
    %16 = arith.negf %15 : vector<8x8x4xf32>
    %17 = math.exp %16 : vector<8x8x4xf32>
    %cst_13 = arith.constant 1.000000e+00 : f32
    %18 = vector.broadcast %cst_13 : f32 to vector<8x8x4xf32>
    %19 = arith.addf %18, %17 : vector<8x8x4xf32>
    %20 = arith.divf %18, %19 : vector<8x8x4xf32>
    %21 = arith.mulf %15, %20 : vector<8x8x4xf32>
    %22 = vector.broadcast %2 : f32 to vector<8x8x4xf32>
    %23 = arith.mulf %21, %22 : vector<8x8x4xf32>
    %c1 = arith.constant 1 : index
    %c1_14 = arith.constant 1 : index
    %c0_15 = arith.constant 0 : index
    %24 = vector.load %arg10[%c1, %c1_14, %c0_15] : memref<10x10x12xf32, #tpu.memory_space<vmem>>, vector<8x8x4xf32>
    tpu.vector_store %arg10[%c1, %c1_14, %c0_15], %23 {strides = array<i32>} : memref<10x10x12xf32, #tpu.memory_space<vmem>>, vector<8x8x4xf32>,
    %c0_16 = arith.constant 0 : index
    %c0_17 = arith.constant 0 : index
    %c0_18 = arith.constant 0 : index
    %c0_19 = arith.constant 0 : index
    %c0_20 = arith.constant 0 : index
    %25 = vector.load %arg5[%c0_16, %c0_17, %c0_18, %c0_19, %c0_20] : memref<1x1x8x8x4xf32, #tpu.memory_space<vmem>>, vector<1x1x8x8x4xf32>
    %26 = vector.shape_cast %25 : vector<1x1x8x8x4xf32> to vector<8x8x4xf32>
    %27 = vector.broadcast %6 : vector<1x1x4xf32> to vector<8x8x4xf32>
    %28 = arith.mulf %26, %27 : vector<8x8x4xf32>
    %29 = vector.broadcast %7 : vector<1x1x4xf32> to vector<8x8x4xf32>
    %30 = arith.addf %28, %29 : vector<8x8x4xf32>
    %31 = arith.negf %30 : vector<8x8x4xf32>
    %32 = math.exp %31 : vector<8x8x4xf32>
    %cst_21 = arith.constant 1.000000e+00 : f32
    %33 = vector.broadcast %cst_21 : f32 to vector<8x8x4xf32>
    %34 = arith.addf %33, %32 : vector<8x8x4xf32>
    %35 = arith.divf %33, %34 : vector<8x8x4xf32>
    %36 = arith.mulf %30, %35 : vector<8x8x4xf32>
    %c1_22 = arith.constant 1 : index
    %c1_23 = arith.constant 1 : index
    %c4 = arith.constant 4 : index
    %37 = vector.load %arg10[%c1_22, %c1_23, %c4] : memref<10x10x12xf32, #tpu.memory_space<vmem>>, vector<8x8x4xf32>
    tpu.vector_store %arg10[%c1_22, %c1_23, %c4], %36 {strides = array<i32>} : memref<10x10x12xf32, #tpu.memory_space<vmem>>, vector<8x8x4xf32>,
    %c0_24 = arith.constant 0 : index
    %c0_25 = arith.constant 0 : index
    %c0_26 = arith.constant 0 : index
    %c0_27 = arith.constant 0 : index
    %c0_28 = arith.constant 0 : index
    %38 = vector.load %arg6[%c0_24, %c0_25, %c0_26, %c0_27, %c0_28] : memref<1x1x8x8x4xf32, #tpu.memory_space<vmem>>, vector<1x1x8x8x4xf32>
    %39 = vector.shape_cast %38 : vector<1x1x8x8x4xf32> to vector<8x8x4xf32>
    %40 = vector.broadcast %6 : vector<1x1x4xf32> to vector<8x8x4xf32>
    %41 = arith.mulf %39, %40 : vector<8x8x4xf32>
    %42 = vector.broadcast %7 : vector<1x1x4xf32> to vector<8x8x4xf32>
    %43 = arith.addf %41, %42 : vector<8x8x4xf32>
    %44 = arith.negf %43 : vector<8x8x4xf32>
    %45 = math.exp %44 : vector<8x8x4xf32>
    %cst_29 = arith.constant 1.000000e+00 : f32
    %46 = vector.broadcast %cst_29 : f32 to vector<8x8x4xf32>
    %47 = arith.addf %46, %45 : vector<8x8x4xf32>
    %48 = arith.divf %46, %47 : vector<8x8x4xf32>
    %49 = arith.mulf %43, %48 : vector<8x8x4xf32>
    %50 = vector.broadcast %5 : f32 to vector<8x8x4xf32>
    %51 = arith.mulf %49, %50 : vector<8x8x4xf32>
    %c1_30 = arith.constant 1 : index
    %c1_31 = arith.constant 1 : index
    %c8 = arith.constant 8 : index
    %52 = vector.load %arg10[%c1_30, %c1_31, %c8] : memref<10x10x12xf32, #tpu.memory_space<vmem>>, vector<8x8x4xf32>
    tpu.vector_store %arg10[%c1_30, %c1_31, %c8], %51 {strides = array<i32>} : memref<10x10x12xf32, #tpu.memory_space<vmem>>, vector<8x8x4xf32>,
    %cst_32 = arith.constant 0.000000e+00 : f32
    %53 = vector.broadcast %cst_32 : f32 to vector<64x8xf32>
    %c0_33 = arith.constant 0 : index
    %c0_34 = arith.constant 0 : index
    %54 = vector.load %arg11[%c0_33, %c0_34] : memref<64x8xf32, #tpu.memory_space<vmem>>, vector<64x8xf32>
    tpu.vector_store %arg11[%c0_33, %c0_34], %53 {strides = array<i32>} : memref<64x8xf32, #tpu.memory_space<vmem>>, vector<64x8xf32>,
    %c0_35 = arith.constant 0 : index
    %c0_36 = arith.constant 0 : index
    %c0_37 = arith.constant 0 : index
    %55 = vector.load %arg10[%c0_35, %c0_36, %c0_37] : memref<10x10x12xf32, #tpu.memory_space<vmem>>, vector<8x8x12xf32>
    %56 = vector.shape_cast %55 : vector<8x8x12xf32> to vector<64x12xf32>
    %57 = arith.truncf %56 : vector<64x12xf32> to vector<64x12xbf16>
    %c0_38 = arith.constant 0 : index
    %c0_39 = arith.constant 0 : index
    %58 = vector.load %arg11[%c0_38, %c0_39] : memref<64x8xf32, #tpu.memory_space<vmem>>, vector<64x8xf32>
    %c0_40 = arith.constant 0 : index
    %c0_41 = arith.constant 0 : index
    %c0_42 = arith.constant 0 : index
    %c0_43 = arith.constant 0 : index
    %59 = vector.load %arg7[%c0_40, %c0_41, %c0_42, %c0_43] : memref<3x3x12x8xbf16, #tpu.memory_space<vmem>>, vector<1x1x12x8xbf16>
    %60 = vector.shape_cast %59 : vector<1x1x12x8xbf16> to vector<12x8xbf16>
    %cst_44 = arith.constant dense<0.000000e+00> : vector<64x8xf32>
    %61 = tpu.matmul %57, %60, %cst_44 {dimension_numbers = #tpu.dot_dimension_numbers<[1], [0], [0], [1], [0, 0, 1, 1], [], []>} : vector<64x12xbf16>, vector<12x8xbf16>, vector<64x8xf32> -> vector<64x8xf32>
    %62 = arith.addf %58, %61 : vector<64x8xf32>
    %c0_45 = arith.constant 0 : index
    %c0_46 = arith.constant 0 : index
    %63 = vector.load %arg11[%c0_45, %c0_46] : memref<64x8xf32, #tpu.memory_space<vmem>>, vector<64x8xf32>
    tpu.vector_store %arg11[%c0_45, %c0_46], %62 {strides = array<i32>} : memref<64x8xf32, #tpu.memory_space<vmem>>, vector<64x8xf32>,
    %c0_47 = arith.constant 0 : index
    %c1_48 = arith.constant 1 : index
    %c0_49 = arith.constant 0 : index
    %64 = vector.load %arg10[%c0_47, %c1_48, %c0_49] : memref<10x10x12xf32, #tpu.memory_space<vmem>>, vector<8x8x12xf32>
    %65 = vector.shape_cast %64 : vector<8x8x12xf32> to vector<64x12xf32>
    %66 = arith.truncf %65 : vector<64x12xf32> to vector<64x12xbf16>
    %c0_50 = arith.constant 0 : index
    %c0_51 = arith.constant 0 : index
    %67 = vector.load %arg11[%c0_50, %c0_51] : memref<64x8xf32, #tpu.memory_space<vmem>>, vector<64x8xf32>
    %c0_52 = arith.constant 0 : index
    %c1_53 = arith.constant 1 : index
    %c0_54 = arith.constant 0 : index
    %c0_55 = arith.constant 0 : index
    %68 = vector.load %arg7[%c0_52, %c1_53, %c0_54, %c0_55] : memref<3x3x12x8xbf16, #tpu.memory_space<vmem>>, vector<1x1x12x8xbf16>
    %69 = vector.shape_cast %68 : vector<1x1x12x8xbf16> to vector<12x8xbf16>
    %cst_56 = arith.constant dense<0.000000e+00> : vector<64x8xf32>
    %70 = tpu.matmul %66, %69, %cst_56 {dimension_numbers = #tpu.dot_dimension_numbers<[1], [0], [0], [1], [0, 0, 1, 1], [], []>} : vector<64x12xbf16>, vector<12x8xbf16>, vector<64x8xf32> -> vector<64x8xf32>
    %71 = arith.addf %67, %70 : vector<64x8xf32>
    %c0_57 = arith.constant 0 : index
    %c0_58 = arith.constant 0 : index
    %72 = vector.load %arg11[%c0_57, %c0_58] : memref<64x8xf32, #tpu.memory_space<vmem>>, vector<64x8xf32>
    tpu.vector_store %arg11[%c0_57, %c0_58], %71 {strides = array<i32>} : memref<64x8xf32, #tpu.memory_space<vmem>>, vector<64x8xf32>,
    %c0_59 = arith.constant 0 : index
    %c2 = arith.constant 2 : index
    %c0_60 = arith.constant 0 : index
    %73 = vector.load %arg10[%c0_59, %c2, %c0_60] : memref<10x10x12xf32, #tpu.memory_space<vmem>>, vector<8x8x12xf32>
    %74 = vector.shape_cast %73 : vector<8x8x12xf32> to vector<64x12xf32>
    %75 = arith.truncf %74 : vector<64x12xf32> to vector<64x12xbf16>
    %c0_61 = arith.constant 0 : index
    %c0_62 = arith.constant 0 : index
    %76 = vector.load %arg11[%c0_61, %c0_62] : memref<64x8xf32, #tpu.memory_space<vmem>>, vector<64x8xf32>
    %c0_63 = arith.constant 0 : index
    %c2_64 = arith.constant 2 : index
    %c0_65 = arith.constant 0 : index
    %c0_66 = arith.constant 0 : index
    %77 = vector.load %arg7[%c0_63, %c2_64, %c0_65, %c0_66] : memref<3x3x12x8xbf16, #tpu.memory_space<vmem>>, vector<1x1x12x8xbf16>
    %78 = vector.shape_cast %77 : vector<1x1x12x8xbf16> to vector<12x8xbf16>
    %cst_67 = arith.constant dense<0.000000e+00> : vector<64x8xf32>
    %79 = tpu.matmul %75, %78, %cst_67 {dimension_numbers = #tpu.dot_dimension_numbers<[1], [0], [0], [1], [0, 0, 1, 1], [], []>} : vector<64x12xbf16>, vector<12x8xbf16>, vector<64x8xf32> -> vector<64x8xf32>
    %80 = arith.addf %76, %79 : vector<64x8xf32>
    %c0_68 = arith.constant 0 : index
    %c0_69 = arith.constant 0 : index
    %81 = vector.load %arg11[%c0_68, %c0_69] : memref<64x8xf32, #tpu.memory_space<vmem>>, vector<64x8xf32>
    tpu.vector_store %arg11[%c0_68, %c0_69], %80 {strides = array<i32>} : memref<64x8xf32, #tpu.memory_space<vmem>>, vector<64x8xf32>,
    %c1_70 = arith.constant 1 : index
    %c0_71 = arith.constant 0 : index
    %c0_72 = arith.constant 0 : index
    %82 = vector.load %arg10[%c1_70, %c0_71, %c0_72] : memref<10x10x12xf32, #tpu.memory_space<vmem>>, vector<8x8x12xf32>
    %83 = vector.shape_cast %82 : vector<8x8x12xf32> to vector<64x12xf32>
    %84 = arith.truncf %83 : vector<64x12xf32> to vector<64x12xbf16>
    %c0_73 = arith.constant 0 : index
    %c0_74 = arith.constant 0 : index
    %85 = vector.load %arg11[%c0_73, %c0_74] : memref<64x8xf32, #tpu.memory_space<vmem>>, vector<64x8xf32>
    %c1_75 = arith.constant 1 : index
    %c0_76 = arith.constant 0 : index
    %c0_77 = arith.constant 0 : index
    %c0_78 = arith.constant 0 : index
    %86 = vector.load %arg7[%c1_75, %c0_76, %c0_77, %c0_78] : memref<3x3x12x8xbf16, #tpu.memory_space<vmem>>, vector<1x1x12x8xbf16>
    %87 = vector.shape_cast %86 : vector<1x1x12x8xbf16> to vector<12x8xbf16>
    %cst_79 = arith.constant dense<0.000000e+00> : vector<64x8xf32>
    %88 = tpu.matmul %84, %87, %cst_79 {dimension_numbers = #tpu.dot_dimension_numbers<[1], [0], [0], [1], [0, 0, 1, 1], [], []>} : vector<64x12xbf16>, vector<12x8xbf16>, vector<64x8xf32> -> vector<64x8xf32>
    %89 = arith.addf %85, %88 : vector<64x8xf32>
    %c0_80 = arith.constant 0 : index
    %c0_81 = arith.constant 0 : index
    %90 = vector.load %arg11[%c0_80, %c0_81] : memref<64x8xf32, #tpu.memory_space<vmem>>, vector<64x8xf32>
    tpu.vector_store %arg11[%c0_80, %c0_81], %89 {strides = array<i32>} : memref<64x8xf32, #tpu.memory_space<vmem>>, vector<64x8xf32>,
    %c1_82 = arith.constant 1 : index
    %c1_83 = arith.constant 1 : index
    %c0_84 = arith.constant 0 : index
    %91 = vector.load %arg10[%c1_82, %c1_83, %c0_84] : memref<10x10x12xf32, #tpu.memory_space<vmem>>, vector<8x8x12xf32>
    %92 = vector.shape_cast %91 : vector<8x8x12xf32> to vector<64x12xf32>
    %93 = arith.truncf %92 : vector<64x12xf32> to vector<64x12xbf16>
    %c0_85 = arith.constant 0 : index
    %c0_86 = arith.constant 0 : index
    %94 = vector.load %arg11[%c0_85, %c0_86] : memref<64x8xf32, #tpu.memory_space<vmem>>, vector<64x8xf32>
    %c1_87 = arith.constant 1 : index
    %c1_88 = arith.constant 1 : index
    %c0_89 = arith.constant 0 : index
    %c0_90 = arith.constant 0 : index
    %95 = vector.load %arg7[%c1_87, %c1_88, %c0_89, %c0_90] : memref<3x3x12x8xbf16, #tpu.memory_space<vmem>>, vector<1x1x12x8xbf16>
    %96 = vector.shape_cast %95 : vector<1x1x12x8xbf16> to vector<12x8xbf16>
    %cst_91 = arith.constant dense<0.000000e+00> : vector<64x8xf32>
    %97 = tpu.matmul %93, %96, %cst_91 {dimension_numbers = #tpu.dot_dimension_numbers<[1], [0], [0], [1], [0, 0, 1, 1], [], []>} : vector<64x12xbf16>, vector<12x8xbf16>, vector<64x8xf32> -> vector<64x8xf32>
    %98 = arith.addf %94, %97 : vector<64x8xf32>
    %c0_92 = arith.constant 0 : index
    %c0_93 = arith.constant 0 : index
    %99 = vector.load %arg11[%c0_92, %c0_93] : memref<64x8xf32, #tpu.memory_space<vmem>>, vector<64x8xf32>
    tpu.vector_store %arg11[%c0_92, %c0_93], %98 {strides = array<i32>} : memref<64x8xf32, #tpu.memory_space<vmem>>, vector<64x8xf32>,
    %c1_94 = arith.constant 1 : index
    %c2_95 = arith.constant 2 : index
    %c0_96 = arith.constant 0 : index
    %100 = vector.load %arg10[%c1_94, %c2_95, %c0_96] : memref<10x10x12xf32, #tpu.memory_space<vmem>>, vector<8x8x12xf32>
    %101 = vector.shape_cast %100 : vector<8x8x12xf32> to vector<64x12xf32>
    %102 = arith.truncf %101 : vector<64x12xf32> to vector<64x12xbf16>
    %c0_97 = arith.constant 0 : index
    %c0_98 = arith.constant 0 : index
    %103 = vector.load %arg11[%c0_97, %c0_98] : memref<64x8xf32, #tpu.memory_space<vmem>>, vector<64x8xf32>
    %c1_99 = arith.constant 1 : index
    %c2_100 = arith.constant 2 : index
    %c0_101 = arith.constant 0 : index
    %c0_102 = arith.constant 0 : index
    %104 = vector.load %arg7[%c1_99, %c2_100, %c0_101, %c0_102] : memref<3x3x12x8xbf16, #tpu.memory_space<vmem>>, vector<1x1x12x8xbf16>
    %105 = vector.shape_cast %104 : vector<1x1x12x8xbf16> to vector<12x8xbf16>
    %cst_103 = arith.constant dense<0.000000e+00> : vector<64x8xf32>
    %106 = tpu.matmul %102, %105, %cst_103 {dimension_numbers = #tpu.dot_dimension_numbers<[1], [0], [0], [1], [0, 0, 1, 1], [], []>} : vector<64x12xbf16>, vector<12x8xbf16>, vector<64x8xf32> -> vector<64x8xf32>
    %107 = arith.addf %103, %106 : vector<64x8xf32>
    %c0_104 = arith.constant 0 : index
    %c0_105 = arith.constant 0 : index
    %108 = vector.load %arg11[%c0_104, %c0_105] : memref<64x8xf32, #tpu.memory_space<vmem>>, vector<64x8xf32>
    tpu.vector_store %arg11[%c0_104, %c0_105], %107 {strides = array<i32>} : memref<64x8xf32, #tpu.memory_space<vmem>>, vector<64x8xf32>,
    %c2_106 = arith.constant 2 : index
    %c0_107 = arith.constant 0 : index
    %c0_108 = arith.constant 0 : index
    %109 = vector.load %arg10[%c2_106, %c0_107, %c0_108] : memref<10x10x12xf32, #tpu.memory_space<vmem>>, vector<8x8x12xf32>
    %110 = vector.shape_cast %109 : vector<8x8x12xf32> to vector<64x12xf32>
    %111 = arith.truncf %110 : vector<64x12xf32> to vector<64x12xbf16>
    %c0_109 = arith.constant 0 : index
    %c0_110 = arith.constant 0 : index
    %112 = vector.load %arg11[%c0_109, %c0_110] : memref<64x8xf32, #tpu.memory_space<vmem>>, vector<64x8xf32>
    %c2_111 = arith.constant 2 : index
    %c0_112 = arith.constant 0 : index
    %c0_113 = arith.constant 0 : index
    %c0_114 = arith.constant 0 : index
    %113 = vector.load %arg7[%c2_111, %c0_112, %c0_113, %c0_114] : memref<3x3x12x8xbf16, #tpu.memory_space<vmem>>, vector<1x1x12x8xbf16>
    %114 = vector.shape_cast %113 : vector<1x1x12x8xbf16> to vector<12x8xbf16>
    %cst_115 = arith.constant dense<0.000000e+00> : vector<64x8xf32>
    %115 = tpu.matmul %111, %114, %cst_115 {dimension_numbers = #tpu.dot_dimension_numbers<[1], [0], [0], [1], [0, 0, 1, 1], [], []>} : vector<64x12xbf16>, vector<12x8xbf16>, vector<64x8xf32> -> vector<64x8xf32>
    %116 = arith.addf %112, %115 : vector<64x8xf32>
    %c0_116 = arith.constant 0 : index
    %c0_117 = arith.constant 0 : index
    %117 = vector.load %arg11[%c0_116, %c0_117] : memref<64x8xf32, #tpu.memory_space<vmem>>, vector<64x8xf32>
    tpu.vector_store %arg11[%c0_116, %c0_117], %116 {strides = array<i32>} : memref<64x8xf32, #tpu.memory_space<vmem>>, vector<64x8xf32>,
    %c2_118 = arith.constant 2 : index
    %c1_119 = arith.constant 1 : index
    %c0_120 = arith.constant 0 : index
    %118 = vector.load %arg10[%c2_118, %c1_119, %c0_120] : memref<10x10x12xf32, #tpu.memory_space<vmem>>, vector<8x8x12xf32>
    %119 = vector.shape_cast %118 : vector<8x8x12xf32> to vector<64x12xf32>
    %120 = arith.truncf %119 : vector<64x12xf32> to vector<64x12xbf16>
    %c0_121 = arith.constant 0 : index
    %c0_122 = arith.constant 0 : index
    %121 = vector.load %arg11[%c0_121, %c0_122] : memref<64x8xf32, #tpu.memory_space<vmem>>, vector<64x8xf32>
    %c2_123 = arith.constant 2 : index
    %c1_124 = arith.constant 1 : index
    %c0_125 = arith.constant 0 : index
    %c0_126 = arith.constant 0 : index
    %122 = vector.load %arg7[%c2_123, %c1_124, %c0_125, %c0_126] : memref<3x3x12x8xbf16, #tpu.memory_space<vmem>>, vector<1x1x12x8xbf16>
    %123 = vector.shape_cast %122 : vector<1x1x12x8xbf16> to vector<12x8xbf16>
    %cst_127 = arith.constant dense<0.000000e+00> : vector<64x8xf32>
    %124 = tpu.matmul %120, %123, %cst_127 {dimension_numbers = #tpu.dot_dimension_numbers<[1], [0], [0], [1], [0, 0, 1, 1], [], []>} : vector<64x12xbf16>, vector<12x8xbf16>, vector<64x8xf32> -> vector<64x8xf32>
    %125 = arith.addf %121, %124 : vector<64x8xf32>
    %c0_128 = arith.constant 0 : index
    %c0_129 = arith.constant 0 : index
    %126 = vector.load %arg11[%c0_128, %c0_129] : memref<64x8xf32, #tpu.memory_space<vmem>>, vector<64x8xf32>
    tpu.vector_store %arg11[%c0_128, %c0_129], %125 {strides = array<i32>} : memref<64x8xf32, #tpu.memory_space<vmem>>, vector<64x8xf32>,
    %c2_130 = arith.constant 2 : index
    %c2_131 = arith.constant 2 : index
    %c0_132 = arith.constant 0 : index
    %127 = vector.load %arg10[%c2_130, %c2_131, %c0_132] : memref<10x10x12xf32, #tpu.memory_space<vmem>>, vector<8x8x12xf32>
    %128 = vector.shape_cast %127 : vector<8x8x12xf32> to vector<64x12xf32>
    %129 = arith.truncf %128 : vector<64x12xf32> to vector<64x12xbf16>
    %c0_133 = arith.constant 0 : index
    %c0_134 = arith.constant 0 : index
    %130 = vector.load %arg11[%c0_133, %c0_134] : memref<64x8xf32, #tpu.memory_space<vmem>>, vector<64x8xf32>
    %c2_135 = arith.constant 2 : index
    %c2_136 = arith.constant 2 : index
    %c0_137 = arith.constant 0 : index
    %c0_138 = arith.constant 0 : index
    %131 = vector.load %arg7[%c2_135, %c2_136, %c0_137, %c0_138] : memref<3x3x12x8xbf16, #tpu.memory_space<vmem>>, vector<1x1x12x8xbf16>
    %132 = vector.shape_cast %131 : vector<1x1x12x8xbf16> to vector<12x8xbf16>
    %cst_139 = arith.constant dense<0.000000e+00> : vector<64x8xf32>
    %133 = tpu.matmul %129, %132, %cst_139 {dimension_numbers = #tpu.dot_dimension_numbers<[1], [0], [0], [1], [0, 0, 1, 1], [], []>} : vector<64x12xbf16>, vector<12x8xbf16>, vector<64x8xf32> -> vector<64x8xf32>
    %134 = arith.addf %130, %133 : vector<64x8xf32>
    %c0_140 = arith.constant 0 : index
    %c0_141 = arith.constant 0 : index
    %135 = vector.load %arg11[%c0_140, %c0_141] : memref<64x8xf32, #tpu.memory_space<vmem>>, vector<64x8xf32>
    tpu.vector_store %arg11[%c0_140, %c0_141], %134 {strides = array<i32>} : memref<64x8xf32, #tpu.memory_space<vmem>>, vector<64x8xf32>,
    %c0_142 = arith.constant 0 : index
    %c0_143 = arith.constant 0 : index
    %136 = vector.load %arg11[%c0_142, %c0_143] : memref<64x8xf32, #tpu.memory_space<vmem>>, vector<64x8xf32>
    %c0_144 = arith.constant 0 : index
    %c0_145 = arith.constant 0 : index
    %137 = vector.load %arg8[%c0_144, %c0_145] : memref<1x8xf32, #tpu.memory_space<vmem>>, vector<1x8xf32>
    %138 = vector.broadcast %137 : vector<1x8xf32> to vector<64x8xf32>
    %139 = arith.addf %136, %138 : vector<64x8xf32>
    %c0_146 = arith.constant 0 : index
    %c0_147 = arith.constant 0 : index
    %c0_148 = arith.constant 0 : index
    %c0_149 = arith.constant 0 : index
    %140 = vector.load %arg9[%c0_146, %c0_147, %c0_148, %c0_149] : memref<1x1x64x8xf32, #tpu.memory_space<vmem>>, vector<1x1x64x8xf32>
    %141 = vector.shape_cast %140 : vector<1x1x64x8xf32> to vector<64x8xf32>
    %142 = vector.shape_cast %139 : vector<64x8xf32> to vector<1x1x64x8xf32>
    tpu.vector_store %arg9[%c0_146, %c0_147, %c0_148, %c0_149], %142 {strides = array<i32>} : memref<1x1x64x8xf32, #tpu.memory_space<vmem>>, vector<1x1x64x8xf32>,
    return
  }
  func.func @transform_0(%arg0: i32, %arg1: i32) -> (i32, i32, i32) {
    %c0_i32 = arith.constant 0 : i32
    %c0_i32_0 = arith.constant 0 : i32
    %c0_i32_1 = arith.constant 0 : i32
    return %arg0, %c0_i32, %c0_i32_0 : i32, i32, i32
  }
  func.func @transform_1(%arg0: i32, %arg1: i32) -> (i32, i32, i32) {
    %c0_i32 = arith.constant 0 : i32
    %c0_i32_0 = arith.constant 0 : i32
    %c0_i32_1 = arith.constant 0 : i32
    return %arg0, %c0_i32, %c0_i32_0 : i32, i32, i32
  }
  func.func @transform_2(%arg0: i32, %arg1: i32) -> (i32, i32, i32, i32, i32) {
    %c1_i32 = arith.constant 1 : i32
    %0 = arith.subi %arg1, %c1_i32 : i32
    %c0_i32 = arith.constant 0 : i32
    %1 = arith.maxsi %0, %c0_i32 : i32
    %c0_i32_0 = arith.constant 0 : i32
    %c0_i32_1 = arith.constant 0 : i32
    %c0_i32_2 = arith.constant 0 : i32
    %c0_i32_3 = arith.constant 0 : i32
    return %arg0, %1, %c0_i32_0, %c0_i32_1, %c0_i32_2 : i32, i32, i32, i32, i32
  }
  func.func @transform_3(%arg0: i32, %arg1: i32) -> (i32, i32, i32, i32, i32) {
    %c0_i32 = arith.constant 0 : i32
    %c0_i32_0 = arith.constant 0 : i32
    %c0_i32_1 = arith.constant 0 : i32
    %c0_i32_2 = arith.constant 0 : i32
    return %arg0, %arg1, %c0_i32, %c0_i32_0, %c0_i32_1 : i32, i32, i32, i32, i32
  }
  func.func @transform_4(%arg0: i32, %arg1: i32) -> (i32, i32, i32, i32, i32) {
    %c1_i32 = arith.constant 1 : i32
    %0 = arith.addi %arg1, %c1_i32 : i32
    %c7_i32 = arith.constant 7 : i32
    %1 = arith.minsi %0, %c7_i32 : i32
    %c0_i32 = arith.constant 0 : i32
    %c0_i32_0 = arith.constant 0 : i32
    %c0_i32_1 = arith.constant 0 : i32
    %c0_i32_2 = arith.constant 0 : i32
    return %arg0, %1, %c0_i32, %c0_i32_0, %c0_i32_1 : i32, i32, i32, i32, i32
  }
  func.func @transform_5(%arg0: i32, %arg1: i32) -> (i32, i32, i32, i32) {
    %c0_i32 = arith.constant 0 : i32
    %c0_i32_0 = arith.constant 0 : i32
    %c0_i32_1 = arith.constant 0 : i32
    %c0_i32_2 = arith.constant 0 : i32
    %c0_i32_3 = arith.constant 0 : i32
    return %c0_i32, %c0_i32_0, %c0_i32_1, %c0_i32_2 : i32, i32, i32, i32
  }
  func.func @transform_6(%arg0: i32, %arg1: i32) -> (i32, i32) {
    %c0_i32 = arith.constant 0 : i32
    %c0_i32_0 = arith.constant 0 : i32
    %c0_i32_1 = arith.constant 0 : i32
    return %c0_i32, %c0_i32_0 : i32, i32
  }
  func.func @transform_7(%arg0: i32, %arg1: i32) -> (i32, i32, i32, i32) {
    %c0_i32 = arith.constant 0 : i32
    %c0_i32_0 = arith.constant 0 : i32
    %c0_i32_1 = arith.constant 0 : i32
    return %arg0, %arg1, %c0_i32, %c0_i32_0 : i32, i32, i32, i32
  }
}

module attributes {stable_mosaic.version = 11 : i64} {
  func.func @_gn_stats_kernel(%arg0: i32, %arg1: i32, %arg2: memref<1x1x64x8xf32, #tpu.memory_space<vmem>>, %arg3: memref<1x1x8xf32, #tpu.memory_space<vmem>>, %arg4: memref<1x8xf32, #tpu.memory_space<vmem>>, %arg5: memref<1x8xf32, #tpu.memory_space<vmem>>, %arg6: memref<8x4xf32, #tpu.memory_space<vmem>>, %arg7: memref<4x8xf32, #tpu.memory_space<vmem>>, %arg8: memref<1x1x8xf32, #tpu.memory_space<vmem>>, %arg9: memref<1x1x8xf32, #tpu.memory_space<vmem>>, %arg10: memref<1x4xf32, #tpu.memory_space<vmem>>, %arg11: memref<1x4xf32, #tpu.memory_space<vmem>>) attributes {dimension_semantics = [#tpu.dimension_semantics<parallel>, #tpu.dimension_semantics<arbitrary>], iteration_bounds = array<i64: 2, 8>, scalar_prefetch = 0 : i64, scratch_operands = 2 : i64, tpu.core_type = #tpu.core_type<tc>, window_params = [{transform_indices = @transform_0, window_bounds = array<i64: 1, 1, 64, 8>}, {transform_indices = @transform_1, window_bounds = array<i64: 1, 1, 8>}, {pipeline_mode = #tpu.pipeline_mode<synchronous>, transform_indices = @transform_2, window_bounds = array<i64: 1, 8>}, {pipeline_mode = #tpu.pipeline_mode<synchronous>, transform_indices = @transform_3, window_bounds = array<i64: 1, 8>}, {pipeline_mode = #tpu.pipeline_mode<synchronous>, transform_indices = @transform_4, window_bounds = array<i64: 8, 4>}, {pipeline_mode = #tpu.pipeline_mode<synchronous>, transform_indices = @transform_5, window_bounds = array<i64: 4, 8>}, {transform_indices = @transform_6, window_bounds = array<i64: 1, 1, 8>}, {transform_indices = @transform_7, window_bounds = array<i64: 1, 1, 8>}]} {
    %c0 = arith.constant 0 : index
    %c0_0 = arith.constant 0 : index
    %c0_1 = arith.constant 0 : index
    %c0_2 = arith.constant 0 : index
    %0 = vector.load %arg2[%c0, %c0_0, %c0_1, %c0_2] : memref<1x1x64x8xf32, #tpu.memory_space<vmem>>, vector<1x1x64x8xf32>
    %1 = vector.shape_cast %0 : vector<1x1x64x8xf32> to vector<64x8xf32>
    %c0_3 = arith.constant 0 : index
    %c0_4 = arith.constant 0 : index
    %c0_5 = arith.constant 0 : index
    %2 = vector.load %arg3[%c0_3, %c0_4, %c0_5] : memref<1x1x8xf32, #tpu.memory_space<vmem>>, vector<1x1x8xf32>
    %3 = vector.shape_cast %2 : vector<1x1x8xf32> to vector<1x8xf32>
    %4 = vector.broadcast %3 : vector<1x8xf32> to vector<64x8xf32>
    %5 = arith.addf %1, %4 : vector<64x8xf32>
    %cst = arith.constant dense<0.000000e+00> : vector<8xf32>
    %6 = vector.multi_reduction <add>, %5, %cst [0] : vector<64x8xf32> to vector<8xf32>
    %7 = vector.shape_cast %6 : vector<8xf32> to vector<1x8xf32>
    %c0_6 = arith.constant 0 : index
    %c0_7 = arith.constant 0 : index
    %8 = vector.load %arg6[%c0_6, %c0_7] : memref<8x4xf32, #tpu.memory_space<vmem>>, vector<8x4xf32>
    %cst_8 = arith.constant dense<0.000000e+00> : vector<1x4xf32>
    %9 = tpu.matmul %7, %8, %cst_8 {dimension_numbers = #tpu.dot_dimension_numbers<[1], [0], [0], [1], [0, 0, 1, 1], [], []>} : vector<1x8xf32>, vector<8x4xf32>, vector<1x4xf32> -> vector<1x4xf32>
    %cst_9 = arith.constant 7.812500e-03 : f32
    %10 = vector.broadcast %cst_9 : f32 to vector<1x4xf32>
    %11 = arith.mulf %9, %10 : vector<1x4xf32>
    %c0_10 = arith.constant 0 : index
    %c0_11 = arith.constant 0 : index
    %12 = vector.load %arg7[%c0_10, %c0_11] : memref<4x8xf32, #tpu.memory_space<vmem>>, vector<4x8xf32>
    %cst_12 = arith.constant dense<0.000000e+00> : vector<1x8xf32>
    %13 = tpu.matmul %11, %12, %cst_12 {dimension_numbers = #tpu.dot_dimension_numbers<[1], [0], [0], [1], [0, 0, 1, 1], [], []>} : vector<1x4xf32>, vector<4x8xf32>, vector<1x8xf32> -> vector<1x8xf32>
    %14 = vector.broadcast %13 : vector<1x8xf32> to vector<64x8xf32>
    %15 = arith.subf %5, %14 : vector<64x8xf32>
    %16 = arith.mulf %15, %15 : vector<64x8xf32>
    %cst_13 = arith.constant dense<0.000000e+00> : vector<8xf32>
    %17 = vector.multi_reduction <add>, %16, %cst_13 [0] : vector<64x8xf32> to vector<8xf32>
    %18 = vector.shape_cast %17 : vector<8xf32> to vector<1x8xf32>
    %c0_14 = arith.constant 0 : index
    %c0_15 = arith.constant 0 : index
    %19 = vector.load %arg6[%c0_14, %c0_15] : memref<8x4xf32, #tpu.memory_space<vmem>>, vector<8x4xf32>
    %cst_16 = arith.constant dense<0.000000e+00> : vector<1x4xf32>
    %20 = tpu.matmul %18, %19, %cst_16 {dimension_numbers = #tpu.dot_dimension_numbers<[1], [0], [0], [1], [0, 0, 1, 1], [], []>} : vector<1x8xf32>, vector<8x4xf32>, vector<1x4xf32> -> vector<1x4xf32>
    %c0_i32 = arith.constant 0 : i32
    %21 = arith.cmpi eq, %arg1, %c0_i32 : i32
    %22 = arith.extui %21 : i1 to i32
    %c0_i32_17 = arith.constant 0 : i32
    %23 = arith.cmpi ne, %22, %c0_i32_17 : i32
    scf.if %23 {
      %c0_21 = arith.constant 0 : index
      %c0_22 = arith.constant 0 : index
      %30 = vector.load %arg10[%c0_21, %c0_22] : memref<1x4xf32, #tpu.memory_space<vmem>>, vector<1x4xf32>
      tpu.vector_store %arg10[%c0_21, %c0_22], %11 {strides = array<i32>} : memref<1x4xf32, #tpu.memory_space<vmem>>, vector<1x4xf32>,
      %c0_23 = arith.constant 0 : index
      %c0_24 = arith.constant 0 : index
      %31 = vector.load %arg11[%c0_23, %c0_24] : memref<1x4xf32, #tpu.memory_space<vmem>>, vector<1x4xf32>
      tpu.vector_store %arg11[%c0_23, %c0_24], %20 {strides = array<i32>} : memref<1x4xf32, #tpu.memory_space<vmem>>, vector<1x4xf32>,
    } else {
    }
    %c0_i32_18 = arith.constant 0 : i32
    %24 = arith.cmpi sgt, %arg1, %c0_i32_18 : i32
    %25 = arith.extui %24 : i1 to i32
    %c0_i32_19 = arith.constant 0 : i32
    %26 = arith.cmpi ne, %25, %c0_i32_19 : i32
    scf.if %26 {
      %c128_i32 = arith.constant 128 : i32
      %30 = arith.muli %arg1, %c128_i32 : i32
      %31 = arith.sitofp %30 : i32 to f32
      %cst_21 = arith.constant 1.280000e+02 : f32
      %32 = arith.addf %31, %cst_21 : f32
      %cst_22 = arith.constant 1.280000e+02 : f32
      %33 = arith.divf %cst_22, %32 : f32
      %c0_23 = arith.constant 0 : index
      %c0_24 = arith.constant 0 : index
      %34 = vector.load %arg10[%c0_23, %c0_24] : memref<1x4xf32, #tpu.memory_space<vmem>>, vector<1x4xf32>
      %35 = arith.subf %11, %34 : vector<1x4xf32>
      %c0_25 = arith.constant 0 : index
      %c0_26 = arith.constant 0 : index
      %36 = vector.load %arg10[%c0_25, %c0_26] : memref<1x4xf32, #tpu.memory_space<vmem>>, vector<1x4xf32>
      %37 = vector.broadcast %33 : f32 to vector<1x4xf32>
      %38 = arith.mulf %35, %37 : vector<1x4xf32>
      %39 = arith.addf %36, %38 : vector<1x4xf32>
      %c0_27 = arith.constant 0 : index
      %c0_28 = arith.constant 0 : index
      %40 = vector.load %arg10[%c0_27, %c0_28] : memref<1x4xf32, #tpu.memory_space<vmem>>, vector<1x4xf32>
      tpu.vector_store %arg10[%c0_27, %c0_28], %39 {strides = array<i32>} : memref<1x4xf32, #tpu.memory_space<vmem>>, vector<1x4xf32>,
      %c0_29 = arith.constant 0 : index
      %c0_30 = arith.constant 0 : index
      %41 = vector.load %arg11[%c0_29, %c0_30] : memref<1x4xf32, #tpu.memory_space<vmem>>, vector<1x4xf32>
      %42 = arith.addf %41, %20 : vector<1x4xf32>
      %43 = arith.mulf %35, %35 : vector<1x4xf32>
      %44 = arith.mulf %31, %33 : f32
      %45 = vector.broadcast %44 : f32 to vector<1x4xf32>
      %46 = arith.mulf %43, %45 : vector<1x4xf32>
      %47 = arith.addf %42, %46 : vector<1x4xf32>
      %c0_31 = arith.constant 0 : index
      %c0_32 = arith.constant 0 : index
      %48 = vector.load %arg11[%c0_31, %c0_32] : memref<1x4xf32, #tpu.memory_space<vmem>>, vector<1x4xf32>
      tpu.vector_store %arg11[%c0_31, %c0_32], %47 {strides = array<i32>} : memref<1x4xf32, #tpu.memory_space<vmem>>, vector<1x4xf32>,
    } else {
    }
    %c7_i32 = arith.constant 7 : i32
    %27 = arith.cmpi eq, %arg1, %c7_i32 : i32
    %28 = arith.extui %27 : i1 to i32
    %c0_i32_20 = arith.constant 0 : i32
    %29 = arith.cmpi ne, %28, %c0_i32_20 : i32
    scf.if %29 {
      %c0_21 = arith.constant 0 : index
      %c0_22 = arith.constant 0 : index
      %30 = vector.load %arg11[%c0_21, %c0_22] : memref<1x4xf32, #tpu.memory_space<vmem>>, vector<1x4xf32>
      %cst_23 = arith.constant 9.765625E-4 : f32
      %31 = vector.broadcast %cst_23 : f32 to vector<1x4xf32>
      %32 = arith.mulf %30, %31 : vector<1x4xf32>
      %cst_24 = arith.constant 9.99999974E-6 : f32
      %33 = vector.broadcast %cst_24 : f32 to vector<1x4xf32>
      %34 = arith.addf %32, %33 : vector<1x4xf32>
      %35 = math.rsqrt %34 : vector<1x4xf32>
      %c0_25 = arith.constant 0 : index
      %c0_26 = arith.constant 0 : index
      %36 = vector.load %arg7[%c0_25, %c0_26] : memref<4x8xf32, #tpu.memory_space<vmem>>, vector<4x8xf32>
      %cst_27 = arith.constant dense<0.000000e+00> : vector<1x8xf32>
      %37 = tpu.matmul %35, %36, %cst_27 {dimension_numbers = #tpu.dot_dimension_numbers<[1], [0], [0], [1], [0, 0, 1, 1], [], []>} : vector<1x4xf32>, vector<4x8xf32>, vector<1x8xf32> -> vector<1x8xf32>
      %c0_28 = arith.constant 0 : index
      %c0_29 = arith.constant 0 : index
      %38 = vector.load %arg10[%c0_28, %c0_29] : memref<1x4xf32, #tpu.memory_space<vmem>>, vector<1x4xf32>
      %c0_30 = arith.constant 0 : index
      %c0_31 = arith.constant 0 : index
      %39 = vector.load %arg7[%c0_30, %c0_31] : memref<4x8xf32, #tpu.memory_space<vmem>>, vector<4x8xf32>
      %cst_32 = arith.constant dense<0.000000e+00> : vector<1x8xf32>
      %40 = tpu.matmul %38, %39, %cst_32 {dimension_numbers = #tpu.dot_dimension_numbers<[1], [0], [0], [1], [0, 0, 1, 1], [], []>} : vector<1x4xf32>, vector<4x8xf32>, vector<1x8xf32> -> vector<1x8xf32>
      %c0_33 = arith.constant 0 : index
      %c0_34 = arith.constant 0 : index
      %41 = vector.load %arg4[%c0_33, %c0_34] : memref<1x8xf32, #tpu.memory_space<vmem>>, vector<1x8xf32>
      %42 = arith.mulf %41, %37 : vector<1x8xf32>
      %c0_35 = arith.constant 0 : index
      %c0_36 = arith.constant 0 : index
      %c0_37 = arith.constant 0 : index
      %43 = vector.load %arg8[%c0_35, %c0_36, %c0_37] : memref<1x1x8xf32, #tpu.memory_space<vmem>>, vector<1x1x8xf32>
      %44 = vector.shape_cast %43 : vector<1x1x8xf32> to vector<1x8xf32>
      %45 = vector.shape_cast %42 : vector<1x8xf32> to vector<1x1x8xf32>
      tpu.vector_store %arg8[%c0_35, %c0_36, %c0_37], %45 {strides = array<i32>} : memref<1x1x8xf32, #tpu.memory_space<vmem>>, vector<1x1x8xf32>,
      %c0_38 = arith.constant 0 : index
      %c0_39 = arith.constant 0 : index
      %c0_40 = arith.constant 0 : index
      %46 = vector.load %arg3[%c0_38, %c0_39, %c0_40] : memref<1x1x8xf32, #tpu.memory_space<vmem>>, vector<1x1x8xf32>
      %47 = vector.shape_cast %46 : vector<1x1x8xf32> to vector<1x8xf32>
      %48 = arith.subf %47, %40 : vector<1x8xf32>
      %49 = arith.mulf %48, %42 : vector<1x8xf32>
      %c0_41 = arith.constant 0 : index
      %c0_42 = arith.constant 0 : index
      %50 = vector.load %arg5[%c0_41, %c0_42] : memref<1x8xf32, #tpu.memory_space<vmem>>, vector<1x8xf32>
      %51 = arith.addf %49, %50 : vector<1x8xf32>
      %c0_43 = arith.constant 0 : index
      %c0_44 = arith.constant 0 : index
      %c0_45 = arith.constant 0 : index
      %52 = vector.load %arg9[%c0_43, %c0_44, %c0_45] : memref<1x1x8xf32, #tpu.memory_space<vmem>>, vector<1x1x8xf32>
      %53 = vector.shape_cast %52 : vector<1x1x8xf32> to vector<1x8xf32>
      %54 = vector.shape_cast %51 : vector<1x8xf32> to vector<1x1x8xf32>
      tpu.vector_store %arg9[%c0_43, %c0_44, %c0_45], %54 {strides = array<i32>} : memref<1x1x8xf32, #tpu.memory_space<vmem>>, vector<1x1x8xf32>,
    } else {
    }
    return
  }
  func.func @transform_0(%arg0: i32, %arg1: i32) -> (i32, i32, i32, i32) {
    %c0_i32 = arith.constant 0 : i32
    %c0_i32_0 = arith.constant 0 : i32
    %c0_i32_1 = arith.constant 0 : i32
    return %arg0, %arg1, %c0_i32, %c0_i32_0 : i32, i32, i32, i32
  }
  func.func @transform_1(%arg0: i32, %arg1: i32) -> (i32, i32, i32) {
    %c0_i32 = arith.constant 0 : i32
    %c0_i32_0 = arith.constant 0 : i32
    %c0_i32_1 = arith.constant 0 : i32
    return %arg0, %c0_i32, %c0_i32_0 : i32, i32, i32
  }
  func.func @transform_2(%arg0: i32, %arg1: i32) -> (i32, i32) {
    %c0_i32 = arith.constant 0 : i32
    %c0_i32_0 = arith.constant 0 : i32
    %c0_i32_1 = arith.constant 0 : i32
    return %c0_i32, %c0_i32_0 : i32, i32
  }
  func.func @transform_3(%arg0: i32, %arg1: i32) -> (i32, i32) {
    %c0_i32 = arith.constant 0 : i32
    %c0_i32_0 = arith.constant 0 : i32
    %c0_i32_1 = arith.constant 0 : i32
    return %c0_i32, %c0_i32_0 : i32, i32
  }
  func.func @transform_4(%arg0: i32, %arg1: i32) -> (i32, i32) {
    %c0_i32 = arith.constant 0 : i32
    %c0_i32_0 = arith.constant 0 : i32
    %c0_i32_1 = arith.constant 0 : i32
    return %c0_i32, %c0_i32_0 : i32, i32
  }
  func.func @transform_5(%arg0: i32, %arg1: i32) -> (i32, i32) {
    %c0_i32 = arith.constant 0 : i32
    %c0_i32_0 = arith.constant 0 : i32
    %c0_i32_1 = arith.constant 0 : i32
    return %c0_i32, %c0_i32_0 : i32, i32
  }
  func.func @transform_6(%arg0: i32, %arg1: i32) -> (i32, i32, i32) {
    %c0_i32 = arith.constant 0 : i32
    %c0_i32_0 = arith.constant 0 : i32
    %c0_i32_1 = arith.constant 0 : i32
    return %arg0, %c0_i32, %c0_i32_0 : i32, i32, i32
  }
  func.func @transform_7(%arg0: i32, %arg1: i32) -> (i32, i32, i32) {
    %c0_i32 = arith.constant 0 : i32
    %c0_i32_0 = arith.constant 0 : i32
    %c0_i32_1 = arith.constant 0 : i32
    return %arg0, %c0_i32, %c0_i32_0 : i32, i32, i32
  }
}

module attributes {stable_mosaic.version = 11 : i64} {
  func.func @_fused_block_kernel(%arg0: i32, %arg1: i32, %arg2: memref<1x1x8xf32, #tpu.memory_space<vmem>>, %arg3: memref<1x1x8xf32, #tpu.memory_space<vmem>>, %arg4: memref<1x1x8x8x8xf32, #tpu.memory_space<vmem>>, %arg5: memref<1x1x8x8x8xf32, #tpu.memory_space<vmem>>, %arg6: memref<1x1x8x8x8xf32, #tpu.memory_space<vmem>>, %arg7: memref<3x3x24x8xbf16, #tpu.memory_space<vmem>>, %arg8: memref<1x8xf32, #tpu.memory_space<vmem>>, %arg9: memref<1x1x64x4xf32, #tpu.memory_space<vmem>>, %arg10: memref<4x8xf32, #tpu.memory_space<vmem>>, %arg11: memref<1x8xf32, #tpu.memory_space<vmem>>, %arg12: memref<1x1x64x8xf32, #tpu.memory_space<vmem>>, %arg13: memref<10x10x24xf32, #tpu.memory_space<vmem>>, %arg14: memref<64x8xf32, #tpu.memory_space<vmem>>) attributes {dimension_semantics = [#tpu.dimension_semantics<parallel>, #tpu.dimension_semantics<parallel>], iteration_bounds = array<i64: 2, 8>, scalar_prefetch = 0 : i64, scratch_operands = 2 : i64, tpu.core_type = #tpu.core_type<tc>, window_params = [{transform_indices = @transform_0, window_bounds = array<i64: 1, 1, 8>}, {transform_indices = @transform_1, window_bounds = array<i64: 1, 1, 8>}, {transform_indices = @transform_2, window_bounds = array<i64: 1, 1, 8, 8, 8>}, {transform_indices = @transform_3, window_bounds = array<i64: 1, 1, 8, 8, 8>}, {transform_indices = @transform_4, window_bounds = array<i64: 1, 1, 8, 8, 8>}, {pipeline_mode = #tpu.pipeline_mode<synchronous>, transform_indices = @transform_5, window_bounds = array<i64: 3, 3, 24, 8>}, {pipeline_mode = #tpu.pipeline_mode<synchronous>, transform_indices = @transform_6, window_bounds = array<i64: 1, 8>}, {transform_indices = @transform_7, window_bounds = array<i64: 1, 1, 64, 4>}, {pipeline_mode = #tpu.pipeline_mode<synchronous>, transform_indices = @transform_8, window_bounds = array<i64: 4, 8>}, {pipeline_mode = #tpu.pipeline_mode<synchronous>, transform_indices = @transform_9, window_bounds = array<i64: 1, 8>}, {transform_indices = @transform_10, window_bounds = array<i64: 1, 1, 64, 8>}]} {
    %c0_i32 = arith.constant 0 : i32
    %0 = arith.cmpi sgt, %arg1, %c0_i32 : i32
    %1 = arith.extui %0 : i1 to i32
    %2 = arith.sitofp %1 : i32 to f32
    %c7_i32 = arith.constant 7 : i32
    %3 = arith.cmpi slt, %arg1, %c7_i32 : i32
    %4 = arith.extui %3 : i1 to i32
    %5 = arith.sitofp %4 : i32 to f32
    %c0 = arith.constant 0 : index
    %c0_0 = arith.constant 0 : index
    %c0_1 = arith.constant 0 : index
    %6 = vector.load %arg2[%c0, %c0_0, %c0_1] : memref<1x1x8xf32, #tpu.memory_space<vmem>>, vector<1x1x8xf32>
    %c0_2 = arith.constant 0 : index
    %c0_3 = arith.constant 0 : index
    %c0_4 = arith.constant 0 : index
    %7 = vector.load %arg3[%c0_2, %c0_3, %c0_4] : memref<1x1x8xf32, #tpu.memory_space<vmem>>, vector<1x1x8xf32>
    %cst = arith.constant 0.000000e+00 : f32
    %8 = vector.broadcast %cst : f32 to vector<10x10x24xf32>
    %c0_5 = arith.constant 0 : index
    %c0_6 = arith.constant 0 : index
    %c0_7 = arith.constant 0 : index
    %9 = vector.load %arg13[%c0_5, %c0_6, %c0_7] : memref<10x10x24xf32, #tpu.memory_space<vmem>>, vector<10x10x24xf32>
    tpu.vector_store %arg13[%c0_5, %c0_6, %c0_7], %8 {strides = array<i32>} : memref<10x10x24xf32, #tpu.memory_space<vmem>>, vector<10x10x24xf32>,
    %c0_8 = arith.constant 0 : index
    %c0_9 = arith.constant 0 : index
    %c0_10 = arith.constant 0 : index
    %c0_11 = arith.constant 0 : index
    %c0_12 = arith.constant 0 : index
    %10 = vector.load %arg4[%c0_8, %c0_9, %c0_10, %c0_11, %c0_12] : memref<1x1x8x8x8xf32, #tpu.memory_space<vmem>>, vector<1x1x8x8x8xf32>
    %11 = vector.shape_cast %10 : vector<1x1x8x8x8xf32> to vector<8x8x8xf32>
    %12 = vector.broadcast %6 : vector<1x1x8xf32> to vector<8x8x8xf32>
    %13 = arith.mulf %11, %12 : vector<8x8x8xf32>
    %14 = vector.broadcast %7 : vector<1x1x8xf32> to vector<8x8x8xf32>
    %15 = arith.addf %13, %14 : vector<8x8x8xf32>
    %16 = arith.negf %15 : vector<8x8x8xf32>
    %17 = math.exp %16 : vector<8x8x8xf32>
    %cst_13 = arith.constant 1.000000e+00 : f32
    %18 = vector.broadcast %cst_13 : f32 to vector<8x8x8xf32>
    %19 = arith.addf %18, %17 : vector<8x8x8xf32>
    %20 = arith.divf %18, %19 : vector<8x8x8xf32>
    %21 = arith.mulf %15, %20 : vector<8x8x8xf32>
    %22 = vector.broadcast %2 : f32 to vector<8x8x8xf32>
    %23 = arith.mulf %21, %22 : vector<8x8x8xf32>
    %c1 = arith.constant 1 : index
    %c1_14 = arith.constant 1 : index
    %c0_15 = arith.constant 0 : index
    %24 = vector.load %arg13[%c1, %c1_14, %c0_15] : memref<10x10x24xf32, #tpu.memory_space<vmem>>, vector<8x8x8xf32>
    tpu.vector_store %arg13[%c1, %c1_14, %c0_15], %23 {strides = array<i32>} : memref<10x10x24xf32, #tpu.memory_space<vmem>>, vector<8x8x8xf32>,
    %c0_16 = arith.constant 0 : index
    %c0_17 = arith.constant 0 : index
    %c0_18 = arith.constant 0 : index
    %c0_19 = arith.constant 0 : index
    %c0_20 = arith.constant 0 : index
    %25 = vector.load %arg5[%c0_16, %c0_17, %c0_18, %c0_19, %c0_20] : memref<1x1x8x8x8xf32, #tpu.memory_space<vmem>>, vector<1x1x8x8x8xf32>
    %26 = vector.shape_cast %25 : vector<1x1x8x8x8xf32> to vector<8x8x8xf32>
    %27 = vector.broadcast %6 : vector<1x1x8xf32> to vector<8x8x8xf32>
    %28 = arith.mulf %26, %27 : vector<8x8x8xf32>
    %29 = vector.broadcast %7 : vector<1x1x8xf32> to vector<8x8x8xf32>
    %30 = arith.addf %28, %29 : vector<8x8x8xf32>
    %31 = arith.negf %30 : vector<8x8x8xf32>
    %32 = math.exp %31 : vector<8x8x8xf32>
    %cst_21 = arith.constant 1.000000e+00 : f32
    %33 = vector.broadcast %cst_21 : f32 to vector<8x8x8xf32>
    %34 = arith.addf %33, %32 : vector<8x8x8xf32>
    %35 = arith.divf %33, %34 : vector<8x8x8xf32>
    %36 = arith.mulf %30, %35 : vector<8x8x8xf32>
    %c1_22 = arith.constant 1 : index
    %c1_23 = arith.constant 1 : index
    %c8 = arith.constant 8 : index
    %37 = vector.load %arg13[%c1_22, %c1_23, %c8] : memref<10x10x24xf32, #tpu.memory_space<vmem>>, vector<8x8x8xf32>
    tpu.vector_store %arg13[%c1_22, %c1_23, %c8], %36 {strides = array<i32>} : memref<10x10x24xf32, #tpu.memory_space<vmem>>, vector<8x8x8xf32>,
    %c0_24 = arith.constant 0 : index
    %c0_25 = arith.constant 0 : index
    %c0_26 = arith.constant 0 : index
    %c0_27 = arith.constant 0 : index
    %c0_28 = arith.constant 0 : index
    %38 = vector.load %arg6[%c0_24, %c0_25, %c0_26, %c0_27, %c0_28] : memref<1x1x8x8x8xf32, #tpu.memory_space<vmem>>, vector<1x1x8x8x8xf32>
    %39 = vector.shape_cast %38 : vector<1x1x8x8x8xf32> to vector<8x8x8xf32>
    %40 = vector.broadcast %6 : vector<1x1x8xf32> to vector<8x8x8xf32>
    %41 = arith.mulf %39, %40 : vector<8x8x8xf32>
    %42 = vector.broadcast %7 : vector<1x1x8xf32> to vector<8x8x8xf32>
    %43 = arith.addf %41, %42 : vector<8x8x8xf32>
    %44 = arith.negf %43 : vector<8x8x8xf32>
    %45 = math.exp %44 : vector<8x8x8xf32>
    %cst_29 = arith.constant 1.000000e+00 : f32
    %46 = vector.broadcast %cst_29 : f32 to vector<8x8x8xf32>
    %47 = arith.addf %46, %45 : vector<8x8x8xf32>
    %48 = arith.divf %46, %47 : vector<8x8x8xf32>
    %49 = arith.mulf %43, %48 : vector<8x8x8xf32>
    %50 = vector.broadcast %5 : f32 to vector<8x8x8xf32>
    %51 = arith.mulf %49, %50 : vector<8x8x8xf32>
    %c1_30 = arith.constant 1 : index
    %c1_31 = arith.constant 1 : index
    %c16 = arith.constant 16 : index
    %52 = vector.load %arg13[%c1_30, %c1_31, %c16] : memref<10x10x24xf32, #tpu.memory_space<vmem>>, vector<8x8x8xf32>
    tpu.vector_store %arg13[%c1_30, %c1_31, %c16], %51 {strides = array<i32>} : memref<10x10x24xf32, #tpu.memory_space<vmem>>, vector<8x8x8xf32>,
    %cst_32 = arith.constant 0.000000e+00 : f32
    %53 = vector.broadcast %cst_32 : f32 to vector<64x8xf32>
    %c0_33 = arith.constant 0 : index
    %c0_34 = arith.constant 0 : index
    %54 = vector.load %arg14[%c0_33, %c0_34] : memref<64x8xf32, #tpu.memory_space<vmem>>, vector<64x8xf32>
    tpu.vector_store %arg14[%c0_33, %c0_34], %53 {strides = array<i32>} : memref<64x8xf32, #tpu.memory_space<vmem>>, vector<64x8xf32>,
    %c0_35 = arith.constant 0 : index
    %c0_36 = arith.constant 0 : index
    %c0_37 = arith.constant 0 : index
    %55 = vector.load %arg13[%c0_35, %c0_36, %c0_37] : memref<10x10x24xf32, #tpu.memory_space<vmem>>, vector<8x8x24xf32>
    %56 = vector.shape_cast %55 : vector<8x8x24xf32> to vector<64x24xf32>
    %57 = arith.truncf %56 : vector<64x24xf32> to vector<64x24xbf16>
    %c0_38 = arith.constant 0 : index
    %c0_39 = arith.constant 0 : index
    %58 = vector.load %arg14[%c0_38, %c0_39] : memref<64x8xf32, #tpu.memory_space<vmem>>, vector<64x8xf32>
    %c0_40 = arith.constant 0 : index
    %c0_41 = arith.constant 0 : index
    %c0_42 = arith.constant 0 : index
    %c0_43 = arith.constant 0 : index
    %59 = vector.load %arg7[%c0_40, %c0_41, %c0_42, %c0_43] : memref<3x3x24x8xbf16, #tpu.memory_space<vmem>>, vector<1x1x24x8xbf16>
    %60 = vector.shape_cast %59 : vector<1x1x24x8xbf16> to vector<24x8xbf16>
    %cst_44 = arith.constant dense<0.000000e+00> : vector<64x8xf32>
    %61 = tpu.matmul %57, %60, %cst_44 {dimension_numbers = #tpu.dot_dimension_numbers<[1], [0], [0], [1], [0, 0, 1, 1], [], []>} : vector<64x24xbf16>, vector<24x8xbf16>, vector<64x8xf32> -> vector<64x8xf32>
    %62 = arith.addf %58, %61 : vector<64x8xf32>
    %c0_45 = arith.constant 0 : index
    %c0_46 = arith.constant 0 : index
    %63 = vector.load %arg14[%c0_45, %c0_46] : memref<64x8xf32, #tpu.memory_space<vmem>>, vector<64x8xf32>
    tpu.vector_store %arg14[%c0_45, %c0_46], %62 {strides = array<i32>} : memref<64x8xf32, #tpu.memory_space<vmem>>, vector<64x8xf32>,
    %c0_47 = arith.constant 0 : index
    %c1_48 = arith.constant 1 : index
    %c0_49 = arith.constant 0 : index
    %64 = vector.load %arg13[%c0_47, %c1_48, %c0_49] : memref<10x10x24xf32, #tpu.memory_space<vmem>>, vector<8x8x24xf32>
    %65 = vector.shape_cast %64 : vector<8x8x24xf32> to vector<64x24xf32>
    %66 = arith.truncf %65 : vector<64x24xf32> to vector<64x24xbf16>
    %c0_50 = arith.constant 0 : index
    %c0_51 = arith.constant 0 : index
    %67 = vector.load %arg14[%c0_50, %c0_51] : memref<64x8xf32, #tpu.memory_space<vmem>>, vector<64x8xf32>
    %c0_52 = arith.constant 0 : index
    %c1_53 = arith.constant 1 : index
    %c0_54 = arith.constant 0 : index
    %c0_55 = arith.constant 0 : index
    %68 = vector.load %arg7[%c0_52, %c1_53, %c0_54, %c0_55] : memref<3x3x24x8xbf16, #tpu.memory_space<vmem>>, vector<1x1x24x8xbf16>
    %69 = vector.shape_cast %68 : vector<1x1x24x8xbf16> to vector<24x8xbf16>
    %cst_56 = arith.constant dense<0.000000e+00> : vector<64x8xf32>
    %70 = tpu.matmul %66, %69, %cst_56 {dimension_numbers = #tpu.dot_dimension_numbers<[1], [0], [0], [1], [0, 0, 1, 1], [], []>} : vector<64x24xbf16>, vector<24x8xbf16>, vector<64x8xf32> -> vector<64x8xf32>
    %71 = arith.addf %67, %70 : vector<64x8xf32>
    %c0_57 = arith.constant 0 : index
    %c0_58 = arith.constant 0 : index
    %72 = vector.load %arg14[%c0_57, %c0_58] : memref<64x8xf32, #tpu.memory_space<vmem>>, vector<64x8xf32>
    tpu.vector_store %arg14[%c0_57, %c0_58], %71 {strides = array<i32>} : memref<64x8xf32, #tpu.memory_space<vmem>>, vector<64x8xf32>,
    %c0_59 = arith.constant 0 : index
    %c2 = arith.constant 2 : index
    %c0_60 = arith.constant 0 : index
    %73 = vector.load %arg13[%c0_59, %c2, %c0_60] : memref<10x10x24xf32, #tpu.memory_space<vmem>>, vector<8x8x24xf32>
    %74 = vector.shape_cast %73 : vector<8x8x24xf32> to vector<64x24xf32>
    %75 = arith.truncf %74 : vector<64x24xf32> to vector<64x24xbf16>
    %c0_61 = arith.constant 0 : index
    %c0_62 = arith.constant 0 : index
    %76 = vector.load %arg14[%c0_61, %c0_62] : memref<64x8xf32, #tpu.memory_space<vmem>>, vector<64x8xf32>
    %c0_63 = arith.constant 0 : index
    %c2_64 = arith.constant 2 : index
    %c0_65 = arith.constant 0 : index
    %c0_66 = arith.constant 0 : index
    %77 = vector.load %arg7[%c0_63, %c2_64, %c0_65, %c0_66] : memref<3x3x24x8xbf16, #tpu.memory_space<vmem>>, vector<1x1x24x8xbf16>
    %78 = vector.shape_cast %77 : vector<1x1x24x8xbf16> to vector<24x8xbf16>
    %cst_67 = arith.constant dense<0.000000e+00> : vector<64x8xf32>
    %79 = tpu.matmul %75, %78, %cst_67 {dimension_numbers = #tpu.dot_dimension_numbers<[1], [0], [0], [1], [0, 0, 1, 1], [], []>} : vector<64x24xbf16>, vector<24x8xbf16>, vector<64x8xf32> -> vector<64x8xf32>
    %80 = arith.addf %76, %79 : vector<64x8xf32>
    %c0_68 = arith.constant 0 : index
    %c0_69 = arith.constant 0 : index
    %81 = vector.load %arg14[%c0_68, %c0_69] : memref<64x8xf32, #tpu.memory_space<vmem>>, vector<64x8xf32>
    tpu.vector_store %arg14[%c0_68, %c0_69], %80 {strides = array<i32>} : memref<64x8xf32, #tpu.memory_space<vmem>>, vector<64x8xf32>,
    %c1_70 = arith.constant 1 : index
    %c0_71 = arith.constant 0 : index
    %c0_72 = arith.constant 0 : index
    %82 = vector.load %arg13[%c1_70, %c0_71, %c0_72] : memref<10x10x24xf32, #tpu.memory_space<vmem>>, vector<8x8x24xf32>
    %83 = vector.shape_cast %82 : vector<8x8x24xf32> to vector<64x24xf32>
    %84 = arith.truncf %83 : vector<64x24xf32> to vector<64x24xbf16>
    %c0_73 = arith.constant 0 : index
    %c0_74 = arith.constant 0 : index
    %85 = vector.load %arg14[%c0_73, %c0_74] : memref<64x8xf32, #tpu.memory_space<vmem>>, vector<64x8xf32>
    %c1_75 = arith.constant 1 : index
    %c0_76 = arith.constant 0 : index
    %c0_77 = arith.constant 0 : index
    %c0_78 = arith.constant 0 : index
    %86 = vector.load %arg7[%c1_75, %c0_76, %c0_77, %c0_78] : memref<3x3x24x8xbf16, #tpu.memory_space<vmem>>, vector<1x1x24x8xbf16>
    %87 = vector.shape_cast %86 : vector<1x1x24x8xbf16> to vector<24x8xbf16>
    %cst_79 = arith.constant dense<0.000000e+00> : vector<64x8xf32>
    %88 = tpu.matmul %84, %87, %cst_79 {dimension_numbers = #tpu.dot_dimension_numbers<[1], [0], [0], [1], [0, 0, 1, 1], [], []>} : vector<64x24xbf16>, vector<24x8xbf16>, vector<64x8xf32> -> vector<64x8xf32>
    %89 = arith.addf %85, %88 : vector<64x8xf32>
    %c0_80 = arith.constant 0 : index
    %c0_81 = arith.constant 0 : index
    %90 = vector.load %arg14[%c0_80, %c0_81] : memref<64x8xf32, #tpu.memory_space<vmem>>, vector<64x8xf32>
    tpu.vector_store %arg14[%c0_80, %c0_81], %89 {strides = array<i32>} : memref<64x8xf32, #tpu.memory_space<vmem>>, vector<64x8xf32>,
    %c1_82 = arith.constant 1 : index
    %c1_83 = arith.constant 1 : index
    %c0_84 = arith.constant 0 : index
    %91 = vector.load %arg13[%c1_82, %c1_83, %c0_84] : memref<10x10x24xf32, #tpu.memory_space<vmem>>, vector<8x8x24xf32>
    %92 = vector.shape_cast %91 : vector<8x8x24xf32> to vector<64x24xf32>
    %93 = arith.truncf %92 : vector<64x24xf32> to vector<64x24xbf16>
    %c0_85 = arith.constant 0 : index
    %c0_86 = arith.constant 0 : index
    %94 = vector.load %arg14[%c0_85, %c0_86] : memref<64x8xf32, #tpu.memory_space<vmem>>, vector<64x8xf32>
    %c1_87 = arith.constant 1 : index
    %c1_88 = arith.constant 1 : index
    %c0_89 = arith.constant 0 : index
    %c0_90 = arith.constant 0 : index
    %95 = vector.load %arg7[%c1_87, %c1_88, %c0_89, %c0_90] : memref<3x3x24x8xbf16, #tpu.memory_space<vmem>>, vector<1x1x24x8xbf16>
    %96 = vector.shape_cast %95 : vector<1x1x24x8xbf16> to vector<24x8xbf16>
    %cst_91 = arith.constant dense<0.000000e+00> : vector<64x8xf32>
    %97 = tpu.matmul %93, %96, %cst_91 {dimension_numbers = #tpu.dot_dimension_numbers<[1], [0], [0], [1], [0, 0, 1, 1], [], []>} : vector<64x24xbf16>, vector<24x8xbf16>, vector<64x8xf32> -> vector<64x8xf32>
    %98 = arith.addf %94, %97 : vector<64x8xf32>
    %c0_92 = arith.constant 0 : index
    %c0_93 = arith.constant 0 : index
    %99 = vector.load %arg14[%c0_92, %c0_93] : memref<64x8xf32, #tpu.memory_space<vmem>>, vector<64x8xf32>
    tpu.vector_store %arg14[%c0_92, %c0_93], %98 {strides = array<i32>} : memref<64x8xf32, #tpu.memory_space<vmem>>, vector<64x8xf32>,
    %c1_94 = arith.constant 1 : index
    %c2_95 = arith.constant 2 : index
    %c0_96 = arith.constant 0 : index
    %100 = vector.load %arg13[%c1_94, %c2_95, %c0_96] : memref<10x10x24xf32, #tpu.memory_space<vmem>>, vector<8x8x24xf32>
    %101 = vector.shape_cast %100 : vector<8x8x24xf32> to vector<64x24xf32>
    %102 = arith.truncf %101 : vector<64x24xf32> to vector<64x24xbf16>
    %c0_97 = arith.constant 0 : index
    %c0_98 = arith.constant 0 : index
    %103 = vector.load %arg14[%c0_97, %c0_98] : memref<64x8xf32, #tpu.memory_space<vmem>>, vector<64x8xf32>
    %c1_99 = arith.constant 1 : index
    %c2_100 = arith.constant 2 : index
    %c0_101 = arith.constant 0 : index
    %c0_102 = arith.constant 0 : index
    %104 = vector.load %arg7[%c1_99, %c2_100, %c0_101, %c0_102] : memref<3x3x24x8xbf16, #tpu.memory_space<vmem>>, vector<1x1x24x8xbf16>
    %105 = vector.shape_cast %104 : vector<1x1x24x8xbf16> to vector<24x8xbf16>
    %cst_103 = arith.constant dense<0.000000e+00> : vector<64x8xf32>
    %106 = tpu.matmul %102, %105, %cst_103 {dimension_numbers = #tpu.dot_dimension_numbers<[1], [0], [0], [1], [0, 0, 1, 1], [], []>} : vector<64x24xbf16>, vector<24x8xbf16>, vector<64x8xf32> -> vector<64x8xf32>
    %107 = arith.addf %103, %106 : vector<64x8xf32>
    %c0_104 = arith.constant 0 : index
    %c0_105 = arith.constant 0 : index
    %108 = vector.load %arg14[%c0_104, %c0_105] : memref<64x8xf32, #tpu.memory_space<vmem>>, vector<64x8xf32>
    tpu.vector_store %arg14[%c0_104, %c0_105], %107 {strides = array<i32>} : memref<64x8xf32, #tpu.memory_space<vmem>>, vector<64x8xf32>,
    %c2_106 = arith.constant 2 : index
    %c0_107 = arith.constant 0 : index
    %c0_108 = arith.constant 0 : index
    %109 = vector.load %arg13[%c2_106, %c0_107, %c0_108] : memref<10x10x24xf32, #tpu.memory_space<vmem>>, vector<8x8x24xf32>
    %110 = vector.shape_cast %109 : vector<8x8x24xf32> to vector<64x24xf32>
    %111 = arith.truncf %110 : vector<64x24xf32> to vector<64x24xbf16>
    %c0_109 = arith.constant 0 : index
    %c0_110 = arith.constant 0 : index
    %112 = vector.load %arg14[%c0_109, %c0_110] : memref<64x8xf32, #tpu.memory_space<vmem>>, vector<64x8xf32>
    %c2_111 = arith.constant 2 : index
    %c0_112 = arith.constant 0 : index
    %c0_113 = arith.constant 0 : index
    %c0_114 = arith.constant 0 : index
    %113 = vector.load %arg7[%c2_111, %c0_112, %c0_113, %c0_114] : memref<3x3x24x8xbf16, #tpu.memory_space<vmem>>, vector<1x1x24x8xbf16>
    %114 = vector.shape_cast %113 : vector<1x1x24x8xbf16> to vector<24x8xbf16>
    %cst_115 = arith.constant dense<0.000000e+00> : vector<64x8xf32>
    %115 = tpu.matmul %111, %114, %cst_115 {dimension_numbers = #tpu.dot_dimension_numbers<[1], [0], [0], [1], [0, 0, 1, 1], [], []>} : vector<64x24xbf16>, vector<24x8xbf16>, vector<64x8xf32> -> vector<64x8xf32>
    %116 = arith.addf %112, %115 : vector<64x8xf32>
    %c0_116 = arith.constant 0 : index
    %c0_117 = arith.constant 0 : index
    %117 = vector.load %arg14[%c0_116, %c0_117] : memref<64x8xf32, #tpu.memory_space<vmem>>, vector<64x8xf32>
    tpu.vector_store %arg14[%c0_116, %c0_117], %116 {strides = array<i32>} : memref<64x8xf32, #tpu.memory_space<vmem>>, vector<64x8xf32>,
    %c2_118 = arith.constant 2 : index
    %c1_119 = arith.constant 1 : index
    %c0_120 = arith.constant 0 : index
    %118 = vector.load %arg13[%c2_118, %c1_119, %c0_120] : memref<10x10x24xf32, #tpu.memory_space<vmem>>, vector<8x8x24xf32>
    %119 = vector.shape_cast %118 : vector<8x8x24xf32> to vector<64x24xf32>
    %120 = arith.truncf %119 : vector<64x24xf32> to vector<64x24xbf16>
    %c0_121 = arith.constant 0 : index
    %c0_122 = arith.constant 0 : index
    %121 = vector.load %arg14[%c0_121, %c0_122] : memref<64x8xf32, #tpu.memory_space<vmem>>, vector<64x8xf32>
    %c2_123 = arith.constant 2 : index
    %c1_124 = arith.constant 1 : index
    %c0_125 = arith.constant 0 : index
    %c0_126 = arith.constant 0 : index
    %122 = vector.load %arg7[%c2_123, %c1_124, %c0_125, %c0_126] : memref<3x3x24x8xbf16, #tpu.memory_space<vmem>>, vector<1x1x24x8xbf16>
    %123 = vector.shape_cast %122 : vector<1x1x24x8xbf16> to vector<24x8xbf16>
    %cst_127 = arith.constant dense<0.000000e+00> : vector<64x8xf32>
    %124 = tpu.matmul %120, %123, %cst_127 {dimension_numbers = #tpu.dot_dimension_numbers<[1], [0], [0], [1], [0, 0, 1, 1], [], []>} : vector<64x24xbf16>, vector<24x8xbf16>, vector<64x8xf32> -> vector<64x8xf32>
    %125 = arith.addf %121, %124 : vector<64x8xf32>
    %c0_128 = arith.constant 0 : index
    %c0_129 = arith.constant 0 : index
    %126 = vector.load %arg14[%c0_128, %c0_129] : memref<64x8xf32, #tpu.memory_space<vmem>>, vector<64x8xf32>
    tpu.vector_store %arg14[%c0_128, %c0_129], %125 {strides = array<i32>} : memref<64x8xf32, #tpu.memory_space<vmem>>, vector<64x8xf32>,
    %c2_130 = arith.constant 2 : index
    %c2_131 = arith.constant 2 : index
    %c0_132 = arith.constant 0 : index
    %127 = vector.load %arg13[%c2_130, %c2_131, %c0_132] : memref<10x10x24xf32, #tpu.memory_space<vmem>>, vector<8x8x24xf32>
    %128 = vector.shape_cast %127 : vector<8x8x24xf32> to vector<64x24xf32>
    %129 = arith.truncf %128 : vector<64x24xf32> to vector<64x24xbf16>
    %c0_133 = arith.constant 0 : index
    %c0_134 = arith.constant 0 : index
    %130 = vector.load %arg14[%c0_133, %c0_134] : memref<64x8xf32, #tpu.memory_space<vmem>>, vector<64x8xf32>
    %c2_135 = arith.constant 2 : index
    %c2_136 = arith.constant 2 : index
    %c0_137 = arith.constant 0 : index
    %c0_138 = arith.constant 0 : index
    %131 = vector.load %arg7[%c2_135, %c2_136, %c0_137, %c0_138] : memref<3x3x24x8xbf16, #tpu.memory_space<vmem>>, vector<1x1x24x8xbf16>
    %132 = vector.shape_cast %131 : vector<1x1x24x8xbf16> to vector<24x8xbf16>
    %cst_139 = arith.constant dense<0.000000e+00> : vector<64x8xf32>
    %133 = tpu.matmul %129, %132, %cst_139 {dimension_numbers = #tpu.dot_dimension_numbers<[1], [0], [0], [1], [0, 0, 1, 1], [], []>} : vector<64x24xbf16>, vector<24x8xbf16>, vector<64x8xf32> -> vector<64x8xf32>
    %134 = arith.addf %130, %133 : vector<64x8xf32>
    %c0_140 = arith.constant 0 : index
    %c0_141 = arith.constant 0 : index
    %135 = vector.load %arg14[%c0_140, %c0_141] : memref<64x8xf32, #tpu.memory_space<vmem>>, vector<64x8xf32>
    tpu.vector_store %arg14[%c0_140, %c0_141], %134 {strides = array<i32>} : memref<64x8xf32, #tpu.memory_space<vmem>>, vector<64x8xf32>,
    %c0_142 = arith.constant 0 : index
    %c0_143 = arith.constant 0 : index
    %136 = vector.load %arg14[%c0_142, %c0_143] : memref<64x8xf32, #tpu.memory_space<vmem>>, vector<64x8xf32>
    %c0_144 = arith.constant 0 : index
    %c0_145 = arith.constant 0 : index
    %137 = vector.load %arg8[%c0_144, %c0_145] : memref<1x8xf32, #tpu.memory_space<vmem>>, vector<1x8xf32>
    %138 = vector.broadcast %137 : vector<1x8xf32> to vector<64x8xf32>
    %139 = arith.addf %136, %138 : vector<64x8xf32>
    %c0_146 = arith.constant 0 : index
    %c0_147 = arith.constant 0 : index
    %c0_148 = arith.constant 0 : index
    %c0_149 = arith.constant 0 : index
    %140 = vector.load %arg9[%c0_146, %c0_147, %c0_148, %c0_149] : memref<1x1x64x4xf32, #tpu.memory_space<vmem>>, vector<1x1x64x4xf32>
    %141 = vector.shape_cast %140 : vector<1x1x64x4xf32> to vector<64x4xf32>
    %c0_150 = arith.constant 0 : index
    %c0_151 = arith.constant 0 : index
    %142 = vector.load %arg10[%c0_150, %c0_151] : memref<4x8xf32, #tpu.memory_space<vmem>>, vector<4x8xf32>
    %cst_152 = arith.constant dense<0.000000e+00> : vector<64x8xf32>
    %143 = tpu.matmul %141, %142, %cst_152 {dimension_numbers = #tpu.dot_dimension_numbers<[1], [0], [0], [1], [0, 0, 1, 1], [], []>} : vector<64x4xf32>, vector<4x8xf32>, vector<64x8xf32> -> vector<64x8xf32>
    %144 = arith.addf %139, %143 : vector<64x8xf32>
    %c0_153 = arith.constant 0 : index
    %c0_154 = arith.constant 0 : index
    %145 = vector.load %arg11[%c0_153, %c0_154] : memref<1x8xf32, #tpu.memory_space<vmem>>, vector<1x8xf32>
    %146 = vector.broadcast %145 : vector<1x8xf32> to vector<64x8xf32>
    %147 = arith.addf %144, %146 : vector<64x8xf32>
    %c0_155 = arith.constant 0 : index
    %c0_156 = arith.constant 0 : index
    %c0_157 = arith.constant 0 : index
    %c0_158 = arith.constant 0 : index
    %148 = vector.load %arg12[%c0_155, %c0_156, %c0_157, %c0_158] : memref<1x1x64x8xf32, #tpu.memory_space<vmem>>, vector<1x1x64x8xf32>
    %149 = vector.shape_cast %148 : vector<1x1x64x8xf32> to vector<64x8xf32>
    %150 = vector.shape_cast %147 : vector<64x8xf32> to vector<1x1x64x8xf32>
    tpu.vector_store %arg12[%c0_155, %c0_156, %c0_157, %c0_158], %150 {strides = array<i32>} : memref<1x1x64x8xf32, #tpu.memory_space<vmem>>, vector<1x1x64x8xf32>,
    return
  }
  func.func @transform_0(%arg0: i32, %arg1: i32) -> (i32, i32, i32) {
    %c0_i32 = arith.constant 0 : i32
    %c0_i32_0 = arith.constant 0 : i32
    %c0_i32_1 = arith.constant 0 : i32
    return %arg0, %c0_i32, %c0_i32_0 : i32, i32, i32
  }
  func.func @transform_1(%arg0: i32, %arg1: i32) -> (i32, i32, i32) {
    %c0_i32 = arith.constant 0 : i32
    %c0_i32_0 = arith.constant 0 : i32
    %c0_i32_1 = arith.constant 0 : i32
    return %arg0, %c0_i32, %c0_i32_0 : i32, i32, i32
  }
  func.func @transform_2(%arg0: i32, %arg1: i32) -> (i32, i32, i32, i32, i32) {
    %c1_i32 = arith.constant 1 : i32
    %0 = arith.subi %arg1, %c1_i32 : i32
    %c0_i32 = arith.constant 0 : i32
    %1 = arith.maxsi %0, %c0_i32 : i32
    %c0_i32_0 = arith.constant 0 : i32
    %c0_i32_1 = arith.constant 0 : i32
    %c0_i32_2 = arith.constant 0 : i32
    %c0_i32_3 = arith.constant 0 : i32
    return %arg0, %1, %c0_i32_0, %c0_i32_1, %c0_i32_2 : i32, i32, i32, i32, i32
  }
  func.func @transform_3(%arg0: i32, %arg1: i32) -> (i32, i32, i32, i32, i32) {
    %c0_i32 = arith.constant 0 : i32
    %c0_i32_0 = arith.constant 0 : i32
    %c0_i32_1 = arith.constant 0 : i32
    %c0_i32_2 = arith.constant 0 : i32
    return %arg0, %arg1, %c0_i32, %c0_i32_0, %c0_i32_1 : i32, i32, i32, i32, i32
  }
  func.func @transform_4(%arg0: i32, %arg1: i32) -> (i32, i32, i32, i32, i32) {
    %c1_i32 = arith.constant 1 : i32
    %0 = arith.addi %arg1, %c1_i32 : i32
    %c7_i32 = arith.constant 7 : i32
    %1 = arith.minsi %0, %c7_i32 : i32
    %c0_i32 = arith.constant 0 : i32
    %c0_i32_0 = arith.constant 0 : i32
    %c0_i32_1 = arith.constant 0 : i32
    %c0_i32_2 = arith.constant 0 : i32
    return %arg0, %1, %c0_i32, %c0_i32_0, %c0_i32_1 : i32, i32, i32, i32, i32
  }
  func.func @transform_5(%arg0: i32, %arg1: i32) -> (i32, i32, i32, i32) {
    %c0_i32 = arith.constant 0 : i32
    %c0_i32_0 = arith.constant 0 : i32
    %c0_i32_1 = arith.constant 0 : i32
    %c0_i32_2 = arith.constant 0 : i32
    %c0_i32_3 = arith.constant 0 : i32
    return %c0_i32, %c0_i32_0, %c0_i32_1, %c0_i32_2 : i32, i32, i32, i32
  }
  func.func @transform_6(%arg0: i32, %arg1: i32) -> (i32, i32) {
    %c0_i32 = arith.constant 0 : i32
    %c0_i32_0 = arith.constant 0 : i32
    %c0_i32_1 = arith.constant 0 : i32
    return %c0_i32, %c0_i32_0 : i32, i32
  }
  func.func @transform_7(%arg0: i32, %arg1: i32) -> (i32, i32, i32, i32) {
    %c0_i32 = arith.constant 0 : i32
    %c0_i32_0 = arith.constant 0 : i32
    %c0_i32_1 = arith.constant 0 : i32
    return %arg0, %arg1, %c0_i32, %c0_i32_0 : i32, i32, i32, i32
  }
  func.func @transform_8(%arg0: i32, %arg1: i32) -> (i32, i32) {
    %c0_i32 = arith.constant 0 : i32
    %c0_i32_0 = arith.constant 0 : i32
    %c0_i32_1 = arith.constant 0 : i32
    return %c0_i32, %c0_i32_0 : i32, i32
  }
  func.func @transform_9(%arg0: i32, %arg1: i32) -> (i32, i32) {
    %c0_i32 = arith.constant 0 : i32
    %c0_i32_0 = arith.constant 0 : i32
    %c0_i32_1 = arith.constant 0 : i32
    return %c0_i32, %c0_i32_0 : i32, i32
  }
  func.func @transform_10(%arg0: i32, %arg1: i32) -> (i32, i32, i32, i32) {
    %c0_i32 = arith.constant 0 : i32
    %c0_i32_0 = arith.constant 0 : i32
    %c0_i32_1 = arith.constant 0 : i32
    return %arg0, %arg1, %c0_i32, %c0_i32_0 : i32, i32, i32, i32
  }
}

</mosaic_0001>

<bundles_post_ra>
// kernel: resnet_block_forward.7
= control target key start
LH: loop header
LB: loop body
LE: loop exit
PB: predicated region body
PF: predicated region fallthrough
CT: control target
= control target key end

     0   :  { %8 = vsyncpa [#allocation3], 0  ;;  %s172_s12 = smov [#allocation2]   ;;  %s220_s0 = inlined_call_operand.hbm [shape: f32[2,16], index: 0, kind: input, shape index: {}]   ;;  %s221_s1 = inlined_call_operand.vmem [shape: f32[16,8], index: 1, kind: input, shape index: {}]   ;;  %s222_s2 = inlined_call_operand.vmem [shape: f32[1,8], index: 2, kind: input, shape index: {}]   ;;  %s223_s3 = inlined_call_operand.vmem [shape: f32[2,8], index: 3, kind: output, shape index: {}]  }
   0x1   :  { %s15_s13 = sshll.u32 %s172_s12, 4  ;;  %s148_s16 = scalar_lea.hbm %s220_s0, 32  ;;  %s16_s13 = int_to_ptr.vmem [resolvable:$true] %s15_s13 }
   0x2   :  { %p149_p0 = scmp.ne.s32.totalorder %s220_s0, %s148_s16  ;;  %p152_p1 = scmp.lt.u32.totalorder %s148_s16, %s220_s0 }
   0x4   :  { %p154_p2 = pnand %p152_p1, %p149_p0 }
   0x6   :  { %157 = shalt.err (!%p154_p2)
}
   0x7   :  { %s158_s21 = scalar_lea.vmem %s16_s13, 32  ;;  %p163_p4 = scmp.lt.s32.totalorder %s16_s13, %s16_s13 }
   0x8   :  { %p159_p3 = scmp.ne.s32.totalorder %s16_s13, %s158_s21  ;;  %p164_p5 = scmp.lt.s32.totalorder %s158_s21, %s158_s21 }
   0xa   :  { %p165_p6 = por %p164_p5, %p163_p4 }
   0xc   :  { %p166_p7 = pnand %p165_p6, %p159_p3 }
   0xe   :  { %169 = shalt.err (!%p166_p7)
}
   0xf   :  { %18 = dma.hbm_to_vmem [thread:$0]  %s220_s0, 32, %s16_s13, [#allocation3]  }
  0x10   :  { %170 = dma.done.wait [#allocation3], 32  }
  0x11   :  { %171 = vsyncadd [#allocation3], 4294967264  ;;  %v173_v0 = vmov 0.0|0.0   ;;  %vm174_vm0 = vmmov 0   ;;  %v175_v1 = vmov 0.0   ;;  %v34_v2 = vld [vmem:[%s221_s1] sm:$0xff] }
  0x12   :  { %137 = vmatprep.subr.bf16.mxu0 %v173_v0  ;;  %134 = vmatprep.mubr.msk.f32.mxu0 %vm174_vm0, %v175_v1  ;;  %v35_v3 = vld [vmem:[%s221_s1 + $0x8] sm:$0xff]  ;;  %v26_v4 = vld [vmem:[#allocation2] sm:$0x3]  ;;  %vm43_vm1 = vcmask 130048   ;;  %vm117_vm2 = vcmask 58368  }
  0x13   :  { %v138_v5 = vpack.c.bf16 %v35_v3, %v34_v2  ;;  %v124_v6 = vmul.f32 -1.442695, %v26_v4  ;;  %v125_v11 = vld [vmem:[%s222_s2] ss:$0 sm:$0xff] }
  0x15   :  { %139 = vmatpush3.bf16.msra.mxu0 %v138_v5  ;;  %144 = vpow2.f32 %v124_v6 }
  0x1f   :  { %v145_v7 = vpop.eup %144 }
  0x20   :  { %v30_v8 = vadd.f32 1.0, %v145_v7 }
  0x22   :  { %146 = vrcp.f32 %v30_v8 }
  0x2c   :  { %v147_v9 = vpop.eup %146 }
  0x2d   :  { %v33_v10 = vmul.f32 %v147_v9, %v26_v4 }
  0x2f   :  { %135 = vmatmul.mubr.msk.f32.vlgmr.msra.gmra.mrb[0].mxu0 %vm43_vm1, %v33_v10 }
 0x102   :  { %v113_v12 = vpop.f32.mrb[0].mxu0 }
 0x103   :  { %v114_v13 = vadd.f32 %v125_v11, %v113_v12  ;;  %v136_v14 = vpop.f32.mrb[1].mxu0 }
 0x105   :  { %118 = vst.msk [vmem:[%s223_s3] sm:$0x3] %vm117_vm2, %v114_v13 }
 0x106   :  { %123 = vsyncpa [#allocation3], 1 }

// kernel: resnet_block_forward.5
= control target key start
LH: loop header
LB: loop body
LE: loop exit
PB: predicated region body
PF: predicated region fallthrough
CT: control target
= control target key end

     0   :  { %s1136_s24 = smov 0   ;;  %s1138_s25 = smov 0   ;;  %s1270_s0 = inlined_call_operand.vmem [shape: f32[2,8,64,4], index: 0, kind: input, shape index: {}]   ;;  %s1271_s1 = inlined_call_operand.vmem [shape: f32[2,1,4], index: 1, kind: input, shape index: {}]   ;;  %s1272_s2 = inlined_call_operand.vmem [shape: f32[1,4], index: 2, kind: input, shape index: {}]   ;;  %s1273_s3 = inlined_call_operand.vmem [shape: f32[1,4], index: 3, kind: input, shape index: {}]   ;;  %s1274_s4 = inlined_call_operand.vmem [shape: f32[4,4], index: 4, kind: input, shape index: {}]   ;;  %s1275_s5 = inlined_call_operand.vmem [shape: f32[4,4], index: 5, kind: input, shape index: {}]   ;;  %s1276_s6 = inlined_call_operand.vmem [shape: f32[2,1,4], index: 6, kind: output, shape index: {0}]   ;;  %s1277_s7 = inlined_call_operand.vmem [shape: f32[2,1,4], index: 7, kind: output, shape index: {1}]  }
   0x1   :  { %1278 = sst [smem:[#allocation4_spill]] %s1274_s4  ;;  %s1140_s26 = smov 0  }
   0x2   :  { %s1142_s27 = smov 0   ;;  %s1144_s28 = smov 0  }
   0x3 LB: > { %s27_s29 = sadd.s32 1, %s1082_s26  ;;  %s30_s30 = sadd.s32 1, %s1086_s27  ;;  %s1090_s28 = sphi %s1144_s28, %s18_s28   ;;  %s1086_s27 = sphi %s1142_s27, %s1283_s27   ;;  %s1082_s26 = sphi %s1140_s26, %s1282_s26   ;;  %s1078_s25 = sphi %s1138_s25, %s1281_s25   ;;  %s1074_s24 = sphi %s1136_s24, %s1280_s24  }
   0x4   : > { %p28_p0 = scmp.ge.s32.totalorder %s27_s29, 8  ;;  %p946_p1 = scmp.ge.s32.totalorder %s1090_s28, 1 }
   0x5   : > { %p266_p2 = scmp.lt.s32.totalorder %s1090_s28, 17 }
   0x6   : > { %s1285_s29 = smov (%p28_p0, %s27_s29), 0  ;;  %s1287_s30 = smov (!%p28_p0, %s30_s30), %s1086_s27 }
   0x7   : > { %p267_p3 = pnand %p946_p1, %p266_p2  ;;  %p32_p4 = scmp.ge.s32.totalorder %s1287_s30, 2 }
   0x8   : > { %s1279_s4 = sld [smem:[#allocation4_spill]] (!%p267_p3)  ;;  %vm373_vm0 = vcmask (!%p267_p3), 1043456   ;;  %p306_p5 = scmp.lt.s32.totalorder (!%p267_p3), %s1078_s25, 1  ;;  %v1092_v1 = vmov (!%p267_p3), 0.0   ;;  %vm1093_vm1 = vmmov (!%p267_p3), 0   ;;  %vm347_vm2 = vcmask (!%p267_p3), 31744  }
   0x9   : > { %s1289_s30 = smov (%p32_p4, %s1287_s30), 0  ;;  %270 = sbr.rel (%p267_p3) target bundleno = 1044 (0x414), region = 44 }
   0xa   : > { %977 = vmatprep.subr.mxu0 (!%p267_p3), %v1092_v1  ;;  %979 = vmatprep.mubr.msk.f32.mxu0 (!%p267_p3), %vm1093_vm1, %v1092_v1  ;;  %p308_p6 = scmp.lt.s32.totalorder (!%p267_p3), %s1074_s24, 7  ;;  %v448_v40 = vld [vmem:[%s1275_s5] sm:$0xf] (!%p267_p3)  ;;  %v525_v44 = vlaneseq (!%p267_p3)  ;;  %p957_p7 = scmp.ne.s32.totalorder (!%p267_p3), %s1074_s24, 0 }
   0xb   : > { %982 = vmatprep.subr.mxu1 (!%p267_p3), %v1092_v1  ;;  %984 = vmatprep.mubr.msk.f32.mxu1 (!%p267_p3), %vm1093_vm1, %v1092_v1 }
   0xc   : > { %983 = vmatpush3.msk.msra.mxu1 (!%p267_p3), %vm373_vm0, %v448_v40  ;;  %v526_v45 = vshrl.u32 (!%p267_p3), %v525_v44, 7 }
   0xe   : > { %v369_v0 = vld [vmem:[%s1279_s4] sm:$0xf] (!%p267_p3)  ;;  %v527_v46 = vsub.s32 (!%p267_p3), 0, %v526_v45 }
   0xf   : > { %978 = vmatpush3.msk.msra.mxu0 (!%p267_p3), %vm373_vm0, %v369_v0 }
  0x10   : > { %s1291_s25 = smov (!%p306_p5, %s1078_s25), 1  ;;  %987 = vmatprep.subr.mxu0 %v1092_v1  ;;  %vm643_vm3 = vcmask (!%p957_p7), 24576  }
  0x11   : > { %s309_s10 = scalar_select %p308_p6, %s1074_s24, 7 }
  0x12   : > { %s948_s11 = sshll.u32 %s1291_s25, 6  ;;  %s1183_s14 = scalar_lea.vmem %s1271_s1, %s1291_s25 }
  0x13   : > { %s947_s15 = sshll.u32 %s309_s10, 3  ;;  %s320_s18 = scalar_lea.vmem %s1276_s6, %s1291_s25  ;;  %v950_v2 = vld [vmem:[%s1183_s14] ss:$0 sm:$0xff] }
  0x14   : > { %s312_s19 = sadd.s32 %s948_s11, %s947_s15  ;;  %s323_s22 = scalar_lea.vmem %s1277_s7, %s1291_s25 }
  0x15   : > { %s949_s23 = sshll.u32 %s312_s19, 3 }
  0x16   : > { %s314_s4 = scalar_lea.vmem %s1270_s0, %s949_s23 }
  0x17   : > { %v324_v3 = vld [vmem:[%s314_s4] sm:$0xff]  ;;  %v325_v4 = vld [vmem:[%s314_s4 + $0x8] sm:$0xff]  ;;  %v326_v5 = vld [vmem:[%s314_s4 + $0x10] sm:$0xff] }
  0x18   : > { %v327_v6 = vld [vmem:[%s314_s4 + $0x18] sm:$0xff]  ;;  %v328_v7 = vld [vmem:[%s314_s4 + $0x20] sm:$0xff]  ;;  %v339_v8 = vadd.f32 %v950_v2, %v324_v3  ;;  %v340_v9 = vadd.f32 %v950_v2, %v325_v4  ;;  %v341_v10 = vadd.f32 %v950_v2, %v326_v5  ;;  %v329_v11 = vld [vmem:[%s314_s4 + $0x28] sm:$0xff] }
  0x19   : > { %v342_v12 = vadd.f32 %v950_v2, %v327_v6  ;;  %v343_v13 = vadd.f32 %v950_v2, %v328_v7  ;;  %v330_v16 = vld [vmem:[%s314_s4 + $0x30] sm:$0xff]  ;;  %v344_v19 = vadd.f32 %v950_v2, %v329_v11  ;;  %v331_v21 = vld [vmem:[%s314_s4 + $0x38] sm:$0xff] }
  0x1a   : > { %v348_v14 = vsel %vm347_vm2, %v339_v8, 0.0  ;;  %v349_v15 = vsel %vm347_vm2, %v340_v9, 0.0  ;;  %v351_v18 = vsel %vm347_vm2, %v341_v10, 0.0  ;;  %v345_v23 = vadd.f32 %v950_v2, %v330_v16 }
  0x1b   : > { %v350_v17 = vadd.f32 %v349_v15, %v348_v14  ;;  %v353_v20 = vsel %vm347_vm2, %v342_v12, 0.0  ;;  %v355_v24 = vsel %vm347_vm2, %v343_v13, 0.0  ;;  %v346_v26 = vadd.f32 %v950_v2, %v331_v21 }
  0x1c   : > { %v357_v27 = vsel %vm347_vm2, %v344_v19, 0.0  ;;  %v359_v29 = vsel %vm347_vm2, %v345_v23, 0.0 }
  0x1d   : > { %v352_v22 = vadd.f32 %v351_v18, %v350_v17  ;;  %v361_v31 = vsel %vm347_vm2, %v346_v26, 0.0 }
  0x1f   : > { %v354_v25 = vadd.f32 %v353_v20, %v352_v22 }
  0x21   : > { %v356_v28 = vadd.f32 %v355_v24, %v354_v25 }
  0x23   : > { %v358_v30 = vadd.f32 %v357_v27, %v356_v28 }
  0x25   : > { %v360_v32 = vadd.f32 %v359_v29, %v358_v30 }
  0x27   : > { %v362_v33 = vadd.f32 %v361_v31, %v360_v32 }
  0x29   : > { %v363_v34 = vrot.slane %v362_v33, 4 }
  0x2b   : > { %v364_v35 = vadd.f32 %v363_v34, %v362_v33 }
  0x2d   : > { %v365_v36 = vrot.slane %v364_v35, 2 }
  0x2f   : > { %v366_v37 = vadd.f32 %v365_v36, %v364_v35 }
  0x31   : > { %v367_v38 = vrot.slane %v366_v37, 1 }
  0x33   : > { %v368_v39 = vadd.f32 %v367_v38, %v366_v37 }
  0x35   : > { %980 = vmatmul.mubr.msk.f32.vlgmr.msra.gmra.mrb[0].mxu0 %vm347_vm2, %v368_v39 }
  0x36   : > { %988 = vmatpush3.msk.msra.mxu0 %vm373_vm0, %v369_v0  ;;  %989 = vmatprep.mubr.msk.f32.mxu0 %vm1093_vm1, %v1092_v1 }
 0x108   : > { %v443_v41 = vpop.f32.mrb[0].mxu0 }
 0x109   : > { %v1212_v42 = vmul.f32 0.015625, %v443_v41  ;;  %v981_v43 = vpop.f32.mrb[1].mxu0 }
 0x10b   : > { %985 = vmatmul.mubr.msk.f32.vlgmr.msra.gmra.mrb[0].mxu1 %vm347_vm2, %v1212_v42  ;;  %644 = vst.msk [vmem:[#allocation2] sm:$0x1] (!%p957_p7), %vm643_vm3, %v1212_v42 }
 0x1de   : > { %v521_v47 = vpop.f32.mrb[0].mxu1 }
 0x1df   : > { %v528_v48 = vrot.slane %v521_v47, %v527_v46  ;;  %v986_v49 = vpop.f32.mrb[1].mxu1 }
 0x1e1   : > { %v529_v50 = vsub.f32 %v339_v8, %v528_v48  ;;  %v530_v51 = vsub.f32 %v340_v9, %v528_v48  ;;  %v531_v52 = vsub.f32 %v341_v10, %v528_v48  ;;  %v532_v53 = vsub.f32 %v342_v12, %v528_v48 }
 0x1e2   : > { %v533_v54 = vsub.f32 %v343_v13, %v528_v48  ;;  %v534_v58 = vsub.f32 %v344_v19, %v528_v48  ;;  %v535_v63 = vsub.f32 %v345_v23, %v528_v48  ;;  %v536_v3 = vsub.f32 %v346_v26, %v528_v48 }
 0x1e3   : > { %v537_v55 = vmul.f32 %v529_v50, %v529_v50  ;;  %v538_v56 = vmul.f32 %v530_v51, %v530_v51  ;;  %v539_v57 = vmul.f32 %v531_v52, %v531_v52  ;;  %v540_v59 = vmul.f32 %v532_v53, %v532_v53 }
 0x1e4   : > { %v541_v0 = vmul.f32 %v533_v54, %v533_v54  ;;  %v542_v4 = vmul.f32 %v534_v58, %v534_v58  ;;  %v543_v7 = vmul.f32 %v535_v63, %v535_v63  ;;  %v544_v10 = vmul.f32 %v536_v3, %v536_v3 }
 0x1e5   : > { %v545_v60 = vsel %vm347_vm2, %v537_v55, 0.0  ;;  %v546_v61 = vsel %vm347_vm2, %v538_v56, 0.0  ;;  %v548_v1 = vsel %vm347_vm2, %v539_v57, 0.0  ;;  %v550_v5 = vsel %vm347_vm2, %v540_v59, 0.0 }
 0x1e6   : > { %v547_v62 = vadd.f32 %v546_v61, %v545_v60  ;;  %v552_v8 = vsel %vm347_vm2, %v541_v0, 0.0  ;;  %v554_v11 = vsel %vm347_vm2, %v542_v4, 0.0  ;;  %v556_v13 = vsel %vm347_vm2, %v543_v7, 0.0 }
 0x1e7   : > { %v558_v15 = vsel %vm347_vm2, %v544_v10, 0.0 }
 0x1e8   : > { %v549_v2 = vadd.f32 %v548_v1, %v547_v62 }
 0x1ea   : > { %v551_v6 = vadd.f32 %v550_v5, %v549_v2 }
 0x1ec   : > { %v553_v9 = vadd.f32 %v552_v8, %v551_v6 }
 0x1ee   : > { %v555_v12 = vadd.f32 %v554_v11, %v553_v9 }
 0x1f0   : > { %v557_v14 = vadd.f32 %v556_v13, %v555_v12 }
 0x1f2   : > { %v559_v16 = vadd.f32 %v558_v15, %v557_v14 }
 0x1f4   : > { %v560_v17 = vrot.slane %v559_v16, 4 }
 0x1f6   : > { %v561_v18 = vadd.f32 %v560_v17, %v559_v16 }
 0x1f8   : > { %v562_v19 = vrot.slane %v561_v18, 2 }
 0x1fa   : > { %v563_v20 = vadd.f32 %v562_v19, %v561_v18 }
 0x1fc   : > { %v564_v21 = vrot.slane %v563_v20, 1 }
 0x1fe   : > { %v565_v22 = vadd.f32 %v564_v21, %v563_v20 }
 0x200   : > { %990 = vmatmul.mubr.msk.f32.vlgmr.msra.gmra.mrb[2].mxu0 %vm347_vm2, %v565_v22 }
 0x2ce   : > { %642 = sbr.rel (%p957_p7) target bundleno = 725 (0x2d5), region = 48 }
 0x2d3   : > { %v635_v23 = vpop.f32.mrb[2].mxu0 }
 0x2d4   : > { %v991_v24 = vpop.f32.mrb[3].mxu0  ;;  %645 = vst.msk [vmem:[#allocation3] sm:$0x1] (!%p957_p7), %vm643_vm3, %v635_v23 }
 0x2d5 PF: > { %p958_p8 = scmp.le.s32.totalorder %s1074_s24, 0 }
 0x2d6   : > { %s959_s11 = sshll.u32 (!%p958_p8), %s1074_s24, 6  ;;  %v657_v27 = vld [vmem:[#allocation2] sm:$0x1] (!%p958_p8)  ;;  %vm662_vm4 = vcmask (!%p958_p8), 24576  }
 0x2d7   : > { %649 = sbr.rel (%p958_p8) target bundleno = 803 (0x323), region = 52  ;;  %s651_s12 = scvt.s32.f32 (!%p958_p8), %s959_s11  ;;  %v658_v28 = vsub.f32 (!%p958_p8), %v1212_v42, %v657_v27 }
 0x2d9   : > { %s652_s13 = sadd.f32 (!%p958_p8), 64.0, %s651_s12  ;;  %v666_v30 = vmul.f32 (!%p958_p8), %v658_v28, %v658_v28 }
 0x2db   : > { %v653_v25 = vstv (!%p958_p8), %s652_s13  ;;  %v664_v29 = vld [vmem:[#allocation3] sm:$0x1] (!%p958_p8) }
 0x2dc   : > { %1048 = vrcp.f32 (!%p958_p8), %v653_v25  ;;  %v665_v33 = vadd.f32 (!%p958_p8), %v664_v29, %v635_v23 }
 0x2e6   : > { %v1049_v26 = vpop.eup %1048 }
 0x2e7   : > { %1002 = vpush %v1049_v26 }
 0x318   : > { %s1003_s15 = spop %1002 }
 0x319   : > { %s656_s16 = smul.f32 64.0, %s1003_s15 }
 0x31b   : > { %v659_v31 = vstv %s656_s16  ;;  %s667_s17 = smul.f32 %s656_s16, %s651_s12 }
 0x31c   : > { %v660_v32 = vmul.f32 %v659_v31, %v658_v28 }
 0x31d   : > { %v668_v34 = vstv %s667_s17 }
 0x31e   : > { %v661_v35 = vadd.f32 %v660_v32, %v657_v27  ;;  %v669_v36 = vmul.f32 %v668_v34, %v666_v30 }
 0x320   : > { %663 = vst.msk [vmem:[#allocation2] sm:$0x1] %vm662_vm4, %v661_v35  ;;  %v670_v37 = vadd.f32 %v669_v36, %v665_v33 }
 0x322   : > { %671 = vst.msk [vmem:[#allocation3] sm:$0x1] %vm662_vm4, %v670_v37 }
 0x323 PF: > { %p960_p9 = scmp.ne.s32.totalorder %s1074_s24, 7 }
 0x324   : > { %v680_v38 = vld [vmem:[%s1275_s5] sm:$0xf] (!%p960_p9)  ;;  %v1094_v39 = vmov (!%p960_p9), 0.0   ;;  %vm1095_vm5 = vmmov (!%p960_p9), 0   ;;  %vm833_vm6 = vcmask (!%p960_p9), 24576  }
 0x325   : > { %675 = sbr.rel (%p960_p9) target bundleno = 1044 (0x414), region = 56  ;;  %997 = vmatprep.subr.mxu1 (!%p960_p9), %v1094_v39  ;;  %992 = vmatprep.subr.mxu0 (!%p960_p9), %v1094_v39  ;;  %v835_v47 = vld [vmem:[%s1183_s14] sm:$0x1] (!%p960_p9) }
 0x326   : > { %998 = vmatpush3.msk.msra.mxu1 (!%p960_p9), %vm373_vm0, %v680_v38  ;;  %999 = vmatprep.mubr.msk.f32.mxu1 (!%p960_p9), %vm1095_vm5, %v1094_v39  ;;  %v831_v48 = vld [vmem:[%s1272_s2] sm:$0x1] (!%p960_p9) }
 0x327   : > { %v757_v40 = vld [vmem:[#allocation2] sm:$0x1] (!%p960_p9)  ;;  %993 = vmatpush3.msk.msra.mxu0 (!%p960_p9), %vm373_vm0, %v680_v38  ;;  %994 = vmatprep.mubr.msk.f32.mxu0 (!%p960_p9), %vm1095_vm5, %v1094_v39 }
 0x328   : > { %1000 = vmatmul.mubr.msk.f32.vlgmr.msra.gmra.mrb[0].mxu1 (!%p960_p9), %vm347_vm2, %v757_v40  ;;  %v838_v53 = vld [vmem:[%s1273_s3] sm:$0x1] (!%p960_p9) }
 0x329   : > { %v676_v41 = vld [vmem:[#allocation3] sm:$0x1] (!%p960_p9) }
 0x32a   : > { %v677_v42 = vmul.f32 (!%p960_p9), 0.001953125, %v676_v41 }
 0x32c   : > { %v678_v43 = vadd.f32 1e-05, %v677_v42 }
 0x32e   : > { %1050 = vrsqrt.f32 %v678_v43 }
 0x338   : > { %v1051_v44 = vpop.eup %1050 }
 0x339   : > { %995 = vmatmul.mubr.msk.f32.vlgmr.msra.gmra.mrb[0].mxu0 %vm347_vm2, %v1051_v44 }
 0x3fb   : > { %v827_v45 = vpop.f32.mrb[0].mxu1 }
 0x3fc   : > { %v1001_v46 = vpop.f32.mrb[1].mxu1  ;;  %v836_v49 = vsub.f32 %v835_v47, %v827_v45 }
 0x40c   : > { %v753_v50 = vpop.f32.mrb[0].mxu0 }
 0x40d   : > { %v832_v51 = vmul.f32 %v831_v48, %v753_v50  ;;  %v996_v52 = vpop.f32.mrb[1].mxu0 }
 0x40f   : > { %834 = vst.msk [vmem:[%s320_s18] sm:$0x1] %vm833_vm6, %v832_v51  ;;  %v837_v54 = vmul.f32 %v836_v49, %v832_v51 }
 0x411   : > { %v839_v55 = vadd.f32 %v838_v53, %v837_v54 }
 0x413   : > { %840 = vst.msk [vmem:[%s323_s22] sm:$0x1] %vm833_vm6, %v839_v55 }
 0x414 PF: > { %s18_s28 = sadd.s32 1, %s1090_s28   ;;  %s1280_s24 = smov %s1082_s26 }
 0x415   : > { %p15_p10 = scmp.ge.s32.totalorder %s18_s28, 18   ;;  %s1281_s25 = smov %s1086_s27 }
 0x416   : > { %s1282_s26 = smov %s1285_s29  ;;  %s1283_s27 = smov %s1289_s30 }
 0x417   :  { %17 = sbr.rel (!%p15_p10) target bundleno = 3 (0x3), region = 101 }

// kernel: resnet_block_forward.8
= control target key start
LH: loop header
LB: loop body
LE: loop exit
PB: predicated region body
PF: predicated region fallthrough
CT: control target
= control target key end

     0   :  { %s1132_s24 = smov 0   ;;  %s1134_s25 = smov 0   ;;  %s1264_s0 = inlined_call_operand.vmem [shape: f32[2,8,64,8], index: 0, kind: input, shape index: {}]   ;;  %s1265_s1 = inlined_call_operand.vmem [shape: f32[2,1,8], index: 1, kind: input, shape index: {}]   ;;  %s1266_s2 = inlined_call_operand.vmem [shape: f32[1,8], index: 2, kind: input, shape index: {}]   ;;  %s1267_s3 = inlined_call_operand.vmem [shape: f32[1,8], index: 3, kind: input, shape index: {}]   ;;  %s1268_s4 = inlined_call_operand.vmem [shape: f32[8,4], index: 4, kind: input, shape index: {}]   ;;  %s1269_s5 = inlined_call_operand.vmem [shape: f32[4,8], index: 5, kind: input, shape index: {}]   ;;  %s1270_s6 = inlined_call_operand.vmem [shape: f32[2,1,8], index: 6, kind: output, shape index: {0}]   ;;  %s1271_s7 = inlined_call_operand.vmem [shape: f32[2,1,8], index: 7, kind: output, shape index: {1}]  }
   0x1   :  { %1272 = sst [smem:[#allocation4_spill]] %s1268_s4  ;;  %s1136_s26 = smov 0  }
   0x2   :  { %s1138_s27 = smov 0   ;;  %s1140_s28 = smov 0  }
   0x3 LB: > { %s27_s29 = sadd.s32 1, %s1078_s26  ;;  %s30_s30 = sadd.s32 1, %s1082_s27  ;;  %s1086_s28 = sphi %s1140_s28, %s18_s28   ;;  %s1082_s27 = sphi %s1138_s27, %s1277_s27   ;;  %s1078_s26 = sphi %s1136_s26, %s1276_s26   ;;  %s1074_s25 = sphi %s1134_s25, %s1275_s25   ;;  %s1070_s24 = sphi %s1132_s24, %s1274_s24  }
   0x4   : > { %p28_p0 = scmp.ge.s32.totalorder %s27_s29, 8  ;;  %p944_p1 = scmp.ge.s32.totalorder %s1086_s28, 1 }
   0x5   : > { %p266_p2 = scmp.lt.s32.totalorder %s1086_s28, 17 }
   0x6   : > { %s1279_s29 = smov (%p28_p0, %s27_s29), 0  ;;  %s1281_s30 = smov (!%p28_p0, %s30_s30), %s1082_s27 }
   0x7   : > { %p267_p3 = pnand %p944_p1, %p266_p2  ;;  %p32_p4 = scmp.ge.s32.totalorder %s1281_s30, 2 }
   0x8   : > { %s1273_s4 = sld [smem:[#allocation4_spill]] (!%p267_p3)  ;;  %p306_p5 = scmp.lt.s32.totalorder (!%p267_p3), %s1074_s25, 1  ;;  %v1088_v1 = vmov (!%p267_p3), 0.0   ;;  %vm1089_vm0 = vmmov (!%p267_p3), 0   ;;  %vm347_vm1 = vcmask (!%p267_p3), 64512   ;;  %vm449_vm2 = vcmask (!%p267_p3), 1043456  }
   0x9   : > { %s1283_s30 = smov (%p32_p4, %s1281_s30), 0  ;;  %270 = sbr.rel (%p267_p3) target bundleno = 1044 (0x414), region = 44 }
   0xa   : > { %p308_p6 = scmp.lt.s32.totalorder (!%p267_p3), %s1070_s24, 7  ;;  %973 = vmatprep.subr.mxu0 (!%p267_p3), %v1088_v1  ;;  %975 = vmatprep.mubr.msk.f32.mxu0 (!%p267_p3), %vm1089_vm0, %v1088_v1  ;;  %v444_v40 = vld [vmem:[%s1269_s5] sm:$0xf] (!%p267_p3)  ;;  %vm445_vm3 = vcmask (!%p267_p3), 31744   ;;  %v523_v44 = vlaneseq (!%p267_p3)  ;;  %p953_p7 = scmp.ne.s32.totalorder (!%p267_p3), %s1070_s24, 0 }
   0xb   : > { %978 = vmatprep.subr.mxu1 (!%p267_p3), %v1088_v1  ;;  %980 = vmatprep.mubr.msk.f32.mxu1 (!%p267_p3), %vm1089_vm0, %v1088_v1 }
   0xc   : > { %979 = vmatpush3.msk.msra.mxu1 (!%p267_p3), %vm449_vm2, %v444_v40  ;;  %v524_v45 = vshrl.u32 (!%p267_p3), %v523_v44, 7 }
   0xe   : > { %v369_v0 = vld [vmem:[%s1273_s4] sm:$0xff] (!%p267_p3)  ;;  %v525_v46 = vsub.s32 (!%p267_p3), 0, %v524_v45 }
   0xf   : > { %974 = vmatpush3.msra.mxu0 (!%p267_p3), %v369_v0 }
  0x10   : > { %s1285_s25 = smov (!%p306_p5, %s1074_s25), 1  ;;  %983 = vmatprep.subr.mxu0 %v1088_v1  ;;  %vm641_vm4 = vcmask (!%p953_p7), 24576  }
  0x11   : > { %s309_s10 = scalar_select %p308_p6, %s1070_s24, 7 }
  0x12   : > { %s946_s11 = sshll.u32 %s1285_s25, 6  ;;  %s1178_s14 = scalar_lea.vmem %s1265_s1, %s1285_s25 }
  0x13   : > { %s945_s15 = sshll.u32 %s309_s10, 3  ;;  %s320_s18 = scalar_lea.vmem %s1270_s6, %s1285_s25  ;;  %v948_v2 = vld [vmem:[%s1178_s14] ss:$0 sm:$0xff] }
  0x14   : > { %s312_s19 = sadd.s32 %s946_s11, %s945_s15  ;;  %s323_s22 = scalar_lea.vmem %s1271_s7, %s1285_s25 }
  0x15   : > { %s947_s23 = sshll.u32 %s312_s19, 3 }
  0x16   : > { %s314_s4 = scalar_lea.vmem %s1264_s0, %s947_s23 }
  0x17   : > { %v324_v3 = vld [vmem:[%s314_s4] sm:$0xff]  ;;  %v325_v4 = vld [vmem:[%s314_s4 + $0x8] sm:$0xff]  ;;  %v326_v5 = vld [vmem:[%s314_s4 + $0x10] sm:$0xff] }
  0x18   : > { %v327_v6 = vld [vmem:[%s314_s4 + $0x18] sm:$0xff]  ;;  %v328_v7 = vld [vmem:[%s314_s4 + $0x20] sm:$0xff]  ;;  %v339_v8 = vadd.f32 %v948_v2, %v324_v3  ;;  %v340_v9 = vadd.f32 %v948_v2, %v325_v4  ;;  %v341_v10 = vadd.f32 %v948_v2, %v326_v5  ;;  %v329_v11 = vld [vmem:[%s314_s4 + $0x28] sm:$0xff] }
  0x19   : > { %v342_v12 = vadd.f32 %v948_v2, %v327_v6  ;;  %v343_v13 = vadd.f32 %v948_v2, %v328_v7  ;;  %v330_v16 = vld [vmem:[%s314_s4 + $0x30] sm:$0xff]  ;;  %v344_v19 = vadd.f32 %v948_v2, %v329_v11  ;;  %v331_v21 = vld [vmem:[%s314_s4 + $0x38] sm:$0xff] }
  0x1a   : > { %v348_v14 = vsel %vm347_vm1, %v339_v8, 0.0  ;;  %v349_v15 = vsel %vm347_vm1, %v340_v9, 0.0  ;;  %v351_v18 = vsel %vm347_vm1, %v341_v10, 0.0  ;;  %v345_v23 = vadd.f32 %v948_v2, %v330_v16 }
  0x1b   : > { %v350_v17 = vadd.f32 %v349_v15, %v348_v14  ;;  %v353_v20 = vsel %vm347_vm1, %v342_v12, 0.0  ;;  %v355_v24 = vsel %vm347_vm1, %v343_v13, 0.0  ;;  %v346_v26 = vadd.f32 %v948_v2, %v331_v21 }
  0x1c   : > { %v357_v27 = vsel %vm347_vm1, %v344_v19, 0.0  ;;  %v359_v29 = vsel %vm347_vm1, %v345_v23, 0.0 }
  0x1d   : > { %v352_v22 = vadd.f32 %v351_v18, %v350_v17  ;;  %v361_v31 = vsel %vm347_vm1, %v346_v26, 0.0 }
  0x1f   : > { %v354_v25 = vadd.f32 %v353_v20, %v352_v22 }
  0x21   : > { %v356_v28 = vadd.f32 %v355_v24, %v354_v25 }
  0x23   : > { %v358_v30 = vadd.f32 %v357_v27, %v356_v28 }
  0x25   : > { %v360_v32 = vadd.f32 %v359_v29, %v358_v30 }
  0x27   : > { %v362_v33 = vadd.f32 %v361_v31, %v360_v32 }
  0x29   : > { %v363_v34 = vrot.slane %v362_v33, 4 }
  0x2b   : > { %v364_v35 = vadd.f32 %v363_v34, %v362_v33 }
  0x2d   : > { %v365_v36 = vrot.slane %v364_v35, 2 }
  0x2f   : > { %v366_v37 = vadd.f32 %v365_v36, %v364_v35 }
  0x31   : > { %v367_v38 = vrot.slane %v366_v37, 1 }
  0x33   : > { %v368_v39 = vadd.f32 %v367_v38, %v366_v37 }
  0x35   : > { %976 = vmatmul.mubr.msk.f32.vlgmr.msra.gmra.mrb[0].mxu0 %vm347_vm1, %v368_v39 }
  0x36   : > { %984 = vmatpush3.msra.mxu0 %v369_v0  ;;  %985 = vmatprep.mubr.msk.f32.mxu0 %vm1089_vm0, %v1088_v1 }
 0x108   : > { %v439_v41 = vpop.f32.mrb[0].mxu0 }
 0x109   : > { %v1206_v42 = vmul.f32 0.0078125, %v439_v41  ;;  %v977_v43 = vpop.f32.mrb[1].mxu0 }
 0x10b   : > { %981 = vmatmul.mubr.msk.f32.vlgmr.msra.gmra.mrb[0].mxu1 %vm445_vm3, %v1206_v42  ;;  %642 = vst.msk [vmem:[#allocation2] sm:$0x1] (!%p953_p7), %vm641_vm4, %v1206_v42 }
 0x1de   : > { %v519_v47 = vpop.f32.mrb[0].mxu1 }
 0x1df   : > { %v526_v48 = vrot.slane %v519_v47, %v525_v46  ;;  %v982_v49 = vpop.f32.mrb[1].mxu1 }
 0x1e1   : > { %v527_v50 = vsub.f32 %v339_v8, %v526_v48  ;;  %v528_v51 = vsub.f32 %v340_v9, %v526_v48  ;;  %v529_v52 = vsub.f32 %v341_v10, %v526_v48  ;;  %v530_v53 = vsub.f32 %v342_v12, %v526_v48 }
 0x1e2   : > { %v531_v54 = vsub.f32 %v343_v13, %v526_v48  ;;  %v532_v58 = vsub.f32 %v344_v19, %v526_v48  ;;  %v533_v63 = vsub.f32 %v345_v23, %v526_v48  ;;  %v534_v3 = vsub.f32 %v346_v26, %v526_v48 }
 0x1e3   : > { %v535_v55 = vmul.f32 %v527_v50, %v527_v50  ;;  %v536_v56 = vmul.f32 %v528_v51, %v528_v51  ;;  %v537_v57 = vmul.f32 %v529_v52, %v529_v52  ;;  %v538_v59 = vmul.f32 %v530_v53, %v530_v53 }
 0x1e4   : > { %v539_v0 = vmul.f32 %v531_v54, %v531_v54  ;;  %v540_v4 = vmul.f32 %v532_v58, %v532_v58  ;;  %v541_v7 = vmul.f32 %v533_v63, %v533_v63  ;;  %v542_v10 = vmul.f32 %v534_v3, %v534_v3 }
 0x1e5   : > { %v543_v60 = vsel %vm347_vm1, %v535_v55, 0.0  ;;  %v544_v61 = vsel %vm347_vm1, %v536_v56, 0.0  ;;  %v546_v1 = vsel %vm347_vm1, %v537_v57, 0.0  ;;  %v548_v5 = vsel %vm347_vm1, %v538_v59, 0.0 }
 0x1e6   : > { %v545_v62 = vadd.f32 %v544_v61, %v543_v60  ;;  %v550_v8 = vsel %vm347_vm1, %v539_v0, 0.0  ;;  %v552_v11 = vsel %vm347_vm1, %v540_v4, 0.0  ;;  %v554_v13 = vsel %vm347_vm1, %v541_v7, 0.0 }
 0x1e7   : > { %v556_v15 = vsel %vm347_vm1, %v542_v10, 0.0 }
 0x1e8   : > { %v547_v2 = vadd.f32 %v546_v1, %v545_v62 }
 0x1ea   : > { %v549_v6 = vadd.f32 %v548_v5, %v547_v2 }
 0x1ec   : > { %v551_v9 = vadd.f32 %v550_v8, %v549_v6 }
 0x1ee   : > { %v553_v12 = vadd.f32 %v552_v11, %v551_v9 }
 0x1f0   : > { %v555_v14 = vadd.f32 %v554_v13, %v553_v12 }
 0x1f2   : > { %v557_v16 = vadd.f32 %v556_v15, %v555_v14 }
 0x1f4   : > { %v558_v17 = vrot.slane %v557_v16, 4 }
 0x1f6   : > { %v559_v18 = vadd.f32 %v558_v17, %v557_v16 }
 0x1f8   : > { %v560_v19 = vrot.slane %v559_v18, 2 }
 0x1fa   : > { %v561_v20 = vadd.f32 %v560_v19, %v559_v18 }
 0x1fc   : > { %v562_v21 = vrot.slane %v561_v20, 1 }
 0x1fe   : > { %v563_v22 = vadd.f32 %v562_v21, %v561_v20 }
 0x200   : > { %986 = vmatmul.mubr.msk.f32.vlgmr.msra.gmra.mrb[2].mxu0 %vm347_vm1, %v563_v22 }
 0x2ce   : > { %640 = sbr.rel (%p953_p7) target bundleno = 725 (0x2d5), region = 48 }
 0x2d3   : > { %v633_v23 = vpop.f32.mrb[2].mxu0 }
 0x2d4   : > { %v987_v24 = vpop.f32.mrb[3].mxu0  ;;  %643 = vst.msk [vmem:[#allocation3] sm:$0x1] (!%p953_p7), %vm641_vm4, %v633_v23 }
 0x2d5 PF: > { %p954_p8 = scmp.le.s32.totalorder %s1070_s24, 0 }
 0x2d6   : > { %s955_s11 = sshll.u32 (!%p954_p8), %s1070_s24, 7  ;;  %v655_v27 = vld [vmem:[#allocation2] sm:$0x1] (!%p954_p8)  ;;  %vm660_vm5 = vcmask (!%p954_p8), 24576  }
 0x2d7   : > { %647 = sbr.rel (%p954_p8) target bundleno = 803 (0x323), region = 52  ;;  %s649_s12 = scvt.s32.f32 (!%p954_p8), %s955_s11  ;;  %v656_v28 = vsub.f32 (!%p954_p8), %v1206_v42, %v655_v27 }
 0x2d9   : > { %s650_s13 = sadd.f32 (!%p954_p8), 128.0, %s649_s12  ;;  %v664_v30 = vmul.f32 (!%p954_p8), %v656_v28, %v656_v28 }
 0x2db   : > { %v651_v25 = vstv (!%p954_p8), %s650_s13  ;;  %v662_v29 = vld [vmem:[#allocation3] sm:$0x1] (!%p954_p8) }
 0x2dc   : > { %1044 = vrcp.f32 (!%p954_p8), %v651_v25  ;;  %v663_v33 = vadd.f32 (!%p954_p8), %v662_v29, %v633_v23 }
 0x2e6   : > { %v1045_v26 = vpop.eup %1044 }
 0x2e7   : > { %998 = vpush %v1045_v26 }
 0x318   : > { %s999_s15 = spop %998 }
 0x319   : > { %s654_s16 = smul.f32 128.0, %s999_s15 }
 0x31b   : > { %v657_v31 = vstv %s654_s16  ;;  %s665_s17 = smul.f32 %s654_s16, %s649_s12 }
 0x31c   : > { %v658_v32 = vmul.f32 %v657_v31, %v656_v28 }
 0x31d   : > { %v666_v34 = vstv %s665_s17 }
 0x31e   : > { %v659_v35 = vadd.f32 %v658_v32, %v655_v27  ;;  %v667_v36 = vmul.f32 %v666_v34, %v664_v30 }
 0x320   : > { %661 = vst.msk [vmem:[#allocation2] sm:$0x1] %vm660_vm5, %v659_v35  ;;  %v668_v37 = vadd.f32 %v667_v36, %v663_v33 }
 0x322   : > { %669 = vst.msk [vmem:[#allocation3] sm:$0x1] %vm660_vm5, %v668_v37 }
 0x323 PF: > { %p956_p9 = scmp.ne.s32.totalorder %s1070_s24, 7 }
 0x324   : > { %v678_v38 = vld [vmem:[%s1269_s5] sm:$0xf] (!%p956_p9)  ;;  %v1090_v39 = vmov (!%p956_p9), 0.0   ;;  %vm1091_vm6 = vmmov (!%p956_p9), 0   ;;  %vm831_vm7 = vcmask (!%p956_p9), 57344  }
 0x325   : > { %673 = sbr.rel (%p956_p9) target bundleno = 1044 (0x414), region = 56  ;;  %993 = vmatprep.subr.mxu1 (!%p956_p9), %v1090_v39  ;;  %988 = vmatprep.subr.mxu0 (!%p956_p9), %v1090_v39  ;;  %v833_v47 = vld [vmem:[%s1178_s14] sm:$0x1] (!%p956_p9) }
 0x326   : > { %994 = vmatpush3.msk.msra.mxu1 (!%p956_p9), %vm449_vm2, %v678_v38  ;;  %995 = vmatprep.mubr.msk.f32.mxu1 (!%p956_p9), %vm1091_vm6, %v1090_v39  ;;  %v829_v48 = vld [vmem:[%s1266_s2] sm:$0x1] (!%p956_p9) }
 0x327   : > { %v755_v40 = vld [vmem:[#allocation2] sm:$0x1] (!%p956_p9)  ;;  %989 = vmatpush3.msk.msra.mxu0 (!%p956_p9), %vm449_vm2, %v678_v38  ;;  %990 = vmatprep.mubr.msk.f32.mxu0 (!%p956_p9), %vm1091_vm6, %v1090_v39 }
 0x328   : > { %996 = vmatmul.mubr.msk.f32.vlgmr.msra.gmra.mrb[0].mxu1 (!%p956_p9), %vm445_vm3, %v755_v40  ;;  %v836_v53 = vld [vmem:[%s1267_s3] sm:$0x1] (!%p956_p9) }
 0x329   : > { %v674_v41 = vld [vmem:[#allocation3] sm:$0x1] (!%p956_p9) }
 0x32a   : > { %v675_v42 = vmul.f32 (!%p956_p9), 0.0009765625, %v674_v41 }
 0x32c   : > { %v676_v43 = vadd.f32 1e-05, %v675_v42 }
 0x32e   : > { %1046 = vrsqrt.f32 %v676_v43 }
 0x338   : > { %v1047_v44 = vpop.eup %1046 }
 0x339   : > { %991 = vmatmul.mubr.msk.f32.vlgmr.msra.gmra.mrb[0].mxu0 %vm445_vm3, %v1047_v44 }
 0x3fb   : > { %v825_v45 = vpop.f32.mrb[0].mxu1 }
 0x3fc   : > { %v997_v46 = vpop.f32.mrb[1].mxu1  ;;  %v834_v49 = vsub.f32 %v833_v47, %v825_v45 }
 0x40c   : > { %v751_v50 = vpop.f32.mrb[0].mxu0 }
 0x40d   : > { %v830_v51 = vmul.f32 %v829_v48, %v751_v50  ;;  %v992_v52 = vpop.f32.mrb[1].mxu0 }
 0x40f   : > { %832 = vst.msk [vmem:[%s320_s18] sm:$0x1] %vm831_vm7, %v830_v51  ;;  %v835_v54 = vmul.f32 %v834_v49, %v830_v51 }
 0x411   : > { %v837_v55 = vadd.f32 %v836_v53, %v835_v54 }
 0x413   : > { %838 = vst.msk [vmem:[%s323_s22] sm:$0x1] %vm831_vm7, %v837_v55 }
 0x414 PF: > { %s18_s28 = sadd.s32 1, %s1086_s28   ;;  %s1274_s24 = smov %s1078_s26 }
 0x415   : > { %p15_p10 = scmp.ge.s32.totalorder %s18_s28, 18   ;;  %s1275_s25 = smov %s1082_s27 }
 0x416   : > { %s1276_s26 = smov %s1279_s29  ;;  %s1277_s27 = smov %s1283_s30 }
 0x417   :  { %17 = sbr.rel (!%p15_p10) target bundleno = 3 (0x3), region = 101 }

// kernel: resnet_block_forward.6
= control target key start
LH: loop header
LB: loop body
LE: loop exit
PB: predicated region body
PF: predicated region fallthrough
CT: control target
= control target key end

     0   :  { %s2656_s24 = smov 0   ;;  %s2658_s25 = smov 0   ;;  %s3326_s0 = inlined_call_operand.vmem [shape: f32[2,1,4], index: 0, kind: input, shape index: {}]   ;;  %s3327_s1 = inlined_call_operand.vmem [shape: f32[2,1,4], index: 1, kind: input, shape index: {}]   ;;  %s3328_s2 = inlined_call_operand.vmem [shape: f32[2,8,8,8,4], index: 2, kind: input, shape index: {}, may-alias: {2,3,4}]   ;;  %s3329_s3 = inlined_call_operand.vmem [shape: f32[2,8,8,8,4], index: 3, kind: input, shape index: {}, may-alias: {2,3,4}]   ;;  %s3330_s4 = inlined_call_operand.vmem [shape: f32[2,8,8,8,4], index: 4, kind: input, shape index: {}, may-alias: {2,3,4}]   ;;  %s3331_s5 = inlined_call_operand.vmem [shape: bf16[3,3,12,8], index: 5, kind: input, shape index: {}]   ;;  %s3332_s6 = inlined_call_operand.vmem [shape: f32[1,8], index: 6, kind: input, shape index: {}]   ;;  %s3333_s7 = inlined_call_operand.vmem [shape: f32[2,8,64,8], index: 7, kind: output, shape index: {}]  }
   0x1   :  { %s2660_s26 = smov 0   ;;  %s2662_s27 = smov 0  }
   0x2   :  { %s2664_s28 = smov 0  }
   0x3 LB: > { %s26_s29 = sadd.s32 1, %s2603_s26  ;;  %s29_s30 = sadd.s32 1, %s2607_s27  ;;  %s2611_s28 = sphi %s2664_s28, %s17_s28   ;;  %s2607_s27 = sphi %s2662_s27, %s3338_s27   ;;  %s2603_s26 = sphi %s2660_s26, %s3337_s26   ;;  %s2599_s25 = sphi %s2658_s25, %s3336_s25   ;;  %s2595_s24 = sphi %s2656_s24, %s3335_s24  }
   0x4   : > { %p27_p0 = scmp.ge.s32.totalorder %s26_s29, 8  ;;  %p2164_p1 = scmp.ge.s32.totalorder %s2611_s28, 1 }
   0x5   : > { %p329_p2 = scmp.lt.s32.totalorder %s2611_s28, 17 }
   0x6   : > { %s3340_s29 = smov (%p27_p0, %s26_s29), 0  ;;  %s3342_s30 = smov (!%p27_p0, %s29_s30), %s2607_s27 }
   0x7   : > { %p330_p3 = pnand %p2164_p1, %p329_p2  ;;  %p31_p4 = scmp.ge.s32.totalorder %s3342_s30, 2 }
   0x8   : > { %p399_p5 = scmp.lt.s32.totalorder (!%p330_p3), %s2599_s25, 1  ;;  %s2165_s8 = sadd.s32 (!%p330_p3), 4294967295, %s2595_s24  ;;  %vm462_vm0 = vcmask (!%p330_p3), 97280   ;;  %vm464_vm1 = vcmask (!%p330_p3), 91136   ;;  %v2613_v0 = vmov (!%p330_p3), 0.0   ;;  %vm894_vm2 = vcmask (!%p330_p3), 1045504  }
   0x9   : > { %s3344_s30 = smov (%p31_p4, %s3342_s30), 0  ;;  %333 = sbr.rel (%p330_p3) target bundleno = 524 (0x20c), region = 48 }
   0xa   : > { %p406_p6 = scmp.gt.s32.totalorder (!%p330_p3), %s2165_s8, 0  ;;  %p2166_p7 = scmp.lt.s32.totalorder (!%p330_p3), %s2165_s8, 7  ;;  %476 = vst.msk [vmem:[#allocation2 + $0x60] sm:$0xff] (!%p330_p3), %vm462_vm0, %v2613_v0  ;;  %463 = vst.msk [vmem:[#allocation2] sm:$0xff] (!%p330_p3), %vm462_vm0, %v2613_v0  ;;  %vm586_vm3 = vcmask (!%p330_p3), 31744   ;;  %vm846_vm4 = vcmask (!%p330_p3), 64512  }
   0xb   : > { %477 = vst.msk [vmem:[#allocation2 + $0x68] sm:$0x3] (!%p330_p3), %vm464_vm1, %v2613_v0  ;;  %465 = vst.msk [vmem:[#allocation2 + $0x8] sm:$0x3] (!%p330_p3), %vm464_vm1, %v2613_v0  ;;  %p422_p8 = scmp.lt.s32.totalorder (!%p330_p3), %s2595_s24, 7  ;;  %s429_s16 = sadd.s32 (!%p330_p3), 1, %s2595_s24 }
   0xc   : > { %466 = vst.msk [vmem:[#allocation2 + $0x10] sm:$0xff] (!%p330_p3), %vm462_vm0, %v2613_v0  ;;  %468 = vst.msk [vmem:[#allocation2 + $0x20] sm:$0xff] (!%p330_p3), %vm462_vm0, %v2613_v0  ;;  %p2745_p9 = scmp.lt.s32.totalorder (!%p330_p3), %s429_s16, 7  ;;  %s2614_s22 = smov (!%p330_p3), 4   ;;  %vm707_vm5 = vcmask (!%p330_p3), 64544   ;;  %vm837_vm6 = vcmask (!%p330_p3), 97344  }
   0xd   : > { %467 = vst.msk [vmem:[#allocation2 + $0x18] sm:$0x3] (!%p330_p3), %vm464_vm1, %v2613_v0  ;;  %469 = vst.msk [vmem:[#allocation2 + $0x28] sm:$0x3] (!%p330_p3), %vm464_vm1, %v2613_v0  ;;  %p454_p10 = scmp.gt.s32.totalorder (!%p330_p3), %s2595_s24, 0 }
   0xe   : > { %470 = vst.msk [vmem:[#allocation2 + $0x30] sm:$0xff] (!%p330_p3), %vm462_vm0, %v2613_v0  ;;  %472 = vst.msk [vmem:[#allocation2 + $0x40] sm:$0xff] (!%p330_p3), %vm462_vm0, %v2613_v0 }
   0xf   : > { %471 = vst.msk [vmem:[#allocation2 + $0x38] sm:$0x3] (!%p330_p3), %vm464_vm1, %v2613_v0  ;;  %473 = vst.msk [vmem:[#allocation2 + $0x48] sm:$0x3] (!%p330_p3), %vm464_vm1, %v2613_v0 }
  0x10   : > { %474 = vst.msk [vmem:[#allocation2 + $0x50] sm:$0xff] %vm462_vm0, %v2613_v0  ;;  %478 = vst.msk [vmem:[#allocation2 + $0x70] sm:$0xff] %vm462_vm0, %v2613_v0  ;;  %s3346_s25 = smov (!%p399_p5, %s2599_s25), 1  ;;  %s3350_s16 = smov (!%p2745_p9, %s429_s16), 7 }
  0x11   : > { %475 = vst.msk [vmem:[#allocation2 + $0x58] sm:$0x3] %vm464_vm1, %v2613_v0  ;;  %479 = vst.msk [vmem:[#allocation2 + $0x78] sm:$0x3] %vm464_vm1, %v2613_v0  ;;  %s407_s9 = scalar_select %p406_p6, %s2165_s8, 0 }
  0x12   : > { %480 = vst.msk [vmem:[#allocation2 + $0x80] sm:$0xff] %vm462_vm0, %v2613_v0  ;;  %482 = vst.msk [vmem:[#allocation2 + $0x90] sm:$0xff] %vm462_vm0, %v2613_v0  ;;  %s401_s12 = scalar_lea.vmem %s3326_s0, %s3346_s25  ;;  %s2740_s13 = sshll.u32 %s3346_s25, 6 }
  0x13   : > { %481 = vst.msk [vmem:[#allocation2 + $0x88] sm:$0x3] %vm464_vm1, %v2613_v0  ;;  %483 = vst.msk [vmem:[#allocation2 + $0x98] sm:$0x3] %vm464_vm1, %v2613_v0  ;;  %s3348_s9 = smov (!%p2166_p7, %s407_s9), 7  ;;  %s404_s21 = scalar_lea.vmem %s3327_s1, %s3346_s25 }
  0x14   : > { %s2171_s14 = sshll.u32 %s3348_s9, 3  ;;  %v2760_v1 = vld [vmem:[%s401_s12] ss:$0 sm:$0xff]  ;;  %s3352_s16 = smov (!%p2745_p9, %s3350_s16), 7  ;;  %853 = vst.msk [vmem:[#allocation3 + $0x30] sm:$0xff] %vm846_vm4, %v2613_v0  ;;  %847 = vst.msk [vmem:[#allocation3] sm:$0xff] %vm846_vm4, %v2613_v0 }
  0x15   : > { %s414_s15 = sadd.s32 %s2740_s13, %s2171_s14  ;;  %v2768_v6 = vld [vmem:[%s404_s21] ss:$0 sm:$0xff]  ;;  %s2615_s12 = smov 8   ;;  %848 = vst.msk [vmem:[#allocation3 + $0x8] sm:$0xff] %vm846_vm4, %v2613_v0  ;;  %849 = vst.msk [vmem:[#allocation3 + $0x10] sm:$0xff] %vm846_vm4, %v2613_v0 }
  0x16   : > { %s2173_s17 = sshll.u32 %s414_s15, 3  ;;  %850 = vst.msk [vmem:[#allocation3 + $0x18] sm:$0xff] %vm846_vm4, %v2613_v0  ;;  %851 = vst.msk [vmem:[#allocation3 + $0x20] sm:$0xff] %vm846_vm4, %v2613_v0 }
  0x17   : > { %s2755_s8 = scalar_lea.vmem %s3328_s2, %s2173_s17  ;;  %s2180_s17 = sshll.u32 %s3352_s16, 3  ;;  %852 = vst.msk [vmem:[#allocation3 + $0x28] sm:$0xff] %vm846_vm4, %v2613_v0  ;;  %854 = vst.msk [vmem:[#allocation3 + $0x38] sm:$0xff] %vm846_vm4, %v2613_v0 }
  0x18   : > { %s423_s9 = scalar_select %p422_p8, %s2595_s24, 7  ;;  %v489_v2 = vld [vmem:[%s2755_s8 + $0x28] sm:$0xff]  ;;  %v487_v3 = vld [vmem:[%s2755_s8 + $0x18] sm:$0xff] }
  0x19   : > { %v503_v4 = vmul.f32 %v2760_v1, %v489_v2  ;;  %v501_v5 = vmul.f32 %v2760_v1, %v487_v3  ;;  %s438_s18 = sadd.s32 %s2180_s17, %s2740_s13 }
  0x1a   : > { %s2174_s25 = sshll.u32 %s423_s9, 3  ;;  %s2182_s16 = sshll.u32 %s438_s18, 3 }
  0x1b   : > { %s2771_s10 = sadd.s32 %s2174_s25, %s2740_s13  ;;  %v2774_v7 = vadd.f32 %v2768_v6, %v503_v4  ;;  %v2778_v8 = vadd.f32 %v2768_v6, %v501_v5  ;;  %s2830_s20 = scalar_lea.vmem %s3330_s4, %s2182_s16 }
  0x1c   : > { %s2176_s11 = sshll.u32 %s2771_s10, 3  ;;  %v720_v38 = vld [vmem:[%s2830_s20 + $0x20] sm:$0xff]  ;;  %v719_v39 = vld [vmem:[%s2830_s20 + $0x18] sm:$0xff]  ;;  %v722_v40 = vld [vmem:[%s2830_s20 + $0x30] sm:$0xff] }
  0x1d   : > { %s2785_s15 = scalar_lea.vmem %s3329_s3, %s2176_s11  ;;  %v2193_v18 = vmul.f32 -1.442695, %v2774_v7  ;;  %v2191_v23 = vmul.f32 -1.442695, %v2778_v8  ;;  %v728_v41 = vmul.f32 %v2760_v1, %v720_v38  ;;  %v727_v42 = vmul.f32 %v2760_v1, %v719_v39  ;;  %v721_v44 = vld [vmem:[%s2830_s20 + $0x28] sm:$0xff]  ;;  %v716_v45 = vld [vmem:[%s2830_s20] sm:$0xff]  ;;  %s452_s16 = scalar_lea.vmem %s3333_s7, %s2176_s11 }
  0x1e   : > { %v600_v9 = vld [vmem:[%s2785_s15 + $0x28] sm:$0xff]  ;;  %v598_v10 = vld [vmem:[%s2785_s15 + $0x18] sm:$0xff]  ;;  %v601_v11 = vld [vmem:[%s2785_s15 + $0x30] sm:$0xff]  ;;  %v730_v43 = vmul.f32 %v2760_v1, %v722_v40  ;;  %v729_v47 = vmul.f32 %v2760_v1, %v721_v44  ;;  %v724_v48 = vmul.f32 %v2760_v1, %v716_v45  ;;  %s2911_s21 = scalar_select %p422_p8, 1, 0 }
  0x1f   : > { %v608_v12 = vmul.f32 %v2760_v1, %v600_v9  ;;  %v606_v13 = vmul.f32 %v2760_v1, %v598_v10  ;;  %v609_v14 = vmul.f32 %v2760_v1, %v601_v11  ;;  %v599_v15 = vld [vmem:[%s2785_s15 + $0x20] sm:$0xff]  ;;  %v596_v16 = vld [vmem:[%s2785_s15 + $0x8] sm:$0xff]  ;;  %v597_v22 = vld [vmem:[%s2785_s15 + $0x10] sm:$0xff]  ;;  %2477 = vpow2.f32 %v2193_v18 }
  0x20   : > { %v595_v17 = vld [vmem:[%s2785_s15] sm:$0xff]  ;;  %v607_v19 = vmul.f32 %v2760_v1, %v599_v15  ;;  %v604_v20 = vmul.f32 %v2760_v1, %v596_v16  ;;  %v605_v27 = vmul.f32 %v2760_v1, %v597_v22  ;;  %2479 = vpow2.f32 %v2191_v23  ;;  %v718_v46 = vld [vmem:[%s2830_s20 + $0x10] sm:$0xff]  ;;  %v717_v9 = vld [vmem:[%s2830_s20 + $0x8] sm:$0xff]  ;;  %s459_s23 = scvt.s32.f32 %s2911_s21 }
  0x21   : > { %v603_v21 = vmul.f32 %v2760_v1, %v595_v17  ;;  %v2805_v24 = vadd.f32 %v2768_v6, %v608_v12  ;;  %v2808_v25 = vadd.f32 %v2768_v6, %v606_v13  ;;  %v2811_v26 = vadd.f32 %v2768_v6, %v609_v14  ;;  %v602_v12 = vld [vmem:[%s2785_s15 + $0x38] sm:$0xff]  ;;  %v490_v16 = vld [vmem:[%s2755_s8 + $0x30] sm:$0xff]  ;;  %v484_v45 = vld [vmem:[%s2755_s8] sm:$0xff] }
  0x22   : > { %v2816_v28 = vadd.f32 %v2768_v6, %v607_v19  ;;  %v2819_v29 = vadd.f32 %v2768_v6, %v604_v20  ;;  %v2835_v36 = vadd.f32 %v2768_v6, %v605_v27  ;;  %v2851_v50 = vadd.f32 %v2768_v6, %v728_v41  ;;  %v723_v15 = vld [vmem:[%s2830_s20 + $0x38] sm:$0xff]  ;;  %v488_v20 = vld [vmem:[%s2755_s8 + $0x20] sm:$0xff]  ;;  %v485_v41 = vld [vmem:[%s2755_s8 + $0x8] sm:$0xff] }
  0x23   : > { %v2822_v30 = vadd.f32 %v2768_v6, %v603_v21  ;;  %v2201_v31 = vmul.f32 -1.442695, %v2805_v24  ;;  %v2199_v32 = vmul.f32 -1.442695, %v2808_v25  ;;  %v2202_v33 = vmul.f32 -1.442695, %v2811_v26 }
  0x24   : > { %v2200_v34 = vmul.f32 -1.442695, %v2816_v28  ;;  %v2197_v35 = vmul.f32 -1.442695, %v2819_v29  ;;  %v2198_v49 = vmul.f32 -1.442695, %v2835_v36  ;;  %v2854_v51 = vadd.f32 %v2768_v6, %v727_v42 }
  0x25   : > { %2481 = vpow2.f32 %v2201_v31  ;;  %v2196_v37 = vmul.f32 -1.442695, %v2822_v30  ;;  %v2857_v52 = vadd.f32 %v2768_v6, %v730_v43  ;;  %v2860_v53 = vadd.f32 %v2768_v6, %v729_v47 }
  0x26   : > { %2483 = vpow2.f32 %v2199_v32  ;;  %v2863_v54 = vadd.f32 %v2768_v6, %v724_v48  ;;  %v726_v55 = vmul.f32 %v2760_v1, %v718_v46  ;;  %v2208_v56 = vmul.f32 -1.442695, %v2851_v50 }
  0x27   : > { %2485 = vpow2.f32 %v2202_v33  ;;  %v2207_v57 = vmul.f32 -1.442695, %v2854_v51  ;;  %v2210_v58 = vmul.f32 -1.442695, %v2857_v52  ;;  %v2209_v59 = vmul.f32 -1.442695, %v2860_v53 }
  0x28   : > { %2487 = vpow2.f32 %v2200_v34  ;;  %v2871_v60 = vadd.f32 %v2768_v6, %v726_v55  ;;  %v2204_v61 = vmul.f32 -1.442695, %v2863_v54  ;;  %v725_v19 = vmul.f32 %v2760_v1, %v717_v9  ;;  %v486_v55 = vld [vmem:[%s2755_s8 + $0x10] sm:$0xff] }
  0x29   : > { %2489 = vpow2.f32 %v2197_v35  ;;  %v2874_v62 = vpop.eup %2477  ;;  %v610_v23 = vmul.f32 %v2760_v1, %v602_v12  ;;  %v731_v32 = vmul.f32 %v2760_v1, %v723_v15  ;;  %v504_v33 = vmul.f32 %v2760_v1, %v490_v16 }
  0x2a   : > { %2491 = vpow2.f32 %v2196_v37  ;;  %v2206_v63 = vmul.f32 -1.442695, %v2871_v60  ;;  %v2877_v2 = vpop.eup %2479  ;;  %v502_v37 = vmul.f32 %v2760_v1, %v488_v20  ;;  %v2890_v40 = vadd.f32 %v2768_v6, %v725_v19 }
  0x2b   : > { %2493 = vpow2.f32 %v2198_v49  ;;  %v2894_v44 = vadd.f32 %v2768_v6, %v610_v23  ;;  %v2898_v48 = vadd.f32 %v2768_v6, %v731_v32  ;;  %v2901_v49 = vadd.f32 %v2768_v6, %v504_v33 }
  0x2c   : > { %2495 = vpow2.f32 %v2208_v56  ;;  %v500_v12 = vmul.f32 %v2760_v1, %v486_v55  ;;  %v549_v19 = vadd.f32 1.0, %v2874_v62 }
  0x2d   : > { %2497 = vpow2.f32 %v2207_v57  ;;  %v2211_v15 = vmul.f32 -1.442695, %v2898_v48  ;;  %v2194_v23 = vmul.f32 -1.442695, %v2901_v49 }
  0x2e   : > { %2499 = vpow2.f32 %v2210_v58  ;;  %v2905_v58 = vadd.f32 %v2768_v6, %v502_v37 }
  0x2f   : > { %v2482_v3 = vpop.eup %2481  ;;  %2501 = vpow2.f32 %v2209_v59  ;;  %v499_v59 = vmul.f32 %v2760_v1, %v485_v41 }
  0x30   : > { %v2484_v4 = vpop.eup %2483  ;;  %v648_v5 = vadd.f32 1.0, %v2482_v3  ;;  %2503 = vpow2.f32 %v2204_v61  ;;  %v491_v61 = vld [vmem:[%s2755_s8 + $0x38] sm:$0xff]  ;;  %s2956_s8 = scalar_select %p454_p10, 1, 0 }
  0x31   : > { %v2486_v10 = vpop.eup %2485  ;;  %v646_v11 = vadd.f32 1.0, %v2484_v4  ;;  %2505 = vpow2.f32 %v2206_v63  ;;  %v2205_v4 = vmul.f32 -1.442695, %v2890_v40  ;;  %v505_v16 = vmul.f32 %v2760_v1, %v491_v61 }
  0x32   : > { %v2488_v13 = vpop.eup %2487  ;;  %2507 = vrcp.f32 %v648_v5  ;;  %v649_v14 = vadd.f32 1.0, %v2486_v10  ;;  %v498_v5 = vmul.f32 %v2760_v1, %v484_v45  ;;  %v2923_v20 = vadd.f32 %v2768_v6, %v499_v59  ;;  %s456_s25 = scvt.s32.f32 %s2956_s8 }
  0x33   : > { %v2490_v17 = vpop.eup %2489  ;;  %2509 = vrcp.f32 %v646_v11  ;;  %v647_v18 = vadd.f32 1.0, %v2488_v13  ;;  %v2203_v11 = vmul.f32 -1.442695, %v2894_v44  ;;  %v547_v1 = vadd.f32 1.0, %v2877_v2 }
  0x34   : > { %v2492_v21 = vpop.eup %2491  ;;  %2511 = vrcp.f32 %v649_v14  ;;  %v644_v22 = vadd.f32 1.0, %v2490_v17  ;;  %v2192_v2 = vmul.f32 -1.442695, %v2905_v58 }
  0x35   : > { %v2494_v27 = vpop.eup %2493  ;;  %2513 = vrcp.f32 %v647_v18  ;;  %v643_v31 = vadd.f32 1.0, %v2492_v21 }
  0x36   : > { %v2496_v34 = vpop.eup %2495  ;;  %2515 = vrcp.f32 %v644_v22  ;;  %v645_v35 = vadd.f32 1.0, %v2494_v27  ;;  %v2930_v22 = vadd.f32 %v2768_v6, %v498_v5  ;;  %v2937_v27 = vadd.f32 %v2768_v6, %v500_v12 }
  0x37   : > { %v2498_v38 = vpop.eup %2497  ;;  %2517 = vrcp.f32 %v643_v31  ;;  %v768_v39 = vadd.f32 1.0, %v2496_v34  ;;  %v2941_v31 = vadd.f32 %v2768_v6, %v505_v16 }
  0x38   : > { %v2500_v42 = vpop.eup %2499  ;;  %v767_v43 = vadd.f32 1.0, %v2498_v38  ;;  %2519 = vrcp.f32 %v645_v35  ;;  %v2948_v35 = vstv %s459_s23  ;;  %v2188_v37 = vmul.f32 -1.442695, %v2930_v22 }
  0x39   : > { %v2502_v46 = vpop.eup %2501  ;;  %2521 = vrcp.f32 %v768_v39  ;;  %v770_v47 = vadd.f32 1.0, %v2500_v42  ;;  %v2190_v41 = vmul.f32 -1.442695, %v2937_v27 }
  0x3a   : > { %v2504_v56 = vpop.eup %2503  ;;  %2523 = vrcp.f32 %v767_v43  ;;  %v769_v57 = vadd.f32 1.0, %v2502_v46  ;;  %v2195_v43 = vmul.f32 -1.442695, %v2941_v31 }
  0x3b   : > { %v2506_v63 = vpop.eup %2505  ;;  %2525 = vrcp.f32 %v770_v47  ;;  %v764_v3 = vadd.f32 1.0, %v2504_v56  ;;  %v2468_v47 = vld [vmem:[%s3331_s5] sm:$0x3f]  }
  0x3c   : > { %v2508_v9 = vpop.eup %2507  ;;  %2527 = vrcp.f32 %v769_v57  ;;  %v766_v10 = vadd.f32 1.0, %v2506_v63  ;;  %2416 = vmatprep.subr.msk.bf16.mxu1 %vm894_vm2, %v2468_v47  ;;  %2415 = vmatprep.subr.msk.bf16.mxu0 %vm894_vm2, %v2468_v47 }
  0x3d   : > { %v2510_v13 = vpop.eup %2509  ;;  %v672_v14 = vmul.f32 %v2508_v9, %v2805_v24  ;;  %2529 = vrcp.f32 %v764_v3 }
  0x3e   : > { %v2512_v17 = vpop.eup %2511  ;;  %v670_v18 = vmul.f32 %v2510_v13, %v2808_v25  ;;  %2531 = vrcp.f32 %v766_v10 }
  0x3f   : > { %v2514_v21 = vpop.eup %2513  ;;  %693 = vrot.lane.b32.xlu1 %v672_v14, %s2614_s22  ;;  %v673_v24 = vmul.f32 %v2512_v17, %v2811_v26  ;;  %2533 = vpow2.f32 %v2205_v4 }
  0x40   : > { %v2516_v25 = vpop.eup %2515  ;;  %689 = vrot.lane.b32.xlu0 %v670_v18, %s2614_s22  ;;  %v671_v62 = vmul.f32 %v2514_v21, %v2816_v28  ;;  %2535 = vpow2.f32 %v2203_v11  ;;  %v2189_v28 = vmul.f32 -1.442695, %v2923_v20  ;;  %v2979_v11 = vstv %s456_s25 }
  0x41   : > { %v2518_v26 = vpop.eup %2517  ;;  %2537 = vpow2.f32 %v2211_v15  ;;  %v668_v34 = vmul.f32 %v2516_v25, %v2819_v29 }
  0x42   : > { %v2943_v32 = vpop.eup %2519  ;;  %2539 = vrcp.f32 %v549_v19  ;;  %v667_v6 = vmul.f32 %v2518_v26, %v2822_v30 }
  0x43   : > { %v2522_v33 = vpop.eup %2521  ;;  %695 = vrot.lane.b32.xlu1 %v673_v24, %s2614_s22  ;;  %2541 = vrcp.f32 %v547_v1 }
  0x44   : > { %v2524_v38 = vpop.eup %2523  ;;  %691 = vrot.lane.b32.xlu0 %v671_v62, %s2614_s22  ;;  %v792_v39 = vmul.f32 %v2522_v33, %v2851_v50  ;;  %2543 = vpow2.f32 %v2194_v23 }
  0x45   : > { %v2526_v42 = vpop.eup %2525  ;;  %v791_v29 = vmul.f32 %v2524_v38, %v2854_v51  ;;  %2545 = vpow2.f32 %v2192_v2 }
  0x46   : > { %v2528_v45 = vpop.eup %2527  ;;  %2547 = vpow2.f32 %v2189_v28  ;;  %v801_v30 = vmul.f32 %v2948_v35, %v792_v39  ;;  %v794_v50 = vmul.f32 %v2526_v42, %v2857_v52  ;;  %v896_v52 = vsel %vm894_vm2, %v2468_v47, 0  ;;  %v3010_v39 = vld [vmem:[%s3331_s5 + $0x10] sm:$0x3f]  }
  0x47   : > { %v2530_v46 = vpop.eup %2529  ;;  %685 = vrot.lane.b32.xlu1 %v668_v34, %s2614_s22  ;;  %2549 = vpow2.f32 %v2188_v37  ;;  %v800_v55 = vmul.f32 %v2948_v35, %v791_v29  ;;  %v793_v56 = vmul.f32 %v2528_v45, %v2860_v53  ;;  %2414 = vmatpush3.bf16.msra.mxu1 %v896_v52 }
  0x48   : > { %v2532_v51 = vpop.eup %2531  ;;  %683 = vrot.lane.b32.xlu0 %v667_v6, %s2614_s22  ;;  %2551 = vpow2.f32 %v2190_v41  ;;  %2324 = vmatpush3.bf16.msra.mxu0 %v896_v52  ;;  %v803_v53 = vmul.f32 %v2948_v35, %v794_v50  ;;  %v788_v3 = vmul.f32 %v2530_v46, %v2863_v54  ;;  %v2986_v54 = vld [vmem:[%s3331_s5 + $0x8] sm:$0x3f]  }
  0x49   : > { %v2534_v57 = vpop.eup %2533  ;;  %2553 = vpow2.f32 %v2195_v43  ;;  %v802_v9 = vmul.f32 %v2948_v35, %v793_v56  ;;  %v790_v18 = vmul.f32 %v2532_v51, %v2871_v60  ;;  %2417 = vmatprep.subr.msk.bf16.mxu1 %vm894_vm2, %v2986_v54  ;;  %2418 = vmatprep.subr.msk.bf16.mxu0 %vm894_vm2, %v3010_v39 }
  0x4a   : > { %v2536_v59 = vpop.eup %2535  ;;  %v765_v61 = vadd.f32 1.0, %v2534_v57  ;;  %v797_v17 = vmul.f32 %v2948_v35, %v788_v3 }
  0x4b   : > { %v2538_v63 = vpop.eup %2537  ;;  %821 = vrot.lane.b32.xlu1 %v801_v30, %s2615_s12  ;;  %v650_v4 = vadd.f32 1.0, %v2536_v59 }
  0x4c   : > { %v2540_v5 = vpop.eup %2539  ;;  %819 = vrot.lane.b32.xlu0 %v800_v55, %s2615_s12  ;;  %2555 = vrcp.f32 %v765_v61  ;;  %v771_v10 = vadd.f32 1.0, %v2538_v63 }
  0x4d   : > { %v2542_v12 = vpop.eup %2541  ;;  %2557 = vrcp.f32 %v650_v4  ;;  %v573_v13 = vmul.f32 %v2540_v5, %v2774_v7 }
  0x4e   : > { %v2544_v14 = vpop.eup %2543  ;;  %2559 = vrcp.f32 %v771_v10  ;;  %v571_v15 = vmul.f32 %v2542_v12, %v2778_v8  ;;  %v669_v8 = vmul.f32 %v2943_v32, %v2835_v36  ;;  %v799_v36 = vmul.f32 %v2948_v35, %v790_v18  ;;  %v979_v18 = vld [vmem:[#allocation2 + $0x1] sm:$0xff] }
  0x4f   : > { %v2546_v16 = vpop.eup %2545  ;;  %825 = vrot.lane.b32.xlu1 %v803_v53, %s2615_s12  ;;  %v582_v19 = vmul.f32 %v2979_v11, %v573_v13  ;;  %v550_v7 = vadd.f32 1.0, %v2544_v14 }
  0x50   : > { %v2548_v21 = vpop.eup %2547  ;;  %823 = vrot.lane.b32.xlu0 %v802_v9, %s2615_s12  ;;  %v580_v24 = vmul.f32 %v2979_v11, %v571_v15  ;;  %v548_v1 = vadd.f32 1.0, %v2546_v16  ;;  %v1020_v16 = vsel %vm894_vm2, %v2986_v54, 0 }
  0x51   : > { %v2550_v25 = vpop.eup %2549  ;;  %592 = vst.msk [vmem:[#allocation2 + $0x61] sm:$0xff] %vm586_vm3, %v582_v19  ;;  %2561 = vrcp.f32 %v550_v7  ;;  %v545_v60 = vadd.f32 1.0, %v2548_v21  ;;  %v2471_v19 = vld [vmem:[%s3331_s5 + $0x18] sm:$0x3f]  }
  0x52   : > { %v2552_v62 = vpop.eup %2551  ;;  %590 = vst.msk [vmem:[#allocation2 + $0x41] sm:$0xff] %vm586_vm3, %v580_v24  ;;  %2563 = vrcp.f32 %v548_v1  ;;  %v544_v23 = vadd.f32 1.0, %v2550_v25 }
  0x53   : > { %v2554_v26 = vpop.eup %2553  ;;  %813 = vrot.lane.b32.xlu1 %v797_v17, %s2615_s12  ;;  %2565 = vrcp.f32 %v545_v60  ;;  %v546_v2 = vadd.f32 1.0, %v2552_v62  ;;  %v855_v17 = vld [vmem:[#allocation2] sm:$0xff] }
  0x54   : > { %687 = vrot.lane.b32.xlu0 %v669_v8, %s2614_s22  ;;  %2567 = vrcp.f32 %v544_v23  ;;  %v551_v32 = vadd.f32 1.0, %v2554_v26  ;;  %v1103_v23 = vld [vmem:[#allocation2 + $0x2] sm:$0xff] }
  0x55   : > { %2569 = vrcp.f32 %v546_v2 }
  0x56   : > { %v2556_v28 = vpop.eup %2555  ;;  %2571 = vrcp.f32 %v551_v32 }
  0x57   : > { %v2558_v33 = vpop.eup %2557  ;;  %817 = vrot.lane.b32.xlu1 %v799_v36, %s2615_s12  ;;  %v789_v34 = vmul.f32 %v2556_v28, %v2890_v40 }
  0x58   : > { %v2560_v37 = vpop.eup %2559  ;;  %v674_v42 = vmul.f32 %v2558_v33, %v2894_v44 }
  0x59   : > { %v798_v38 = vmul.f32 %v2948_v35, %v789_v34  ;;  %v795_v6 = vmul.f32 %v2560_v37, %v2898_v48 }
  0x5b   : > { %v2562_v41 = vpop.eup %2561  ;;  %815 = vrot.lane.b32.xlu0 %v798_v38, %s2615_s12  ;;  %v804_v29 = vmul.f32 %v2948_v35, %v795_v6  ;;  %v1144_v6 = vsel %vm894_vm2, %v3010_v39, 0 }
  0x5c   : > { %v2564_v40 = vpop.eup %2563  ;;  %v574_v43 = vmul.f32 %v2562_v41, %v2901_v49  ;;  %v1268_v41 = vsel %vm894_vm2, %v2471_v19, 0 }
  0x5d   : > { %v2566_v45 = vpop.eup %2565  ;;  %827 = vrot.lane.b32.xlu1 %v804_v29, %s2615_s12  ;;  %v572_v48 = vmul.f32 %v2564_v40, %v2905_v58  ;;  %v2473_v29 = vld [vmem:[%s3331_s5 + $0x28] sm:$0x3f]  }
  0x5e   : > { %v2568_v46 = vpop.eup %2567  ;;  %v583_v30 = vmul.f32 %v2979_v11, %v574_v43  ;;  %v569_v50 = vmul.f32 %v2566_v45, %v2923_v20 }
  0x5f   : > { %v2570_v47 = vpop.eup %2569  ;;  %697 = vrot.lane.b32.xlu0 %v674_v42, %s2614_s22  ;;  %v581_v44 = vmul.f32 %v2979_v11, %v572_v48  ;;  %v568_v35 = vmul.f32 %v2568_v46, %v2930_v22  ;;  %v2472_v42 = vld [vmem:[%s3331_s5 + $0x20] sm:$0x3f]  }
  0x60   : > { %v2572_v51 = vpop.eup %2571  ;;  %593 = vst.msk [vmem:[#allocation2 + $0x71] sm:$0xff] %vm586_vm3, %v583_v30  ;;  %v578_v49 = vmul.f32 %v2979_v11, %v569_v50  ;;  %v570_v55 = vmul.f32 %v2570_v47, %v2937_v27 }
  0x61   : > { %591 = vst.msk [vmem:[#allocation2 + $0x51] sm:$0xff] %vm586_vm3, %v581_v44  ;;  %v577_v58 = vmul.f32 %v2979_v11, %v568_v35  ;;  %v575_v20 = vmul.f32 %v2572_v51, %v2941_v31  ;;  %v1392_v35 = vsel %vm894_vm2, %v2472_v42, 0  ;;  %v2474_v51 = vld [vmem:[%s3331_s5 + $0x30] sm:$0x3f]  }
  0x62   : > { %588 = vst.msk [vmem:[#allocation2 + $0x21] sm:$0xff] %vm586_vm3, %v578_v49  ;;  %v579_v56 = vmul.f32 %v2979_v11, %v570_v55 }
  0x63   : > { %587 = vst.msk [vmem:[#allocation2 + $0x11] sm:$0xff] %vm586_vm3, %v577_v58  ;;  %v584_v22 = vmul.f32 %v2979_v11, %v575_v20 }
  0x64   : > { %589 = vst.msk [vmem:[#allocation2 + $0x31] sm:$0xff] %vm586_vm3, %v579_v56 }
  0x65   : > { %594 = vst.msk [vmem:[#allocation2 + $0x81] sm:$0xff] %vm586_vm3, %v584_v22 }
  0xb1   : > { %v694_v27 = vpop.permute.xlu1 %693 }
  0xb2   : > { %713 = vst.msk [vmem:[#allocation2 + $0x61] sm:$0xff] %vm707_vm5, %v694_v27  ;;  %v690_v31 = vpop.permute.xlu0 %689  ;;  %v1516_v27 = vsel %vm894_vm2, %v2473_v29, 0 }
  0xb3   : > { %711 = vst.msk [vmem:[#allocation2 + $0x41] sm:$0xff] %vm707_vm5, %v690_v31  ;;  %v2475_v31 = vld [vmem:[%s3331_s5 + $0x38] sm:$0x3f]  }
  0xb5   : > { %v696_v57 = vpop.permute.xlu1 %695 }
  0xb6   : > { %714 = vst.msk [vmem:[#allocation2 + $0x71] sm:$0xff] %vm707_vm5, %v696_v57  ;;  %v692_v52 = vpop.permute.xlu0 %691 }
  0xb7   : > { %712 = vst.msk [vmem:[#allocation2 + $0x51] sm:$0xff] %vm707_vm5, %v692_v52 }
  0xb9   : > { %v686_v59 = vpop.permute.xlu1 %685 }
  0xba   : > { %709 = vst.msk [vmem:[#allocation2 + $0x21] sm:$0xff] %vm707_vm5, %v686_v59  ;;  %v684_v61 = vpop.permute.xlu0 %683 }
  0xbb   : > { %708 = vst.msk [vmem:[#allocation2 + $0x11] sm:$0xff] %vm707_vm5, %v684_v61 }
  0xbd   : > { %v822_v0 = vpop.permute.xlu1 %821 }
  0xbe   : > { %842 = vst.msk [vmem:[#allocation2 + $0x51] sm:$0xff] %vm837_vm6, %v822_v0  ;;  %v820_v63 = vpop.permute.xlu0 %819 }
  0xbf   : > { %841 = vst.msk [vmem:[#allocation2 + $0x41] sm:$0xff] %vm837_vm6, %v820_v63  ;;  %v1641_v63 = vsel %vm894_vm2, %v2474_v51, 0 }
  0xc1   : > { %v826_v53 = vpop.permute.xlu1 %825 }
  0xc2   : > { %844 = vst.msk [vmem:[#allocation2 + $0x71] sm:$0xff] %vm837_vm6, %v826_v53  ;;  %v824_v3 = vpop.permute.xlu0 %823  ;;  %v2476_v53 = vld [vmem:[%s3331_s5 + $0x40] sm:$0x3f]  }
  0xc3   : > { %843 = vst.msk [vmem:[#allocation2 + $0x61] sm:$0xff] %vm837_vm6, %v824_v3 }
  0xc5   : > { %v814_v4 = vpop.permute.xlu1 %813  ;;  %v3063_v5 = vld [vmem:[#allocation2 + $0x50] sm:$0xff] }
  0xc6   : > { %838 = vst.msk [vmem:[#allocation2 + $0x11] sm:$0xff] %vm837_vm6, %v814_v4  ;;  %v688_v9 = vpop.permute.xlu0 %687  ;;  %v3066_v10 = vld [vmem:[#allocation2 + $0x40] sm:$0xff]  ;;  %v984_v36 = vld [vmem:[#allocation2 + $0x51] sm:$0xff] }
  0xc7   : > { %710 = vst.msk [vmem:[#allocation2 + $0x31] sm:$0xff] %vm707_vm5, %v688_v9  ;;  %v3071_v11 = vpack.c.bf16 %v3063_v5, %v3066_v10  ;;  %v983_v26 = vld [vmem:[#allocation2 + $0x41] sm:$0xff]  ;;  %v1108_v46 = vld [vmem:[#allocation2 + $0x52] sm:$0xff] }
  0xc8   : > { %v3107_v37 = vpack.c.bf16 %v984_v36, %v983_v26  ;;  %v1107_v48 = vld [vmem:[#allocation2 + $0x42] sm:$0xff] }
  0xc9   : > { %2329 = vmatprep.mubr.msk.bf16.mxu1 %vm462_vm0, %v3071_v11  ;;  %v818_v12 = vpop.permute.xlu1 %817  ;;  %v3075_v13 = vld [vmem:[#allocation2 + $0x70] sm:$0xff]  ;;  %v3127_v47 = vpack.c.bf16 %v1108_v46, %v1107_v48 }
  0xca   : > { %840 = vst.msk [vmem:[#allocation2 + $0x31] sm:$0xff] %vm837_vm6, %v818_v12  ;;  %v3078_v14 = vld [vmem:[#allocation2 + $0x60] sm:$0xff]  ;;  %v986_v39 = vld [vmem:[#allocation2 + $0x71] sm:$0xff] }
  0xcb   : > { %v3082_v15 = vpack.c.bf16 %v3075_v13, %v3078_v14  ;;  %v985_v40 = vld [vmem:[#allocation2 + $0x61] sm:$0xff]  ;;  %v1110_v55 = vld [vmem:[#allocation2 + $0x72] sm:$0xff]  ;;  %v1237_v56 = vpack.c.bf16 %v3078_v14, %v3063_v5  ;;  %v1889_v14 = vsel %vm894_vm2, %v2476_v53, 0 }
  0xcc   : > { %v990_v30 = vpack.c.bf16 %v986_v39, %v985_v40  ;;  %v1109_v49 = vld [vmem:[#allocation2 + $0x62] sm:$0xff]  ;;  %v1361_v61 = vpack.c.bf16 %v985_v40, %v984_v36 }
  0xcd   : > { %v816_v7 = vpop.permute.xlu0 %815  ;;  %2330 = vmatmul.mubr.msk.bf16.vlgmr.msra.gmra.mrb[0].mxu1 %vm462_vm0, %v3082_v15  ;;  %v856_v21 = vld [vmem:[#allocation2 + $0x10] sm:$0xff]  ;;  %v1114_v58 = vpack.c.bf16 %v1110_v55, %v1109_v49  ;;  %v1485_v9 = vpack.c.bf16 %v1109_v49, %v1108_v46 }
  0xce   : > { %v3091_v8 = vld [vmem:[#allocation2 + $0x11] sm:$0xff]  ;;  %839 = vst.msk [vmem:[#allocation2 + $0x21] sm:$0xff] %vm837_vm6, %v816_v7  ;;  %2334 = vmatpush3.bf16.msra.mxu1 %v1020_v16  ;;  %v863_v24 = vpack.c.bf16 %v856_v21, %v855_v17 }
  0xcf   : > { %v987_v1 = vpack.c.bf16 %v3091_v8, %v979_v18  ;;  %2419 = vmatprep.subr.msk.bf16.mxu1 %vm894_vm2, %v2471_v19  ;;  %v828_v54 = vpop.permute.xlu1 %827  ;;  %v1104_v2 = vld [vmem:[#allocation2 + $0x12] sm:$0xff] }
  0xd0   : > { %2325 = vmatprep.mubr.msk.bf16.mxu0 %vm462_vm0, %v863_v24  ;;  %v1111_v38 = vpack.c.bf16 %v1104_v2, %v1103_v23  ;;  %v1607_v16 = vld [vmem:[#allocation2 + $0x90] sm:$0xff]  ;;  %v874_v24 = vld [vmem:[#allocation3 + $0x38] sm:$0xff] }
  0xd1   : > { %2335 = vmatprep.mubr.msk.bf16.mxu1 %vm462_vm0, %v987_v1  ;;  %v698_v25 = vpop.permute.xlu0 %697  ;;  %v858_v60 = vld [vmem:[#allocation2 + $0x30] sm:$0xff] }
  0xd2   : > { %715 = vst.msk [vmem:[#allocation2 + $0x81] sm:$0xff] %vm707_vm5, %v698_v25  ;;  %v3100_v62 = vld [vmem:[#allocation2 + $0x31] sm:$0xff]  ;;  %v1236_v20 = vpack.c.bf16 %v3066_v10, %v858_v60  ;;  %v1765_v10 = vsel %vm894_vm2, %v2475_v31, 0  ;;  %v872_v25 = vld [vmem:[#allocation3 + $0x28] sm:$0xff] }
  0xd3   : > { %845 = vst.msk [vmem:[#allocation2 + $0x81] sm:$0xff] %vm837_vm6, %v828_v54  ;;  %v1106_v45 = vld [vmem:[#allocation2 + $0x32] sm:$0xff]  ;;  %v1360_v59 = vpack.c.bf16 %v983_v26, %v3100_v62 }
  0xd4   : > { %v1484_v5 = vpack.c.bf16 %v1107_v48, %v1106_v45  ;;  %v1731_v18 = vld [vmem:[#allocation2 + $0x91] sm:$0xff] }
  0xd5   : > { %v857_v32 = vld [vmem:[#allocation2 + $0x20] sm:$0xff]  ;;  %v873_v7 = vld [vmem:[#allocation3 + $0x30] sm:$0xff] }
  0xd6   : > { %v981_v28 = vld [vmem:[#allocation2 + $0x21] sm:$0xff]  ;;  %v3102_v33 = vpack.c.bf16 %v858_v60, %v857_v32  ;;  %v1235_v44 = vpack.c.bf16 %v857_v32, %v856_v21 }
  0xd7   : > { %v3105_v34 = vpack.c.bf16 %v3100_v62, %v981_v28  ;;  %v1105_v43 = vld [vmem:[#allocation2 + $0x22] sm:$0xff]  ;;  %v1359_v22 = vpack.c.bf16 %v981_v28, %v3091_v8 }
  0xd8   : > { %2326 = vmatmul.mubr.msk.bf16.vlgmr.msra.gmra.mrb[0].mxu0 %vm462_vm0, %v3102_v33  ;;  %v1112_v50 = vpack.c.bf16 %v1106_v45, %v1105_v43  ;;  %v1483_v0 = vpack.c.bf16 %v1105_v43, %v1104_v2  ;;  %v871_v21 = vld [vmem:[#allocation3 + $0x20] sm:$0xff]  ;;  %v869_v2 = vld [vmem:[#allocation3 + $0x10] sm:$0xff] }
  0xd9   : > { %2336 = vmatmul.mubr.msk.bf16.vlgmr.msra.gmra.mrb[4].mxu1 %vm462_vm0, %v3105_v34  ;;  %2345 = vmatprep.mubr.msk.bf16.mxu0 %vm462_vm0, %v1111_v38  ;;  %v867_v32 = vld [vmem:[#allocation3] sm:$0xff] }
  0xda   : > { %2339 = vmatprep.mubr.msk.bf16.mxu1 %vm462_vm0, %v3107_v37  ;;  %2344 = vmatpush3.bf16.msra.mxu0 %v1144_v6  ;;  %v1234_v57 = vld [vmem:[#allocation2 + $0x80] sm:$0xff] }
  0xdb   : > { %2354 = vmatpush3.bf16.msra.mxu1 %v1268_v41  ;;  %2420 = vmatprep.subr.msk.bf16.mxu0 %vm894_vm2, %v2472_v42  ;;  %v1238_v52 = vpack.c.bf16 %v1234_v57, %v3075_v13  ;;  %v1358_v3 = vld [vmem:[#allocation2 + $0x81] sm:$0xff]  ;;  %v1611_v17 = vpack.c.bf16 %v1607_v16, %v1234_v57 }
  0xdc   : > { %2421 = vmatprep.subr.msk.bf16.mxu1 %vm894_vm2, %v2473_v29  ;;  %v1362_v4 = vpack.c.bf16 %v1358_v3, %v986_v39  ;;  %v1482_v12 = vld [vmem:[#allocation2 + $0x82] sm:$0xff] }
  0xdd   : > { %v1486_v13 = vpack.c.bf16 %v1482_v12, %v1110_v55  ;;  %v868_v41 = vld [vmem:[#allocation3 + $0x8] sm:$0xff] }
  0xe0   : > { %2346 = vmatmul.mubr.msk.bf16.vlgmr.msra.gmra.mrb[4].mxu0 %vm462_vm0, %v1112_v50 }
  0xe1   : > { %2340 = vmatmul.mubr.msk.bf16.gmra.mrb[8].mxu1 %vm462_vm0, %v990_v30  ;;  %2349 = vmatprep.mubr.msk.bf16.mxu0 %vm462_vm0, %v3127_v47 }
  0xe2   : > { %2355 = vmatprep.mubr.msk.bf16.mxu1 %vm462_vm0, %v1235_v44  ;;  %2364 = vmatpush3.bf16.msra.mxu0 %v1392_v35 }
  0xe3   : > { %2422 = vmatprep.subr.msk.bf16.mxu0 %vm894_vm2, %v2474_v51 }
  0xe8   : > { %2350 = vmatmul.mubr.msk.bf16.gmra.mrb[8].mxu0 %vm462_vm0, %v1114_v58 }
  0xe9   : > { %2356 = vmatmul.mubr.msk.bf16.vlgmr.msra.gmra.mrb[12].mxu1 %vm462_vm0, %v1236_v20  ;;  %2365 = vmatprep.mubr.msk.bf16.mxu0 %vm462_vm0, %v1359_v22 }
  0xea   : > { %2359 = vmatprep.mubr.msk.bf16.mxu1 %vm462_vm0, %v1237_v56  ;;  %2374 = vmatpush3.bf16.msra.mxu1 %v1516_v27 }
  0xeb   : > { %2423 = vmatprep.subr.msk.bf16.mxu1 %vm894_vm2, %v2475_v31 }
  0xf0   : > { %2366 = vmatmul.mubr.msk.bf16.vlgmr.msra.gmra.mrb[12].mxu0 %vm462_vm0, %v1360_v59 }
  0xf1   : > { %2360 = vmatmul.mubr.msk.bf16.gmra.mrb[16].mxu1 %vm462_vm0, %v1238_v52  ;;  %2369 = vmatprep.mubr.msk.bf16.mxu0 %vm462_vm0, %v1361_v61 }
  0xf2   : > { %2375 = vmatprep.mubr.msk.bf16.mxu1 %vm462_vm0, %v1483_v0  ;;  %2384 = vmatpush3.bf16.msra.mxu0 %v1641_v63 }
  0xf3   : > { %2424 = vmatprep.subr.msk.bf16.mxu0 %vm894_vm2, %v2476_v53 }
  0xf8   : > { %2370 = vmatmul.mubr.msk.bf16.gmra.mrb[16].mxu0 %vm462_vm0, %v1362_v4 }
  0xf9   : > { %2376 = vmatmul.mubr.msk.bf16.vlgmr.msra.gmra.mrb[20].mxu1 %vm462_vm0, %v1484_v5  ;;  %2385 = vmatprep.mubr.msk.bf16.mxu0 %vm462_vm0, %v3102_v33 }
  0xfa   : > { %2379 = vmatprep.mubr.msk.bf16.mxu1 %vm462_vm0, %v1485_v9  ;;  %2394 = vmatpush3.bf16.msra.mxu1 %v1765_v10 }
 0x100   : > { %2386 = vmatmul.mubr.msk.bf16.vlgmr.msra.gmra.mrb[20].mxu0 %vm462_vm0, %v3071_v11  ;;  %v1735_v11 = vpack.c.bf16 %v1731_v18, %v1358_v3 }
 0x101   : > { %2380 = vmatmul.mubr.msk.bf16.gmra.mrb[24].mxu1 %vm462_vm0, %v1486_v13  ;;  %2389 = vmatprep.mubr.msk.bf16.mxu0 %vm462_vm0, %v3082_v15  ;;  %v1855_v15 = vld [vmem:[#allocation2 + $0x92] sm:$0xff] }
 0x102   : > { %2395 = vmatprep.mubr.msk.bf16.mxu1 %vm462_vm0, %v3105_v34  ;;  %2404 = vmatpush3.bf16.msra.mxu0 %v1889_v14  ;;  %v1859_v19 = vpack.c.bf16 %v1855_v15, %v1482_v12  ;;  %v870_v34 = vld [vmem:[#allocation3 + $0x18] sm:$0xff] }
 0x108   : > { %2390 = vmatmul.mubr.msk.bf16.gmra.mrb[24].mxu0 %vm462_vm0, %v1611_v17 }
 0x109   : > { %2396 = vmatmul.mubr.msk.bf16.vlgmr.msra.gmra.mrb[28].mxu1 %vm462_vm0, %v3107_v37  ;;  %2405 = vmatprep.mubr.msk.bf16.mxu0 %vm462_vm0, %v1112_v50 }
 0x10a   : > { %2399 = vmatprep.mubr.msk.bf16.mxu1 %vm462_vm0, %v990_v30 }
 0x110   : > { %2406 = vmatmul.mubr.msk.bf16.vlgmr.msra.gmra.mrb[28].mxu0 %vm462_vm0, %v3127_v47 }
 0x111   : > { %2400 = vmatmul.mubr.msk.bf16.gmra.mrb[32].mxu1 %vm462_vm0, %v1735_v11  ;;  %2409 = vmatprep.mubr.msk.bf16.mxu0 %vm462_vm0, %v1114_v58 }
 0x118   : > { %2410 = vmatmul.mubr.msk.bf16.gmra.mrb[32].mxu0 %vm462_vm0, %v1859_v19 }
 0x1a0   : > { %v2331_v8 = vpop.f32.mrb[0].mxu1 }
 0x1a1   : > { %v969_v1 = vadd.f32 %v2331_v8, %v873_v7  ;;  %v948_v54 = vpop.f32.mrb[1].mxu1 }
 0x1a2   : > { %v967_v60 = vadd.f32 %v948_v54, %v871_v21  ;;  %v2332_v62 = vpop.f32.mrb[2].mxu1 }
 0x1a3   : > { %977 = vst.msk [vmem:[#allocation3 + $0x30] sm:$0xff] %vm846_vm4, %v969_v1  ;;  %v970_v23 = vadd.f32 %v2332_v62, %v874_v24  ;;  %v951_v26 = vpop.f32.mrb[3].mxu1 }
 0x1a4   : > { %975 = vst.msk [vmem:[#allocation3 + $0x20] sm:$0xff] %vm846_vm4, %v967_v60  ;;  %v968_v36 = vadd.f32 %v951_v26, %v872_v25 }
 0x1a5   : > { %978 = vst.msk [vmem:[#allocation3 + $0x38] sm:$0xff] %vm846_vm4, %v970_v23 }
 0x1a6   : > { %976 = vst.msk [vmem:[#allocation3 + $0x28] sm:$0xff] %vm846_vm4, %v968_v36 }
 0x1aa   : > { %v997_v46 = vld [vmem:[#allocation3 + $0x30] sm:$0xff] }
 0x1ab   : > { %v2327_v28 = vpop.f32.mrb[0].mxu0  ;;  %v995_v44 = vld [vmem:[#allocation3 + $0x20] sm:$0xff] }
 0x1ac   : > { %v2337_v33 = vpop.f32.mrb[4].mxu1  ;;  %v965_v37 = vadd.f32 %v2327_v28, %v869_v2  ;;  %v932_v38 = vpop.f32.mrb[1].mxu0  ;;  %v998_v58 = vld [vmem:[#allocation3 + $0x38] sm:$0xff] }
 0x1ad   : > { %v1056_v6 = vpop.f32.mrb[5].mxu1  ;;  %v963_v42 = vadd.f32 %v932_v38, %v867_v32  ;;  %v2328_v29 = vpop.f32.mrb[2].mxu0  ;;  %v996_v57 = vld [vmem:[#allocation3 + $0x28] sm:$0xff] }
 0x1ae   : > { %v2338_v39 = vpop.f32.mrb[6].mxu1  ;;  %973 = vst.msk [vmem:[#allocation3 + $0x10] sm:$0xff] %vm846_vm4, %v965_v37  ;;  %v966_v40 = vadd.f32 %v2328_v29, %v870_v34  ;;  %v935_v43 = vpop.f32.mrb[3].mxu0 }
 0x1af   : > { %v1059_v45 = vpop.f32.mrb[7].mxu1  ;;  %971 = vst.msk [vmem:[#allocation3] sm:$0xff] %vm846_vm4, %v963_v42  ;;  %v964_v48 = vadd.f32 %v935_v43, %v868_v41 }
 0x1b0   : > { %974 = vst.msk [vmem:[#allocation3 + $0x18] sm:$0xff] %vm846_vm4, %v966_v40 }
 0x1b1   : > { %972 = vst.msk [vmem:[#allocation3 + $0x8] sm:$0xff] %vm846_vm4, %v964_v48 }
 0x1b3   : > { %v2347_v50 = vpop.f32.mrb[4].mxu0 }
 0x1b4   : > { %v2341_v30 = vpop.f32.mrb[8].mxu1  ;;  %v1180_v51 = vpop.f32.mrb[5].mxu0 }
 0x1b5   : > { %v1093_v47 = vadd.f32 %v2341_v30, %v997_v46  ;;  %v1072_v35 = vpop.f32.mrb[9].mxu1  ;;  %v993_v49 = vld [vmem:[#allocation3 + $0x10] sm:$0xff]  ;;  %v2348_v56 = vpop.f32.mrb[6].mxu0 }
 0x1b6   : > { %v1091_v55 = vadd.f32 %v1072_v35, %v995_v44  ;;  %v2342_v20 = vpop.f32.mrb[10].mxu1  ;;  %v1089_v22 = vadd.f32 %v2337_v33, %v993_v49  ;;  %v991_v27 = vld [vmem:[#allocation3] sm:$0xff]  ;;  %v1183_v59 = vpop.f32.mrb[7].mxu0 }
 0x1b7   : > { %1101 = vst.msk [vmem:[#allocation3 + $0x30] sm:$0xff] %vm846_vm4, %v1093_v47  ;;  %v1094_v31 = vadd.f32 %v2342_v20, %v998_v58  ;;  %v1075_v52 = vpop.f32.mrb[11].mxu1  ;;  %v1087_v61 = vadd.f32 %v1056_v6, %v991_v27  ;;  %v994_v0 = vld [vmem:[#allocation3 + $0x18] sm:$0xff] }
 0x1b8   : > { %1099 = vst.msk [vmem:[#allocation3 + $0x20] sm:$0xff] %vm846_vm4, %v1091_v55  ;;  %v1092_v63 = vadd.f32 %v1075_v52, %v996_v57  ;;  %1097 = vst.msk [vmem:[#allocation3 + $0x10] sm:$0xff] %vm846_vm4, %v1089_v22  ;;  %v1090_v53 = vadd.f32 %v2338_v39, %v994_v0  ;;  %v992_v3 = vld [vmem:[#allocation3 + $0x8] sm:$0xff] }
 0x1b9   : > { %1102 = vst.msk [vmem:[#allocation3 + $0x38] sm:$0xff] %vm846_vm4, %v1094_v31  ;;  %1095 = vst.msk [vmem:[#allocation3] sm:$0xff] %vm846_vm4, %v1087_v61  ;;  %v1088_v4 = vadd.f32 %v1059_v45, %v992_v3 }
 0x1ba   : > { %1100 = vst.msk [vmem:[#allocation3 + $0x28] sm:$0xff] %vm846_vm4, %v1092_v63  ;;  %1098 = vst.msk [vmem:[#allocation3 + $0x18] sm:$0xff] %vm846_vm4, %v1090_v53 }
 0x1bb   : > { %1096 = vst.msk [vmem:[#allocation3 + $0x8] sm:$0xff] %vm846_vm4, %v1088_v4  ;;  %v2351_v5 = vpop.f32.mrb[8].mxu0 }
 0x1bc   : > { %v2357_v9 = vpop.f32.mrb[12].mxu1  ;;  %v1196_v10 = vpop.f32.mrb[9].mxu0 }
 0x1bd   : > { %v1304_v12 = vpop.f32.mrb[13].mxu1  ;;  %v2352_v14 = vpop.f32.mrb[10].mxu0 }
 0x1be   : > { %v1121_v13 = vld [vmem:[#allocation3 + $0x30] sm:$0xff]  ;;  %v2358_v16 = vpop.f32.mrb[14].mxu1  ;;  %v1199_v11 = vpop.f32.mrb[11].mxu0 }
 0x1bf   : > { %v1217_v17 = vadd.f32 %v2351_v5, %v1121_v13  ;;  %v1119_v18 = vld [vmem:[#allocation3 + $0x20] sm:$0xff]  ;;  %v1307_v15 = vpop.f32.mrb[15].mxu1  ;;  %v1117_v19 = vld [vmem:[#allocation3 + $0x10] sm:$0xff] }
 0x1c0   : > { %v1215_v7 = vadd.f32 %v1196_v10, %v1119_v18  ;;  %v1122_v21 = vld [vmem:[#allocation3 + $0x38] sm:$0xff]  ;;  %v1213_v8 = vadd.f32 %v2347_v50, %v1117_v19  ;;  %v1115_v24 = vld [vmem:[#allocation3] sm:$0xff] }
 0x1c1   : > { %1225 = vst.msk [vmem:[#allocation3 + $0x30] sm:$0xff] %vm846_vm4, %v1217_v17  ;;  %v1218_v1 = vadd.f32 %v2352_v14, %v1122_v21  ;;  %v1120_v54 = vld [vmem:[#allocation3 + $0x28] sm:$0xff]  ;;  %v1211_v25 = vadd.f32 %v1180_v51, %v1115_v24  ;;  %v1118_v60 = vld [vmem:[#allocation3 + $0x18] sm:$0xff] }
 0x1c2   : > { %1223 = vst.msk [vmem:[#allocation3 + $0x20] sm:$0xff] %vm846_vm4, %v1215_v7  ;;  %v1216_v62 = vadd.f32 %v1199_v11, %v1120_v54  ;;  %1221 = vst.msk [vmem:[#allocation3 + $0x10] sm:$0xff] %vm846_vm4, %v1213_v8  ;;  %v1214_v23 = vadd.f32 %v2348_v56, %v1118_v60  ;;  %v1116_v26 = vld [vmem:[#allocation3 + $0x8] sm:$0xff] }
 0x1c3   : > { %1226 = vst.msk [vmem:[#allocation3 + $0x38] sm:$0xff] %vm846_vm4, %v1218_v1  ;;  %1219 = vst.msk [vmem:[#allocation3] sm:$0xff] %vm846_vm4, %v1211_v25  ;;  %v1212_v36 = vadd.f32 %v1183_v59, %v1116_v26  ;;  %v2367_v32 = vpop.f32.mrb[12].mxu0 }
 0x1c4   : > { %1224 = vst.msk [vmem:[#allocation3 + $0x28] sm:$0xff] %vm846_vm4, %v1216_v62  ;;  %v2361_v2 = vpop.f32.mrb[16].mxu1  ;;  %1222 = vst.msk [vmem:[#allocation3 + $0x18] sm:$0xff] %vm846_vm4, %v1214_v23  ;;  %v1428_v33 = vpop.f32.mrb[13].mxu0 }
 0x1c5   : > { %v1320_v28 = vpop.f32.mrb[17].mxu1  ;;  %1220 = vst.msk [vmem:[#allocation3 + $0x8] sm:$0xff] %vm846_vm4, %v1212_v36  ;;  %v2368_v37 = vpop.f32.mrb[14].mxu0 }
 0x1c6   : > { %v2362_v34 = vpop.f32.mrb[18].mxu1  ;;  %v1431_v6 = vpop.f32.mrb[15].mxu0 }
 0x1c7   : > { %v1323_v38 = vpop.f32.mrb[19].mxu1 }
 0x1c8   : > { %v1245_v41 = vld [vmem:[#allocation3 + $0x30] sm:$0xff] }
 0x1c9   : > { %v1341_v42 = vadd.f32 %v2361_v2, %v1245_v41  ;;  %v1243_v29 = vld [vmem:[#allocation3 + $0x20] sm:$0xff]  ;;  %v1241_v39 = vld [vmem:[#allocation3 + $0x10] sm:$0xff] }
 0x1ca   : > { %v1339_v40 = vadd.f32 %v1320_v28, %v1243_v29  ;;  %v1246_v43 = vld [vmem:[#allocation3 + $0x38] sm:$0xff]  ;;  %v1337_v45 = vadd.f32 %v2357_v9, %v1241_v39  ;;  %v1239_v48 = vld [vmem:[#allocation3] sm:$0xff] }
 0x1cb   : > { %1349 = vst.msk [vmem:[#allocation3 + $0x30] sm:$0xff] %vm846_vm4, %v1341_v42  ;;  %v1342_v46 = vadd.f32 %v2362_v34, %v1246_v43  ;;  %v1244_v30 = vld [vmem:[#allocation3 + $0x28] sm:$0xff]  ;;  %v1335_v50 = vadd.f32 %v1304_v12, %v1239_v48  ;;  %v1242_v47 = vld [vmem:[#allocation3 + $0x18] sm:$0xff]  ;;  %v2371_v35 = vpop.f32.mrb[16].mxu0 }
 0x1cc   : > { %1347 = vst.msk [vmem:[#allocation3 + $0x20] sm:$0xff] %vm846_vm4, %v1339_v40  ;;  %v1340_v44 = vadd.f32 %v1323_v38, %v1244_v30  ;;  %v2377_v51 = vpop.f32.mrb[20].mxu1  ;;  %1345 = vst.msk [vmem:[#allocation3 + $0x10] sm:$0xff] %vm846_vm4, %v1337_v45  ;;  %v1338_v49 = vadd.f32 %v2358_v16, %v1242_v47  ;;  %v1240_v55 = vld [vmem:[#allocation3 + $0x8] sm:$0xff]  ;;  %v1444_v58 = vpop.f32.mrb[17].mxu0 }
 0x1cd   : > { %1350 = vst.msk [vmem:[#allocation3 + $0x38] sm:$0xff] %vm846_vm4, %v1342_v46  ;;  %v1552_v20 = vpop.f32.mrb[21].mxu1  ;;  %1343 = vst.msk [vmem:[#allocation3] sm:$0xff] %vm846_vm4, %v1335_v50  ;;  %v1336_v56 = vadd.f32 %v1307_v15, %v1240_v55  ;;  %v2372_v22 = vpop.f32.mrb[18].mxu0 }
 0x1ce   : > { %1348 = vst.msk [vmem:[#allocation3 + $0x28] sm:$0xff] %vm846_vm4, %v1340_v44  ;;  %v2378_v27 = vpop.f32.mrb[22].mxu1  ;;  %1346 = vst.msk [vmem:[#allocation3 + $0x18] sm:$0xff] %vm846_vm4, %v1338_v49  ;;  %v1447_v31 = vpop.f32.mrb[19].mxu0 }
 0x1cf   : > { %v1555_v57 = vpop.f32.mrb[23].mxu1  ;;  %1344 = vst.msk [vmem:[#allocation3 + $0x8] sm:$0xff] %vm846_vm4, %v1336_v56 }
 0x1d2   : > { %v1369_v52 = vld [vmem:[#allocation3 + $0x30] sm:$0xff] }
 0x1d3   : > { %v1465_v59 = vadd.f32 %v2371_v35, %v1369_v52  ;;  %v1367_v61 = vld [vmem:[#allocation3 + $0x20] sm:$0xff]  ;;  %v1365_v0 = vld [vmem:[#allocation3 + $0x10] sm:$0xff]  ;;  %v3219_v4 = vpop.f32.mrb[20].mxu0 }
 0x1d4   : > { %v1463_v63 = vadd.f32 %v1444_v58, %v1367_v61  ;;  %v1370_v53 = vld [vmem:[#allocation3 + $0x38] sm:$0xff]  ;;  %v2381_v3 = vpop.f32.mrb[24].mxu1  ;;  %v1461_v5 = vadd.f32 %v2367_v32, %v1365_v0  ;;  %v1363_v9 = vld [vmem:[#allocation3] sm:$0xff]  ;;  %v3222_v14 = vpop.f32.mrb[21].mxu0 }
 0x1d5   : > { %1473 = vst.msk [vmem:[#allocation3 + $0x30] sm:$0xff] %vm846_vm4, %v1465_v59  ;;  %v1466_v10 = vadd.f32 %v2372_v22, %v1370_v53  ;;  %v1368_v12 = vld [vmem:[#allocation3 + $0x28] sm:$0xff]  ;;  %v1568_v13 = vpop.f32.mrb[25].mxu1  ;;  %v1459_v16 = vadd.f32 %v1428_v33, %v1363_v9  ;;  %v1366_v17 = vld [vmem:[#allocation3 + $0x18] sm:$0xff]  ;;  %v3225_v15 = vpop.f32.mrb[22].mxu0 }
 0x1d6   : > { %1471 = vst.msk [vmem:[#allocation3 + $0x20] sm:$0xff] %vm846_vm4, %v1463_v63  ;;  %v1464_v18 = vadd.f32 %v1447_v31, %v1368_v12  ;;  %v2382_v11 = vpop.f32.mrb[26].mxu1  ;;  %1469 = vst.msk [vmem:[#allocation3 + $0x10] sm:$0xff] %vm846_vm4, %v1461_v5  ;;  %v1462_v19 = vadd.f32 %v2368_v37, %v1366_v17  ;;  %v1364_v7 = vld [vmem:[#allocation3 + $0x8] sm:$0xff]  ;;  %v3229_v8 = vpop.f32.mrb[23].mxu0 }
 0x1d7   : > { %1474 = vst.msk [vmem:[#allocation3 + $0x38] sm:$0xff] %vm846_vm4, %v1466_v10  ;;  %v1571_v21 = vpop.f32.mrb[27].mxu1  ;;  %1467 = vst.msk [vmem:[#allocation3] sm:$0xff] %vm846_vm4, %v1459_v16  ;;  %v1460_v24 = vadd.f32 %v1431_v6, %v1364_v7 }
 0x1d8   : > { %1472 = vst.msk [vmem:[#allocation3 + $0x28] sm:$0xff] %vm846_vm4, %v1464_v18  ;;  %1470 = vst.msk [vmem:[#allocation3 + $0x18] sm:$0xff] %vm846_vm4, %v1462_v19 }
 0x1d9   : > { %1468 = vst.msk [vmem:[#allocation3 + $0x8] sm:$0xff] %vm846_vm4, %v1460_v24 }
 0x1db   : > { %v2391_v54 = vpop.f32.mrb[24].mxu0 }
 0x1dc   : > { %v1493_v1 = vld [vmem:[#allocation3 + $0x30] sm:$0xff]  ;;  %v3235_v25 = vpop.f32.mrb[28].mxu1  ;;  %v1693_v23 = vpop.f32.mrb[25].mxu0 }
 0x1dd   : > { %v1589_v60 = vadd.f32 %v2381_v3, %v1493_v1  ;;  %v1491_v62 = vld [vmem:[#allocation3 + $0x20] sm:$0xff]  ;;  %v3237_v26 = vpop.f32.mrb[29].mxu1  ;;  %v1489_v36 = vld [vmem:[#allocation3 + $0x10] sm:$0xff]  ;;  %v2392_v28 = vpop.f32.mrb[26].mxu0 }
 0x1de   : > { %v1587_v2 = vadd.f32 %v1568_v13, %v1491_v62  ;;  %v1494_v32 = vld [vmem:[#allocation3 + $0x38] sm:$0xff]  ;;  %v3239_v33 = vpop.f32.mrb[30].mxu1  ;;  %v1585_v34 = vadd.f32 %v2377_v51, %v1489_v36  ;;  %v1487_v37 = vld [vmem:[#allocation3] sm:$0xff]  ;;  %v1696_v41 = vpop.f32.mrb[27].mxu0 }
 0x1df   : > { %1597 = vst.msk [vmem:[#allocation3 + $0x30] sm:$0xff] %vm846_vm4, %v1589_v60  ;;  %v1590_v38 = vadd.f32 %v2382_v11, %v1494_v32  ;;  %v1492_v6 = vld [vmem:[#allocation3 + $0x28] sm:$0xff]  ;;  %v3242_v42 = vpop.f32.mrb[31].mxu1  ;;  %v1583_v29 = vadd.f32 %v1552_v20, %v1487_v37  ;;  %v1490_v39 = vld [vmem:[#allocation3 + $0x18] sm:$0xff] }
 0x1e0   : > { %1595 = vst.msk [vmem:[#allocation3 + $0x20] sm:$0xff] %vm846_vm4, %v1587_v2  ;;  %v1588_v40 = vadd.f32 %v1571_v21, %v1492_v6  ;;  %1593 = vst.msk [vmem:[#allocation3 + $0x10] sm:$0xff] %vm846_vm4, %v1585_v34  ;;  %v1586_v43 = vadd.f32 %v2378_v27, %v1490_v39  ;;  %v1488_v45 = vld [vmem:[#allocation3 + $0x8] sm:$0xff] }
 0x1e1   : > { %1598 = vst.msk [vmem:[#allocation3 + $0x38] sm:$0xff] %vm846_vm4, %v1590_v38  ;;  %1591 = vst.msk [vmem:[#allocation3] sm:$0xff] %vm846_vm4, %v1583_v29  ;;  %v1584_v48 = vadd.f32 %v1555_v57, %v1488_v45 }
 0x1e2   : > { %1596 = vst.msk [vmem:[#allocation3 + $0x28] sm:$0xff] %vm846_vm4, %v1588_v40  ;;  %1594 = vst.msk [vmem:[#allocation3 + $0x18] sm:$0xff] %vm846_vm4, %v1586_v43  ;;  %v2273_v40 = vld [vmem:[%s3332_s6] ss:$0 sm:$0xff] }
 0x1e3   : > { %1592 = vst.msk [vmem:[#allocation3 + $0x8] sm:$0xff] %vm846_vm4, %v1584_v48  ;;  %v3251_v30 = vpop.f32.mrb[28].mxu0 }
 0x1e4   : > { %v2401_v46 = vpop.f32.mrb[32].mxu1  ;;  %v3253_v47 = vpop.f32.mrb[29].mxu0 }
 0x1e5   : > { %v1817_v50 = vpop.f32.mrb[33].mxu1  ;;  %v3255_v51 = vpop.f32.mrb[30].mxu0 }
 0x1e6   : > { %v1618_v44 = vld [vmem:[#allocation3 + $0x30] sm:$0xff]  ;;  %v2402_v35 = vpop.f32.mrb[34].mxu1  ;;  %v3257_v20 = vpop.f32.mrb[31].mxu0 }
 0x1e7   : > { %v1714_v49 = vadd.f32 %v2391_v54, %v1618_v44  ;;  %v1616_v55 = vld [vmem:[#allocation3 + $0x20] sm:$0xff]  ;;  %v1820_v58 = vpop.f32.mrb[35].mxu1  ;;  %v1614_v56 = vld [vmem:[#allocation3 + $0x10] sm:$0xff] }
 0x1e8   : > { %v1712_v22 = vadd.f32 %v1693_v23, %v1616_v55  ;;  %v1619_v27 = vld [vmem:[#allocation3 + $0x38] sm:$0xff]  ;;  %v1710_v31 = vadd.f32 %v3219_v4, %v1614_v56  ;;  %v1612_v57 = vld [vmem:[#allocation3] sm:$0xff] }
 0x1e9   : > { %1722 = vst.msk [vmem:[#allocation3 + $0x30] sm:$0xff] %vm846_vm4, %v1714_v49  ;;  %v1715_v52 = vadd.f32 %v2392_v28, %v1619_v27  ;;  %v1617_v59 = vld [vmem:[#allocation3 + $0x28] sm:$0xff]  ;;  %v1708_v61 = vadd.f32 %v3222_v14, %v1612_v57  ;;  %v1615_v0 = vld [vmem:[#allocation3 + $0x18] sm:$0xff] }
 0x1ea   : > { %1720 = vst.msk [vmem:[#allocation3 + $0x20] sm:$0xff] %vm846_vm4, %v1712_v22  ;;  %v1713_v63 = vadd.f32 %v1696_v41, %v1617_v59  ;;  %1718 = vst.msk [vmem:[#allocation3 + $0x10] sm:$0xff] %vm846_vm4, %v1710_v31  ;;  %v1711_v53 = vadd.f32 %v3225_v15, %v1615_v0  ;;  %v1613_v3 = vld [vmem:[#allocation3 + $0x8] sm:$0xff] }
 0x1eb   : > { %1723 = vst.msk [vmem:[#allocation3 + $0x38] sm:$0xff] %vm846_vm4, %v1715_v52  ;;  %1716 = vst.msk [vmem:[#allocation3] sm:$0xff] %vm846_vm4, %v1708_v61  ;;  %v1709_v4 = vadd.f32 %v3229_v8, %v1613_v3  ;;  %v2411_v5 = vpop.f32.mrb[32].mxu0 }
 0x1ec   : > { %1721 = vst.msk [vmem:[#allocation3 + $0x28] sm:$0xff] %vm846_vm4, %v1713_v63  ;;  %1719 = vst.msk [vmem:[#allocation3 + $0x18] sm:$0xff] %vm846_vm4, %v1711_v53  ;;  %v1941_v9 = vpop.f32.mrb[33].mxu0 }
 0x1ed   : > { %1717 = vst.msk [vmem:[#allocation3 + $0x8] sm:$0xff] %vm846_vm4, %v1709_v4  ;;  %v2412_v10 = vpop.f32.mrb[34].mxu0 }
 0x1ee   : > { %v1944_v12 = vpop.f32.mrb[35].mxu0 }
 0x1f0   : > { %v1742_v13 = vld [vmem:[#allocation3 + $0x30] sm:$0xff] }
 0x1f1   : > { %v1838_v14 = vadd.f32 %v2401_v46, %v1742_v13  ;;  %v1740_v16 = vld [vmem:[#allocation3 + $0x20] sm:$0xff]  ;;  %v1738_v17 = vld [vmem:[#allocation3 + $0x10] sm:$0xff] }
 0x1f2   : > { %v1836_v18 = vadd.f32 %v1817_v50, %v1740_v16  ;;  %v1743_v11 = vld [vmem:[#allocation3 + $0x38] sm:$0xff]  ;;  %v1834_v15 = vadd.f32 %v3235_v25, %v1738_v17  ;;  %v1736_v19 = vld [vmem:[#allocation3] sm:$0xff] }
 0x1f3   : > { %1846 = vst.msk [vmem:[#allocation3 + $0x30] sm:$0xff] %vm846_vm4, %v1838_v14  ;;  %v1839_v7 = vadd.f32 %v2402_v35, %v1743_v11  ;;  %v1741_v21 = vld [vmem:[#allocation3 + $0x28] sm:$0xff]  ;;  %v1832_v8 = vadd.f32 %v3237_v26, %v1736_v19  ;;  %v1739_v24 = vld [vmem:[#allocation3 + $0x18] sm:$0xff] }
 0x1f4   : > { %1844 = vst.msk [vmem:[#allocation3 + $0x20] sm:$0xff] %vm846_vm4, %v1836_v18  ;;  %v1837_v1 = vadd.f32 %v1820_v58, %v1741_v21  ;;  %1842 = vst.msk [vmem:[#allocation3 + $0x10] sm:$0xff] %vm846_vm4, %v1834_v15  ;;  %v1835_v54 = vadd.f32 %v3239_v33, %v1739_v24  ;;  %v1737_v60 = vld [vmem:[#allocation3 + $0x8] sm:$0xff] }
 0x1f5   : > { %1847 = vst.msk [vmem:[#allocation3 + $0x38] sm:$0xff] %vm846_vm4, %v1839_v7  ;;  %1840 = vst.msk [vmem:[#allocation3] sm:$0xff] %vm846_vm4, %v1832_v8  ;;  %v1833_v25 = vadd.f32 %v3242_v42, %v1737_v60 }
 0x1f6   : > { %1845 = vst.msk [vmem:[#allocation3 + $0x28] sm:$0xff] %vm846_vm4, %v1837_v1  ;;  %1843 = vst.msk [vmem:[#allocation3 + $0x18] sm:$0xff] %vm846_vm4, %v1835_v54 }
 0x1f7   : > { %1841 = vst.msk [vmem:[#allocation3 + $0x8] sm:$0xff] %vm846_vm4, %v1833_v25 }
 0x1fa   : > { %v1866_v62 = vld [vmem:[#allocation3 + $0x30] sm:$0xff] }
 0x1fb   : > { %v1962_v23 = vadd.f32 %v2411_v5, %v1866_v62  ;;  %v1864_v26 = vld [vmem:[#allocation3 + $0x20] sm:$0xff]  ;;  %v1862_v36 = vld [vmem:[#allocation3 + $0x10] sm:$0xff] }
 0x1fc   : > { %v1960_v2 = vadd.f32 %v1941_v9, %v1864_v26  ;;  %v1867_v32 = vld [vmem:[#allocation3 + $0x38] sm:$0xff]  ;;  %v1958_v28 = vadd.f32 %v3251_v30, %v1862_v36  ;;  %v1860_v33 = vld [vmem:[#allocation3] sm:$0xff] }
 0x1fd   : > { %1970 = vst.msk [vmem:[#allocation3 + $0x30] sm:$0xff] %vm846_vm4, %v1962_v23  ;;  %v1963_v34 = vadd.f32 %v2412_v10, %v1867_v32  ;;  %v1865_v37 = vld [vmem:[#allocation3 + $0x28] sm:$0xff]  ;;  %v1956_v38 = vadd.f32 %v3253_v47, %v1860_v33  ;;  %v1863_v6 = vld [vmem:[#allocation3 + $0x18] sm:$0xff] }
 0x1fe   : > { %1968 = vst.msk [vmem:[#allocation3 + $0x20] sm:$0xff] %vm846_vm4, %v1960_v2  ;;  %v1961_v41 = vadd.f32 %v1944_v12, %v1865_v37  ;;  %1966 = vst.msk [vmem:[#allocation3 + $0x10] sm:$0xff] %vm846_vm4, %v1958_v28  ;;  %v1959_v42 = vadd.f32 %v3255_v51, %v1863_v6  ;;  %v1861_v29 = vld [vmem:[#allocation3 + $0x8] sm:$0xff] }
 0x1ff   : > { %1971 = vst.msk [vmem:[#allocation3 + $0x38] sm:$0xff] %vm846_vm4, %v1963_v34  ;;  %1964 = vst.msk [vmem:[#allocation3] sm:$0xff] %vm846_vm4, %v1956_v38  ;;  %v1957_v39 = vadd.f32 %v3257_v20, %v1861_v29 }
 0x200   : > { %1969 = vst.msk [vmem:[#allocation3 + $0x28] sm:$0xff] %vm846_vm4, %v1961_v41  ;;  %1967 = vst.msk [vmem:[#allocation3 + $0x18] sm:$0xff] %vm846_vm4, %v1959_v42 }
 0x201   : > { %1965 = vst.msk [vmem:[#allocation3 + $0x8] sm:$0xff] %vm846_vm4, %v1957_v39 }
 0x204   : > { %v1978_v43 = vld [vmem:[#allocation3 + $0x30] sm:$0xff] }
 0x205   : > { %v1993_v45 = vadd.f32 %v2273_v40, %v1978_v43  ;;  %v1976_v48 = vld [vmem:[#allocation3 + $0x20] sm:$0xff]  ;;  %v1974_v46 = vld [vmem:[#allocation3 + $0x10] sm:$0xff] }
 0x206   : > { %v1991_v30 = vadd.f32 %v2273_v40, %v1976_v48  ;;  %v1979_v50 = vld [vmem:[#allocation3 + $0x38] sm:$0xff]  ;;  %v1989_v47 = vadd.f32 %v2273_v40, %v1974_v46  ;;  %v1972_v44 = vld [vmem:[#allocation3] sm:$0xff] }
 0x207   : > { %2001 = vst.msk [vmem:[%s452_s16 + $0x30] sm:$0xff] %vm846_vm4, %v1993_v45  ;;  %v1994_v35 = vadd.f32 %v2273_v40, %v1979_v50  ;;  %v1977_v51 = vld [vmem:[#allocation3 + $0x28] sm:$0xff]  ;;  %v1987_v49 = vadd.f32 %v2273_v40, %v1972_v44  ;;  %v1975_v55 = vld [vmem:[#allocation3 + $0x18] sm:$0xff] }
 0x208   : > { %1999 = vst.msk [vmem:[%s452_s16 + $0x20] sm:$0xff] %vm846_vm4, %v1991_v30  ;;  %v1992_v58 = vadd.f32 %v2273_v40, %v1977_v51  ;;  %1997 = vst.msk [vmem:[%s452_s16 + $0x10] sm:$0xff] %vm846_vm4, %v1989_v47  ;;  %v1990_v20 = vadd.f32 %v2273_v40, %v1975_v55  ;;  %v1973_v56 = vld [vmem:[#allocation3 + $0x8] sm:$0xff] }
 0x209   : > { %2002 = vst.msk [vmem:[%s452_s16 + $0x38] sm:$0xff] %vm846_vm4, %v1994_v35  ;;  %1995 = vst.msk [vmem:[%s452_s16] sm:$0xff] %vm846_vm4, %v1987_v49  ;;  %v1988_v22 = vadd.f32 %v2273_v40, %v1973_v56 }
 0x20a   : > { %2000 = vst.msk [vmem:[%s452_s16 + $0x28] sm:$0xff] %vm846_vm4, %v1992_v58  ;;  %1998 = vst.msk [vmem:[%s452_s16 + $0x18] sm:$0xff] %vm846_vm4, %v1990_v20 }
 0x20b   : > { %1996 = vst.msk [vmem:[%s452_s16 + $0x8] sm:$0xff] %vm846_vm4, %v1988_v22 }
 0x20c PF: > { %s17_s28 = sadd.s32 1, %s2611_s28   ;;  %s3335_s24 = smov %s2603_s26 }
 0x20d   : > { %p14_p11 = scmp.ge.s32.totalorder %s17_s28, 18   ;;  %s3336_s25 = smov %s2607_s27 }
 0x20e   : > { %s3337_s26 = smov %s3340_s29  ;;  %s3338_s27 = smov %s3344_s30 }
 0x20f   :  { %16 = sbr.rel (!%p14_p11) target bundleno = 3 (0x3), region = 100 }

// kernel: resnet_block_forward.9
= control target key start
LH: loop header
LB: loop body
LE: loop exit
PB: predicated region body
PF: predicated region fallthrough
CT: control target
= control target key end

     0   :  { %s3102_s13 = smov 0   ;;  %s3104_s14 = smov 0   ;;  %s3830_s0 = inlined_call_operand.vmem [shape: f32[2,1,8], index: 0, kind: input, shape index: {}]   ;;  %s3831_s1 = inlined_call_operand.vmem [shape: f32[2,1,8], index: 1, kind: input, shape index: {}]   ;;  %s3832_s2 = inlined_call_operand.vmem [shape: f32[2,8,8,8,8], index: 2, kind: input, shape index: {}, may-alias: {2,3,4}]   ;;  %s3833_s3 = inlined_call_operand.vmem [shape: f32[2,8,8,8,8], index: 3, kind: input, shape index: {}, may-alias: {2,3,4}]   ;;  %s3834_s4 = inlined_call_operand.vmem [shape: f32[2,8,8,8,8], index: 4, kind: input, shape index: {}, may-alias: {2,3,4}]   ;;  %s3835_s5 = inlined_call_operand.vmem [shape: bf16[3,3,24,8], index: 5, kind: input, shape index: {}]   ;;  %s3836_s6 = inlined_call_operand.vmem [shape: f32[1,8], index: 6, kind: input, shape index: {}]   ;;  %s3837_s7 = inlined_call_operand.vmem [shape: f32[2,8,64,4], index: 7, kind: input, shape index: {}]   ;;  %s3838_s8 = inlined_call_operand.vmem [shape: f32[4,8], index: 8, kind: input, shape index: {}]   ;;  %s3839_s9 = inlined_call_operand.vmem [shape: f32[1,8], index: 9, kind: input, shape index: {}]   ;;  %s3840_s10 = inlined_call_operand.vmem [shape: f32[2,8,64,8], index: 10, kind: output, shape index: {}]  }
   0x1   :  { %3841 = sst [smem:[#allocation4_spill]] %s3830_s0  ;;  %s3106_s15 = smov 0  }
   0x2   :  { %s3108_s16 = smov 0   ;;  %s3110_s17 = smov 0  }
   0x3 LB: > { %s29_s18 = sadd.s32 1, %s3034_s15  ;;  %s32_s19 = sadd.s32 1, %s3038_s16  ;;  %s3042_s17 = sphi %s3110_s17, %s20_s17   ;;  %s3038_s16 = sphi %s3108_s16, %s3847_s16   ;;  %s3034_s15 = sphi %s3106_s15, %s3846_s15   ;;  %s3030_s14 = sphi %s3104_s14, %s3845_s14   ;;  %s3026_s13 = sphi %s3102_s13, %s3844_s13  }
   0x4   : > { %p30_p0 = scmp.ge.s32.totalorder %s29_s18, 8  ;;  %p2509_p1 = scmp.ge.s32.totalorder %s3042_s17, 1 }
   0x5   : > { %p420_p2 = scmp.lt.s32.totalorder %s3042_s17, 17 }
   0x6   : > { %s3849_s18 = smov (%p30_p0, %s29_s18), 0  ;;  %s3851_s19 = smov (!%p30_p0, %s32_s19), %s3038_s16 }
   0x7   : > { %p421_p3 = pnand %p2509_p1, %p420_p2  ;;  %p34_p4 = scmp.ge.s32.totalorder %s3851_s19, 2 }
   0x8   : > { %p505_p5 = scmp.lt.s32.totalorder (!%p421_p3), %s3030_s14, 1  ;;  %s3138_s20 = sadd.s32 (!%p421_p3), 4294967295, %s3026_s13  ;;  %vm577_vm0 = vcmask (!%p421_p3), 195584   ;;  %vm579_vm1 = vcmask (!%p421_p3), 189440   ;;  %vm701_vm2 = vcmask (!%p421_p3), 64512   ;;  %v3044_v0 = vmov (!%p421_p3), 0.0  }
   0x9   : > { %s3853_s19 = smov (%p34_p4, %s3851_s19), 0  ;;  %424 = sbr.rel (%p421_p3) target bundleno = 528 (0x210), region = 60 }
   0xa   : > { %p512_p6 = scmp.gt.s32.totalorder (!%p421_p3), %s3138_s20, 0  ;;  %p2511_p7 = scmp.lt.s32.totalorder (!%p421_p3), %s3138_s20, 7  ;;  %585 = vst.msk [vmem:[#allocation2 + $0x30] sm:$0xff] (!%p421_p3), %vm577_vm0, %v3044_v0  ;;  %578 = vst.msk [vmem:[#allocation2] sm:$0xff] (!%p421_p3), %vm577_vm0, %v3044_v0  ;;  %vm1013_vm3 = vcmask (!%p421_p3), 1043456   ;;  %vm822_vm4 = vcmask (!%p421_p3), 130112  }
   0xb   : > { %586 = vst.msk [vmem:[#allocation2 + $0x38] sm:$0x3] (!%p421_p3), %vm579_vm1, %v3044_v0  ;;  %580 = vst.msk [vmem:[#allocation2 + $0x8] sm:$0x3] (!%p421_p3), %vm579_vm1, %v3044_v0  ;;  %s3842_s0 = sld [smem:[#allocation4_spill]] (!%p421_p3)  ;;  %p528_p8 = scmp.lt.s32.totalorder (!%p421_p3), %s3026_s13, 7 }
   0xc   : > { %581 = vst.msk [vmem:[#allocation2 + $0x10] sm:$0xff] (!%p421_p3), %vm577_vm0, %v3044_v0  ;;  %583 = vst.msk [vmem:[#allocation2 + $0x20] sm:$0xff] (!%p421_p3), %vm577_vm0, %v3044_v0  ;;  %s535_s28 = sadd.s32 (!%p421_p3), 1, %s3026_s13  ;;  %p569_p10 = scmp.gt.s32.totalorder (!%p421_p3), %s3026_s13, 0  ;;  %vm952_vm5 = vcmask (!%p421_p3), 195712   ;;  %vm2163_vm6 = vcmask (!%p421_p3), 31744  }
   0xd   : > { %582 = vst.msk [vmem:[#allocation2 + $0x18] sm:$0x3] (!%p421_p3), %vm579_vm1, %v3044_v0  ;;  %584 = vst.msk [vmem:[#allocation2 + $0x28] sm:$0x3] (!%p421_p3), %vm579_vm1, %v3044_v0  ;;  %p3186_p9 = scmp.lt.s32.totalorder (!%p421_p3), %s535_s28, 7 }
   0xe   : > { %587 = vst.msk [vmem:[#allocation2 + $0x40] sm:$0xff] (!%p421_p3), %vm577_vm0, %v3044_v0  ;;  %589 = vst.msk [vmem:[#allocation2 + $0x50] sm:$0xff] (!%p421_p3), %vm577_vm0, %v3044_v0 }
   0xf   : > { %588 = vst.msk [vmem:[#allocation2 + $0x48] sm:$0x3] (!%p421_p3), %vm579_vm1, %v3044_v0  ;;  %590 = vst.msk [vmem:[#allocation2 + $0x58] sm:$0x3] (!%p421_p3), %vm579_vm1, %v3044_v0 }
  0x10   : > { %591 = vst.msk [vmem:[#allocation2 + $0x60] sm:$0xff] %vm577_vm0, %v3044_v0  ;;  %593 = vst.msk [vmem:[#allocation2 + $0x70] sm:$0xff] %vm577_vm0, %v3044_v0  ;;  %s3855_s14 = smov (!%p505_p5, %s3030_s14), 1  ;;  %s3859_s28 = smov (!%p3186_p9, %s535_s28), 7 }
  0x11   : > { %592 = vst.msk [vmem:[#allocation2 + $0x68] sm:$0x3] %vm579_vm1, %v3044_v0  ;;  %594 = vst.msk [vmem:[#allocation2 + $0x78] sm:$0x3] %vm579_vm1, %v3044_v0  ;;  %s513_s21 = scalar_select %p512_p6, %s3138_s20, 0 }
  0x12   : > { %595 = vst.msk [vmem:[#allocation2 + $0x80] sm:$0xff] %vm577_vm0, %v3044_v0  ;;  %597 = vst.msk [vmem:[#allocation2 + $0x90] sm:$0xff] %vm577_vm0, %v3044_v0  ;;  %s507_s24 = scalar_lea.vmem %s3842_s0, %s3855_s14  ;;  %s3181_s25 = sshll.u32 %s3855_s14, 6 }
  0x13   : > { %596 = vst.msk [vmem:[#allocation2 + $0x88] sm:$0x3] %vm579_vm1, %v3044_v0  ;;  %598 = vst.msk [vmem:[#allocation2 + $0x98] sm:$0x3] %vm579_vm1, %v3044_v0  ;;  %s3857_s21 = smov (!%p2511_p7, %s513_s21), 7  ;;  %s510_s20 = scalar_lea.vmem %s3831_s1, %s3855_s14 }
  0x14   : > { %961 = vst.msk [vmem:[#allocation3] sm:$0xff] %vm701_vm2, %v3044_v0  ;;  %962 = vst.msk [vmem:[#allocation3 + $0x8] sm:$0xff] %vm701_vm2, %v3044_v0  ;;  %s2516_s26 = sshll.u32 %s3857_s21, 3  ;;  %v3201_v1 = vld [vmem:[%s507_s24] ss:$0 sm:$0xff]  ;;  %s3861_s28 = smov (!%p3186_p9, %s3859_s28), 7 }
  0x15   : > { %963 = vst.msk [vmem:[#allocation3 + $0x10] sm:$0xff] %vm701_vm2, %v3044_v0  ;;  %964 = vst.msk [vmem:[#allocation3 + $0x18] sm:$0xff] %vm701_vm2, %v3044_v0  ;;  %s520_s27 = sadd.s32 %s3181_s25, %s2516_s26  ;;  %v3209_v6 = vld [vmem:[%s510_s20] ss:$0 sm:$0xff]  ;;  %s2525_s30 = sshll.u32 %s3861_s28, 3 }
  0x16   : > { %965 = vst.msk [vmem:[#allocation3 + $0x20] sm:$0xff] %vm701_vm2, %v3044_v0  ;;  %966 = vst.msk [vmem:[#allocation3 + $0x28] sm:$0xff] %vm701_vm2, %v3044_v0  ;;  %s2518_s29 = sshll.u32 %s520_s27, 3  ;;  %s544_s12 = sadd.s32 %s2525_s30, %s3181_s25 }
  0x17   : > { %967 = vst.msk [vmem:[#allocation3 + $0x30] sm:$0xff] %vm701_vm2, %v3044_v0  ;;  %968 = vst.msk [vmem:[#allocation3 + $0x38] sm:$0xff] %vm701_vm2, %v3044_v0  ;;  %s3196_s0 = scalar_lea.vmem %s3832_s2, %s2518_s29  ;;  %s2527_s28 = sshll.u32 %s544_s12, 3 }
  0x18   : > { %s529_s21 = scalar_select %p528_p8, %s3026_s13, 7  ;;  %v601_v2 = vld [vmem:[%s3196_s0 + $0x10] sm:$0xff]  ;;  %v599_v3 = vld [vmem:[%s3196_s0] sm:$0xff] }
  0x19   : > { %v615_v4 = vmul.f32 %v3201_v1, %v601_v2  ;;  %v613_v5 = vmul.f32 %v3201_v1, %v599_v3  ;;  %s3269_s22 = scalar_lea.vmem %s3834_s4, %s2527_s28 }
  0x1a   : > { %s2519_s14 = sshll.u32 %s529_s21, 3  ;;  %v831_v38 = vld [vmem:[%s3269_s22] sm:$0xff]  ;;  %v833_v39 = vld [vmem:[%s3269_s22 + $0x10] sm:$0xff]  ;;  %v832_v40 = vld [vmem:[%s3269_s22 + $0x8] sm:$0xff] }
  0x1b   : > { %s532_s26 = sadd.s32 %s2519_s14, %s3181_s25  ;;  %v3213_v7 = vadd.f32 %v3209_v6, %v615_v4  ;;  %v3218_v8 = vadd.f32 %v3209_v6, %v613_v5  ;;  %v839_v41 = vmul.f32 %v3201_v1, %v831_v38  ;;  %v841_v43 = vmul.f32 %v3201_v1, %v833_v39  ;;  %v835_v44 = vld [vmem:[%s3269_s22 + $0x20] sm:$0xff]  ;;  %v834_v45 = vld [vmem:[%s3269_s22 + $0x18] sm:$0xff]  ;;  %v837_v46 = vld [vmem:[%s3269_s22 + $0x30] sm:$0xff]  ;;  %s3046_s25 = smov 16  }
  0x1c   : > { %s3215_s27 = sshll.u32 %s532_s26, 3  ;;  %v840_v47 = vmul.f32 %v3201_v1, %v832_v40  ;;  %v843_v48 = vmul.f32 %v3201_v1, %v835_v44  ;;  %v842_v49 = vmul.f32 %v3201_v1, %v834_v45  ;;  %v845_v52 = vmul.f32 %v3201_v1, %v837_v46  ;;  %v836_v5 = vld [vmem:[%s3269_s22 + $0x28] sm:$0xff]  ;;  %v605_v40 = vld [vmem:[%s3196_s0 + $0x30] sm:$0xff]  ;;  %v602_v44 = vld [vmem:[%s3196_s0 + $0x18] sm:$0xff] }
  0x1d   : > { %s3224_s11 = scalar_lea.vmem %s3833_s3, %s3215_s27  ;;  %v2538_v18 = vmul.f32 -1.442695, %v3213_v7  ;;  %v2536_v23 = vmul.f32 -1.442695, %v3218_v8  ;;  %v3290_v50 = vadd.f32 %v3209_v6, %v839_v41  ;;  %v3293_v51 = vadd.f32 %v3209_v6, %v841_v43 }
  0x1e   : > { %v712_v9 = vld [vmem:[%s3224_s11 + $0x10] sm:$0xff]  ;;  %v710_v10 = vld [vmem:[%s3224_s11] sm:$0xff]  ;;  %v711_v15 = vld [vmem:[%s3224_s11 + $0x8] sm:$0xff]  ;;  %v3297_v53 = vadd.f32 %v3209_v6, %v840_v47  ;;  %v3300_v54 = vadd.f32 %v3209_v6, %v843_v48  ;;  %v3303_v55 = vadd.f32 %v3209_v6, %v842_v49  ;;  %v3308_v58 = vadd.f32 %v3209_v6, %v845_v52  ;;  %s3350_s23 = scalar_select %p528_p8, 1, 0 }
  0x1f   : > { %v714_v11 = vld [vmem:[%s3224_s11 + $0x20] sm:$0xff]  ;;  %v720_v12 = vmul.f32 %v3201_v1, %v712_v9  ;;  %v718_v13 = vmul.f32 %v3201_v1, %v710_v10  ;;  %v716_v16 = vld [vmem:[%s3224_s11 + $0x30] sm:$0xff]  ;;  %v713_v17 = vld [vmem:[%s3224_s11 + $0x18] sm:$0xff]  ;;  %v719_v19 = vmul.f32 %v3201_v1, %v711_v15  ;;  %2908 = vpow2.f32 %v2538_v18  ;;  %s3389_s14 = scalar_select %p569_p10, 1, 0 }
  0x20   : > { %v722_v14 = vmul.f32 %v3201_v1, %v714_v11  ;;  %v724_v20 = vmul.f32 %v3201_v1, %v716_v16  ;;  %v721_v21 = vmul.f32 %v3201_v1, %v713_v17  ;;  %v715_v22 = vld [vmem:[%s3224_s11 + $0x28] sm:$0xff]  ;;  %2910 = vpow2.f32 %v2536_v23  ;;  %v717_v11 = vld [vmem:[%s3224_s11 + $0x38] sm:$0xff]  ;;  %v603_v15 = vld [vmem:[%s3196_s0 + $0x20] sm:$0xff]  ;;  %s574_s21 = scvt.s32.f32 %s3350_s23 }
  0x21   : > { %v3244_v24 = vadd.f32 %v3209_v6, %v720_v12  ;;  %v3247_v25 = vadd.f32 %v3209_v6, %v718_v13  ;;  %v723_v27 = vmul.f32 %v3201_v1, %v715_v22  ;;  %v3255_v28 = vadd.f32 %v3209_v6, %v719_v19  ;;  %v600_v19 = vld [vmem:[%s3196_s0 + $0x8] sm:$0xff]  ;;  %s571_s13 = scvt.s32.f32 %s3389_s14 }
  0x22   : > { %v3250_v26 = vadd.f32 %v3209_v6, %v722_v14  ;;  %v3258_v29 = vadd.f32 %v3209_v6, %v724_v20  ;;  %v3261_v30 = vadd.f32 %v3209_v6, %v721_v21  ;;  %v2552_v56 = vmul.f32 -1.442695, %v3290_v50  ;;  %v838_v14 = vld [vmem:[%s3269_s22 + $0x38] sm:$0xff]  ;;  %v604_v49 = vld [vmem:[%s3196_s0 + $0x28] sm:$0xff] }
  0x23   : > { %v2546_v31 = vmul.f32 -1.442695, %v3244_v24  ;;  %v2544_v32 = vmul.f32 -1.442695, %v3247_v25  ;;  %v2545_v34 = vmul.f32 -1.442695, %v3255_v28  ;;  %v3274_v36 = vadd.f32 %v3209_v6, %v723_v27 }
  0x24   : > { %v2548_v33 = vmul.f32 -1.442695, %v3250_v26  ;;  %v2550_v35 = vmul.f32 -1.442695, %v3258_v29  ;;  %v2547_v37 = vmul.f32 -1.442695, %v3261_v30  ;;  %v844_v18 = vmul.f32 %v3201_v1, %v836_v5 }
  0x25   : > { %2912 = vpow2.f32 %v2546_v31  ;;  %v2549_v42 = vmul.f32 -1.442695, %v3274_v36  ;;  %v2554_v57 = vmul.f32 -1.442695, %v3293_v51  ;;  %v2553_v59 = vmul.f32 -1.442695, %v3297_v53 }
  0x26   : > { %2914 = vpow2.f32 %v2544_v32  ;;  %v2556_v60 = vmul.f32 -1.442695, %v3300_v54  ;;  %v2555_v61 = vmul.f32 -1.442695, %v3303_v55  ;;  %v2558_v63 = vmul.f32 -1.442695, %v3308_v58 }
  0x27   : > { %2916 = vpow2.f32 %v2548_v33  ;;  %v725_v22 = vmul.f32 %v3201_v1, %v717_v11  ;;  %v846_v31 = vmul.f32 %v3201_v1, %v838_v14  ;;  %v617_v32 = vmul.f32 %v3201_v1, %v603_v15 }
  0x28   : > { %2918 = vpow2.f32 %v2545_v34  ;;  %v3329_v39 = vadd.f32 %v3209_v6, %v844_v18 }
  0x29   : > { %2920 = vpow2.f32 %v2550_v35  ;;  %v3313_v62 = vpop.eup %2908  ;;  %v614_v35 = vmul.f32 %v3201_v1, %v600_v19  ;;  %v3333_v43 = vadd.f32 %v3209_v6, %v725_v22  ;;  %v3337_v47 = vadd.f32 %v3209_v6, %v846_v31 }
  0x2a   : > { %2922 = vpow2.f32 %v2547_v37  ;;  %v3316_v0 = vpop.eup %2910  ;;  %v3340_v48 = vadd.f32 %v3209_v6, %v617_v32 }
  0x2b   : > { %2924 = vpow2.f32 %v2549_v42 }
  0x2c   : > { %2926 = vpow2.f32 %v2552_v56 }
  0x2d   : > { %2928 = vpow2.f32 %v2554_v57  ;;  %v3344_v57 = vadd.f32 %v3209_v6, %v614_v35  ;;  %v2891_v35 = vld [vmem:[%s3835_s5 + $0xc] sm:$0xff]  }
  0x2e   : > { %2930 = vpow2.f32 %v2553_v59  ;;  %v619_v59 = vmul.f32 %v3201_v1, %v605_v40  ;;  %2728 = vmatprep.subr.bf16.mxu1 %v2891_v35 }
  0x2f   : > { %v2913_v2 = vpop.eup %2912  ;;  %2932 = vpow2.f32 %v2556_v60  ;;  %v606_v60 = vld [vmem:[%s3196_s0 + $0x38] sm:$0xff]  ;;  %s3045_s0 = smov 8   ;;  %2729 = vmatpush3.bf16.msra.mxu1 %v2891_v35 }
  0x30   : > { %v2915_v3 = vpop.eup %2914  ;;  %v760_v4 = vadd.f32 1.0, %v2913_v2  ;;  %2934 = vpow2.f32 %v2555_v61  ;;  %v2557_v2 = vmul.f32 -1.442695, %v3329_v39  ;;  %v620_v14 = vmul.f32 %v3201_v1, %v606_v60 }
  0x31   : > { %v2917_v9 = vpop.eup %2916  ;;  %v758_v10 = vadd.f32 1.0, %v2915_v3  ;;  %2936 = vpow2.f32 %v2558_v63  ;;  %v616_v3 = vmul.f32 %v3201_v1, %v602_v44  ;;  %v3362_v18 = vadd.f32 %v3209_v6, %v619_v59  ;;  %v2893_v59 = vld [vmem:[%s3835_s5 + $0x14] ss:$0 sps:$4 sm:$0xff]  }
  0x32   : > { %v2919_v12 = vpop.eup %2918  ;;  %2938 = vrcp.f32 %v760_v4  ;;  %v762_v13 = vadd.f32 1.0, %v2917_v9  ;;  %v2551_v9 = vmul.f32 -1.442695, %v3333_v43  ;;  %2839 = vmatprep.subr.msk.bf16.mxu1 %vm1013_vm3, %v2893_v59 }
  0x33   : > { %v2921_v16 = vpop.eup %2920  ;;  %2940 = vrcp.f32 %v758_v10  ;;  %v759_v17 = vadd.f32 1.0, %v2919_v12  ;;  %v618_v10 = vmul.f32 %v3201_v1, %v604_v49  ;;  %v659_v1 = vadd.f32 1.0, %v3316_v0 }
  0x34   : > { %v2923_v20 = vpop.eup %2922  ;;  %2942 = vrcp.f32 %v762_v13  ;;  %v764_v21 = vadd.f32 1.0, %v2921_v16  ;;  %v2559_v13 = vmul.f32 -1.442695, %v3337_v47  ;;  %v3380_v0 = vadd.f32 %v3209_v6, %v620_v14 }
  0x35   : > { %v2925_v23 = vpop.eup %2924  ;;  %2944 = vrcp.f32 %v759_v17  ;;  %v761_v27 = vadd.f32 1.0, %v2923_v20  ;;  %v661_v17 = vadd.f32 1.0, %v3313_v62  ;;  %v3370_v20 = vadd.f32 %v3209_v6, %v616_v3 }
  0x36   : > { %v2927_v33 = vpop.eup %2926  ;;  %2946 = vrcp.f32 %v764_v21  ;;  %v763_v34 = vadd.f32 1.0, %v2925_v23  ;;  %v2540_v21 = vmul.f32 -1.442695, %v3340_v48  ;;  %v3376_v22 = vadd.f32 %v3209_v6, %v618_v10  ;;  %v2890_v6 = vld [vmem:[%s3835_s5] sm:$0xff]  }
  0x37   : > { %v2929_v37 = vpop.eup %2928  ;;  %2948 = vrcp.f32 %v761_v27  ;;  %v879_v38 = vadd.f32 1.0, %v2927_v33  ;;  %v2537_v23 = vmul.f32 -1.442695, %v3344_v57  ;;  %v2542_v31 = vmul.f32 -1.442695, %v3362_v18  ;;  %2716 = vmatprep.subr.bf16.mxu0 %v2890_v6 }
  0x38   : > { %v2931_v41 = vpop.eup %2930  ;;  %2950 = vrcp.f32 %v763_v34  ;;  %v881_v42 = vadd.f32 1.0, %v2929_v37  ;;  %v3385_v33 = vstv %s574_s21  ;;  %v2539_v34 = vmul.f32 -1.442695, %v3370_v20  ;;  %2717 = vmatpush3.bf16.msra.mxu0 %v2890_v6  ;;  %v3451_v6 = vld [vmem:[%s3835_s5 + $0x24] sm:$0xff]   ;;  %s558_s21 = scalar_lea.vmem %s3837_s7, %s3215_s27 }
  0x39   : > { %v2933_v45 = vpop.eup %2932  ;;  %2952 = vrcp.f32 %v879_v38  ;;  %v880_v46 = vadd.f32 1.0, %v2931_v41  ;;  %v2541_v40 = vmul.f32 -1.442695, %v3376_v22 }
  0x3a   : > { %v2935_v52 = vpop.eup %2934  ;;  %2954 = vrcp.f32 %v881_v42  ;;  %v883_v56 = vadd.f32 1.0, %v2933_v45  ;;  %v2543_v42 = vmul.f32 -1.442695, %v3380_v0 }
  0x3b   : > { %v2937_v61 = vpop.eup %2936  ;;  %2956 = vrcp.f32 %v880_v46  ;;  %v882_v63 = vadd.f32 1.0, %v2935_v52  ;;  %v2892_v46 = vld [vmem:[%s3835_s5 + $0x8] ss:$0 sps:$4 sm:$0xff]  }
  0x3c   : > { %v2939_v4 = vpop.eup %2938  ;;  %2958 = vrcp.f32 %v883_v56  ;;  %v885_v5 = vadd.f32 1.0, %v2937_v61  ;;  %2838 = vmatprep.subr.msk.bf16.mxu0 %vm1013_vm3, %v2892_v46  ;;  %v1015_v60 = vsel %vm1013_vm3, %v2892_v46, 0 }
  0x3d   : > { %v2941_v11 = vpop.eup %2940  ;;  %v784_v12 = vmul.f32 %v2939_v4, %v3244_v24  ;;  %2960 = vrcp.f32 %v882_v63  ;;  %2719 = vmatpush3.bf16.msra.mxu0 %v1015_v60 }
  0x3e   : > { %v2943_v15 = vpop.eup %2942  ;;  %v782_v16 = vmul.f32 %v2941_v11, %v3247_v25  ;;  %2962 = vrcp.f32 %v885_v5  ;;  %v3423_v5 = vstv %s571_s13  ;;  %s3787_s13 = scalar_lea.vmem %s3840_s10, %s3215_s27 }
  0x3f   : > { %v2945_v19 = vpop.eup %2944  ;;  %802 = vrot.lane.b32.xlu1 %v784_v12, %s3045_s0  ;;  %v786_v24 = vmul.f32 %v2943_v15, %v3250_v26  ;;  %2964 = vpow2.f32 %v2557_v2 }
  0x40   : > { %v2947_v25 = vpop.eup %2946  ;;  %798 = vrot.lane.b32.xlu0 %v782_v16, %s3045_s0  ;;  %v783_v62 = vmul.f32 %v2945_v19, %v3255_v28  ;;  %2966 = vpow2.f32 %v2551_v9 }
  0x41   : > { %v2949_v26 = vpop.eup %2948  ;;  %2968 = vpow2.f32 %v2559_v13  ;;  %v788_v28 = vmul.f32 %v2947_v25, %v3258_v29 }
  0x42   : > { %v2951_v27 = vpop.eup %2950  ;;  %2970 = vrcp.f32 %v661_v17  ;;  %v785_v29 = vmul.f32 %v2949_v26, %v3261_v30 }
  0x43   : > { %v2953_v32 = vpop.eup %2952  ;;  %806 = vrot.lane.b32.xlu1 %v786_v24, %s3045_s0  ;;  %2972 = vrcp.f32 %v659_v1  ;;  %v787_v52 = vmul.f32 %v2951_v27, %v3274_v36  ;;  %v1144_v36 = vsel %vm1013_vm3, %v2893_v59, 0 }
  0x44   : > { %v2955_v37 = vpop.eup %2954  ;;  %800 = vrot.lane.b32.xlu0 %v783_v62, %s3045_s0  ;;  %v903_v38 = vmul.f32 %v2953_v32, %v3290_v50  ;;  %2974 = vpow2.f32 %v2540_v21  ;;  %2731 = vmatpush3.bf16.msra.mxu1 %v1144_v36  ;;  %v3444_v32 = vld [vmem:[%s3835_s5 + $0x18] sm:$0xff]  }
  0x45   : > { %v2957_v41 = vpop.eup %2956  ;;  %2976 = vpow2.f32 %v2537_v23  ;;  %v905_v50 = vmul.f32 %v2955_v37, %v3293_v51  ;;  %2740 = vmatprep.subr.bf16.mxu0 %v3444_v32  ;;  %2752 = vmatprep.subr.bf16.mxu1 %v3451_v6 }
  0x46   : > { %v2959_v44 = vpop.eup %2958  ;;  %2978 = vpow2.f32 %v2542_v31  ;;  %v912_v30 = vmul.f32 %v3385_v33, %v903_v38  ;;  %v904_v56 = vmul.f32 %v2957_v41, %v3297_v53 }
  0x47   : > { %v2961_v45 = vpop.eup %2960  ;;  %810 = vrot.lane.b32.xlu1 %v788_v28, %s3045_s0  ;;  %2980 = vpow2.f32 %v2539_v34  ;;  %v914_v53 = vmul.f32 %v3385_v33, %v905_v50  ;;  %v907_v3 = vmul.f32 %v2959_v44, %v3300_v54 }
  0x48   : > { %v2963_v49 = vpop.eup %2962  ;;  %804 = vrot.lane.b32.xlu0 %v785_v29, %s3045_s0  ;;  %2982 = vpow2.f32 %v2541_v40  ;;  %v913_v10 = vmul.f32 %v3385_v33, %v904_v56  ;;  %v906_v11 = vmul.f32 %v2961_v45, %v3303_v55 }
  0x49   : > { %v2965_v51 = vpop.eup %2964  ;;  %2984 = vpow2.f32 %v2543_v42  ;;  %v916_v17 = vmul.f32 %v3385_v33, %v907_v3  ;;  %v909_v19 = vmul.f32 %v2963_v49, %v3308_v58 }
  0x4a   : > { %v2967_v61 = vpop.eup %2966  ;;  %v884_v63 = vadd.f32 1.0, %v2965_v51  ;;  %v915_v25 = vmul.f32 %v3385_v33, %v906_v11 }
  0x4b   : > { %v2969_v2 = vpop.eup %2968  ;;  %928 = vrot.lane.b32.xlu1 %v912_v30, %s3046_s25  ;;  %v765_v4 = vadd.f32 1.0, %v2967_v61  ;;  %v918_v27 = vmul.f32 %v3385_v33, %v909_v19 }
  0x4c   : > { %v2971_v9 = vpop.eup %2970  ;;  %808 = vrot.lane.b32.xlu0 %v787_v52, %s3045_s0  ;;  %2986 = vrcp.f32 %v884_v63  ;;  %v886_v12 = vadd.f32 1.0, %v2969_v2 }
  0x4d   : > { %v2973_v13 = vpop.eup %2972  ;;  %2988 = vrcp.f32 %v765_v4  ;;  %v685_v14 = vmul.f32 %v2971_v9, %v3213_v7  ;;  %v1098_v9 = vld [vmem:[#allocation2 + $0x1] sm:$0xff] }
  0x4e   : > { %v2975_v15 = vpop.eup %2974  ;;  %2990 = vrcp.f32 %v886_v12  ;;  %v683_v54 = vmul.f32 %v2973_v13, %v3218_v8 }
  0x4f   : > { %v2977_v16 = vpop.eup %2976  ;;  %932 = vrot.lane.b32.xlu1 %v914_v53, %s3046_s25  ;;  %v694_v24 = vmul.f32 %v3423_v5, %v685_v14  ;;  %v663_v55 = vadd.f32 1.0, %v2975_v15 }
  0x50   : > { %v2979_v1 = vpop.eup %2978  ;;  %930 = vrot.lane.b32.xlu0 %v913_v10, %s3046_s25  ;;  %v692_v7 = vmul.f32 %v3423_v5, %v683_v54  ;;  %v660_v62 = vadd.f32 1.0, %v2977_v16 }
  0x51   : > { %v2981_v21 = vpop.eup %2980  ;;  %704 = vst.msk [vmem:[#allocation2 + $0x31] sm:$0xff] %vm701_vm2, %v694_v24  ;;  %2992 = vrcp.f32 %v663_v55  ;;  %v665_v8 = vadd.f32 1.0, %v2979_v1 }
  0x52   : > { %v2983_v26 = vpop.eup %2982  ;;  %702 = vst.msk [vmem:[#allocation2 + $0x11] sm:$0xff] %vm701_vm2, %v692_v7  ;;  %2994 = vrcp.f32 %v660_v62  ;;  %v662_v58 = vadd.f32 1.0, %v2981_v21  ;;  %v2897_v7 = vld [vmem:[%s3835_s5 + $0x2c] ss:$0 sps:$4 sm:$0xff]  }
  0x53   : > { %v2985_v23 = vpop.eup %2984  ;;  %936 = vrot.lane.b32.xlu1 %v916_v17, %s3046_s25  ;;  %2996 = vrcp.f32 %v665_v8  ;;  %v664_v31 = vadd.f32 1.0, %v2983_v26 }
  0x54   : > { %934 = vrot.lane.b32.xlu0 %v915_v25, %s3046_s25  ;;  %2998 = vrcp.f32 %v662_v58  ;;  %v666_v28 = vadd.f32 1.0, %v2985_v23  ;;  %v2896_v25 = vld [vmem:[%s3835_s5 + $0x20] ss:$0 sps:$4 sm:$0xff]  }
  0x55   : > { %3000 = vrcp.f32 %v664_v31  ;;  %v1273_v31 = vsel %vm1013_vm3, %v2896_v25, 0 }
  0x56   : > { %v2987_v34 = vpop.eup %2986  ;;  %3002 = vrcp.f32 %v666_v28  ;;  %v1402_v28 = vsel %vm1013_vm3, %v2897_v7, 0 }
  0x57   : > { %v2989_v35 = vpop.eup %2988  ;;  %940 = vrot.lane.b32.xlu1 %v918_v27, %s3046_s25  ;;  %v908_v37 = vmul.f32 %v2987_v34, %v3329_v39  ;;  %v2899_v34 = vld [vmem:[%s3835_s5 + $0x3c] sm:$0xff]  }
  0x58   : > { %v2991_v29 = vpop.eup %2990  ;;  %v789_v42 = vmul.f32 %v2989_v35, %v3333_v43 }
  0x59   : > { %v917_v38 = vmul.f32 %v3385_v33, %v908_v37  ;;  %v910_v40 = vmul.f32 %v2991_v29, %v3337_v47 }
  0x5b   : > { %v2993_v41 = vpop.eup %2992  ;;  %938 = vrot.lane.b32.xlu0 %v917_v38, %s3046_s25  ;;  %v919_v44 = vmul.f32 %v3385_v33, %v910_v40  ;;  %v1227_v38 = vld [vmem:[#allocation2 + $0x2] sm:$0xff] }
  0x5c   : > { %v2995_v45 = vpop.eup %2994  ;;  %v687_v30 = vmul.f32 %v2993_v41, %v3340_v48 }
  0x5d   : > { %v2997_v50 = vpop.eup %2996  ;;  %942 = vrot.lane.b32.xlu1 %v919_v44, %s3046_s25  ;;  %v684_v39 = vmul.f32 %v2995_v45, %v3344_v57 }
  0x5e   : > { %v2999_v46 = vpop.eup %2998  ;;  %v696_v49 = vmul.f32 %v3423_v5, %v687_v30  ;;  %v689_v47 = vmul.f32 %v2997_v50, %v3362_v18 }
  0x5f   : > { %v3001_v52 = vpop.eup %3000  ;;  %812 = vrot.lane.b32.xlu0 %v789_v42, %s3045_s0  ;;  %v693_v43 = vmul.f32 %v3423_v5, %v684_v39  ;;  %v686_v33 = vmul.f32 %v2999_v46, %v3370_v20 }
  0x60   : > { %v3003_v56 = vpop.eup %3002  ;;  %706 = vst.msk [vmem:[#allocation2 + $0x51] sm:$0xff] %vm701_vm2, %v696_v49  ;;  %v698_v48 = vmul.f32 %v3423_v5, %v689_v47  ;;  %v688_v59 = vmul.f32 %v3001_v52, %v3376_v22 }
  0x61   : > { %703 = vst.msk [vmem:[#allocation2 + $0x21] sm:$0xff] %vm701_vm2, %v693_v43  ;;  %v695_v57 = vmul.f32 %v3423_v5, %v686_v33  ;;  %v690_v18 = vmul.f32 %v3003_v56, %v3380_v0 }
  0x62   : > { %708 = vst.msk [vmem:[#allocation2 + $0x71] sm:$0xff] %vm701_vm2, %v698_v48  ;;  %v697_v51 = vmul.f32 %v3423_v5, %v688_v59  ;;  %v2900_v48 = vld [vmem:[%s3835_s5 + $0x38] ss:$0 sps:$4 sm:$0xff]   ;;  %v2901_v59 = vld [vmem:[%s3835_s5 + $0x44] ss:$0 sps:$4 sm:$0xff]  }
  0x63   : > { %705 = vst.msk [vmem:[#allocation2 + $0x41] sm:$0xff] %vm701_vm2, %v695_v57  ;;  %v699_v20 = vmul.f32 %v3423_v5, %v690_v18  ;;  %v969_v5 = vld [vmem:[#allocation2] sm:$0xff]  ;;  %v2902_v57 = vld [vmem:[%s3835_s5 + $0x48] sm:$0xff]   ;;  %v2903_v18 = vld [vmem:[%s3835_s5 + $0x54] sm:$0xff]  }
  0x64   : > { %707 = vst.msk [vmem:[#allocation2 + $0x61] sm:$0xff] %vm701_vm2, %v697_v51 }
  0x65   : > { %709 = vst.msk [vmem:[#allocation2 + $0x81] sm:$0xff] %vm701_vm2, %v699_v20 }
  0xb1   : > { %v803_v22 = vpop.permute.xlu1 %802 }
  0xb2   : > { %825 = vst.msk [vmem:[#allocation2 + $0x31] sm:$0xff] %vm822_vm4, %v803_v22  ;;  %v799_v60 = vpop.permute.xlu0 %798 }
  0xb3   : > { %823 = vst.msk [vmem:[#allocation2 + $0x11] sm:$0xff] %vm822_vm4, %v799_v60  ;;  %v1531_v60 = vsel %vm1013_vm3, %v2900_v48, 0 }
  0xb5   : > { %v807_v0 = vpop.permute.xlu1 %806 }
  0xb6   : > { %827 = vst.msk [vmem:[#allocation2 + $0x51] sm:$0xff] %vm822_vm4, %v807_v0  ;;  %v801_v61 = vpop.permute.xlu0 %800  ;;  %v1660_v0 = vsel %vm1013_vm3, %v2901_v59, 0 }
  0xb7   : > { %824 = vst.msk [vmem:[#allocation2 + $0x21] sm:$0xff] %vm822_vm4, %v801_v61 }
  0xb9   : > { %v811_v63 = vpop.permute.xlu1 %810 }
  0xba   : > { %829 = vst.msk [vmem:[#allocation2 + $0x71] sm:$0xff] %vm822_vm4, %v811_v63  ;;  %v805_v36 = vpop.permute.xlu0 %804 }
  0xbb   : > { %826 = vst.msk [vmem:[#allocation2 + $0x41] sm:$0xff] %vm822_vm4, %v805_v36 }
  0xbd   : > { %v929_v2 = vpop.permute.xlu1 %928 }
  0xbe   : > { %953 = vst.msk [vmem:[#allocation2 + $0x11] sm:$0xff] %vm952_vm5, %v929_v2  ;;  %v809_v53 = vpop.permute.xlu0 %808 }
  0xbf   : > { %828 = vst.msk [vmem:[#allocation2 + $0x61] sm:$0xff] %vm822_vm4, %v809_v53 }
  0xc1   : > { %v933_v3 = vpop.permute.xlu1 %932 }
  0xc2   : > { %955 = vst.msk [vmem:[#allocation2 + $0x31] sm:$0xff] %vm952_vm5, %v933_v3  ;;  %v931_v4 = vpop.permute.xlu0 %930 }
  0xc3   : > { %954 = vst.msk [vmem:[#allocation2 + $0x21] sm:$0xff] %vm952_vm5, %v931_v4 }
  0xc5   : > { %v937_v10 = vpop.permute.xlu1 %936  ;;  %v970_v11 = vld [vmem:[#allocation2 + $0x10] sm:$0xff] }
  0xc6   : > { %v3491_v12 = vld [vmem:[#allocation2 + $0x11] sm:$0xff]  ;;  %957 = vst.msk [vmem:[#allocation2 + $0x51] sm:$0xff] %vm952_vm5, %v937_v10  ;;  %v935_v13 = vpop.permute.xlu0 %934  ;;  %v977_v14 = vpack.c.bf16 %v970_v11, %v969_v5  ;;  %v2905_v10 = vld [vmem:[%s3835_s5 + $0x5c] ss:$0 sps:$4 sm:$0xff]  }
  0xc7   : > { %v1106_v15 = vpack.c.bf16 %v3491_v12, %v1098_v9  ;;  %956 = vst.msk [vmem:[#allocation2 + $0x41] sm:$0xff] %vm952_vm5, %v935_v13  ;;  %v1228_v40 = vld [vmem:[#allocation2 + $0x12] sm:$0xff]  ;;  %v2904_v9 = vld [vmem:[%s3835_s5 + $0x50] ss:$0 sps:$4 sm:$0xff]  }
  0xc8   : > { %2720 = vmatprep.mubr.msk.bf16.mxu0 %vm577_vm0, %v977_v14  ;;  %v1235_v30 = vpack.c.bf16 %v1228_v40, %v1227_v38  ;;  %v1790_v13 = vsel %vm1013_vm3, %v2904_v9, 0  ;;  %v1919_v14 = vsel %vm1013_vm3, %v2905_v10, 0 }
  0xc9   : > { %2732 = vmatprep.mubr.msk.bf16.mxu1 %vm577_vm0, %v1106_v15  ;;  %v941_v54 = vpop.permute.xlu1 %940  ;;  %v3498_v16 = vld [vmem:[#allocation2 + $0x30] sm:$0xff]  ;;  %v2906_v15 = vld [vmem:[%s3835_s5 + $0x60] sm:$0xff]  }
  0xca   : > { %v3500_v17 = vld [vmem:[#allocation2 + $0x31] sm:$0xff]  ;;  %959 = vst.msk [vmem:[#allocation2 + $0x71] sm:$0xff] %vm952_vm5, %v941_v54  ;;  %v971_v19 = vld [vmem:[#allocation2 + $0x20] sm:$0xff] }
  0xcb   : > { %v3503_v24 = vld [vmem:[#allocation2 + $0x21] sm:$0xff]  ;;  %v3506_v55 = vpack.c.bf16 %v3498_v16, %v971_v19  ;;  %v1364_v50 = vpack.c.bf16 %v971_v19, %v970_v11  ;;  %v1230_v46 = vld [vmem:[#allocation2 + $0x32] sm:$0xff] }
  0xcc   : > { %v3510_v1 = vpack.c.bf16 %v3500_v17, %v3503_v24  ;;  %v1229_v39 = vld [vmem:[#allocation2 + $0x22] sm:$0xff]  ;;  %v1493_v36 = vpack.c.bf16 %v3503_v24, %v3491_v12  ;;  %v1751_v24 = vld [vmem:[#allocation2 + $0x90] sm:$0xff] }
  0xcd   : > { %v939_v62 = vpop.permute.xlu0 %938  ;;  %2721 = vmatmul.mubr.msk.bf16.vlgmr.msra.gmra.mrb[0].mxu0 %vm577_vm0, %v3506_v55  ;;  %v974_v21 = vld [vmem:[#allocation2 + $0x50] sm:$0xff]  ;;  %v3564_v52 = vpack.c.bf16 %v1230_v46, %v1229_v39  ;;  %v1622_v2 = vpack.c.bf16 %v1229_v39, %v1228_v40  ;;  %v2162_v54 = vld [vmem:[%s3838_s8] sm:$0xf]  ;;  %v2907_v19 = vld [vmem:[%s3835_s5 + $0x68] ss:$0 sps:$4 sm:$0xff]  }
  0xce   : > { %2733 = vmatmul.mubr.msk.bf16.vlgmr.msra.gmra.mrb[0].mxu1 %vm577_vm0, %v3510_v1  ;;  %v3522_v8 = vld [vmem:[#allocation2 + $0x51] sm:$0xff]  ;;  %958 = vst.msk [vmem:[#allocation2 + $0x61] sm:$0xff] %vm952_vm5, %v939_v62  ;;  %v973_v26 = vld [vmem:[#allocation2 + $0x40] sm:$0xff]  ;;  %2741 = vmatpush3.bf16.msra.mxu0 %v3444_v32 }
  0xcf   : > { %v3525_v58 = vld [vmem:[#allocation2 + $0x41] sm:$0xff]  ;;  %2753 = vmatpush3.bf16.msra.mxu1 %v3451_v6  ;;  %v3529_v23 = vpack.c.bf16 %v974_v21, %v973_v26  ;;  %2840 = vmatprep.subr.msk.bf16.mxu0 %vm1013_vm3, %v2896_v25  ;;  %v2898_v32 = vld [vmem:[%s3835_s5 + $0x30] sm:$0xff]   ;;  %v943_v6 = vpop.permute.xlu1 %942  ;;  %v1365_v43 = vpack.c.bf16 %v973_v26, %v3498_v16  ;;  %v2157_v26 = vld [vmem:[%s558_s21 + $0x18] sm:$0xff] }
  0xd0   : > { %v3533_v27 = vpack.c.bf16 %v3522_v8, %v3525_v58  ;;  %2841 = vmatprep.subr.msk.bf16.mxu1 %vm1013_vm3, %v2897_v7  ;;  %v1231_v49 = vld [vmem:[#allocation2 + $0x42] sm:$0xff]  ;;  %v1232_v47 = vld [vmem:[#allocation2 + $0x52] sm:$0xff]  ;;  %v1494_v53 = vpack.c.bf16 %v3525_v58, %v3500_v17 }
  0xd1   : > { %v813_v35 = vpop.permute.xlu0 %812  ;;  %2724 = vmatprep.mubr.msk.bf16.mxu0 %vm577_vm0, %v3529_v23  ;;  %v976_v37 = vld [vmem:[#allocation2 + $0x70] sm:$0xff]  ;;  %v3567_v33 = vpack.c.bf16 %v1232_v47, %v1231_v49  ;;  %v1623_v3 = vpack.c.bf16 %v1231_v49, %v1230_v46  ;;  %v2154_v62 = vld [vmem:[%s558_s21] sm:$0xff] }
  0xd2   : > { %2736 = vmatprep.mubr.msk.bf16.mxu1 %vm577_vm0, %v3533_v27  ;;  %830 = vst.msk [vmem:[#allocation2 + $0x81] sm:$0xff] %vm822_vm4, %v813_v35  ;;  %2743 = vmatpush3.bf16.msra.mxu0 %v1273_v31  ;;  %v3551_v29 = vld [vmem:[#allocation2 + $0x71] sm:$0xff]  ;;  %v2158_v58 = vld [vmem:[%s558_s21 + $0x20] sm:$0xff] }
  0xd3   : > { %2755 = vmatpush3.bf16.msra.mxu1 %v1402_v28  ;;  %960 = vst.msk [vmem:[#allocation2 + $0x81] sm:$0xff] %vm952_vm5, %v943_v6  ;;  %2764 = vmatprep.subr.bf16.mxu0 %v2898_v32  ;;  %v1234_v20 = vld [vmem:[#allocation2 + $0x72] sm:$0xff]  ;;  %v981_v6 = vld [vmem:[#allocation3] sm:$0xff] }
  0xd4   : > { %2776 = vmatprep.subr.bf16.mxu1 %v2899_v34  ;;  %v2160_v28 = vld [vmem:[%s558_s21 + $0x30] sm:$0xff] }
  0xd5   : > { %v975_v41 = vld [vmem:[#allocation2 + $0x60] sm:$0xff] }
  0xd6   : > { %v1104_v42 = vld [vmem:[#allocation2 + $0x61] sm:$0xff]  ;;  %v3553_v44 = vpack.c.bf16 %v976_v37, %v975_v41  ;;  %v1366_v56 = vpack.c.bf16 %v975_v41, %v974_v21 }
  0xd7   : > { %v3556_v45 = vpack.c.bf16 %v3551_v29, %v1104_v42  ;;  %v1233_v51 = vld [vmem:[#allocation2 + $0x62] sm:$0xff]  ;;  %v1495_v4 = vpack.c.bf16 %v1104_v42, %v3522_v8  ;;  %v2156_v8 = vld [vmem:[%s558_s21 + $0x10] sm:$0xff] }
  0xd8   : > { %2725 = vmatmul.mubr.msk.bf16.gmra.mrb[4].mxu0 %vm577_vm0, %v3553_v44  ;;  %v3593_v61 = vpack.c.bf16 %v1234_v20, %v1233_v51  ;;  %v1624_v5 = vpack.c.bf16 %v1233_v51, %v1232_v47  ;;  %v2155_v21 = vld [vmem:[%s558_s21 + $0x8] sm:$0xff]  ;;  %v987_v47 = vld [vmem:[#allocation3 + $0x30] sm:$0xff] }
  0xd9   : > { %2737 = vmatmul.mubr.msk.bf16.gmra.mrb[4].mxu1 %vm577_vm0, %v3556_v45  ;;  %2744 = vmatprep.mubr.msk.bf16.mxu0 %vm577_vm0, %v1235_v30  ;;  %v982_v42 = vld [vmem:[#allocation3 + $0x8] sm:$0xff] }
  0xda   : > { %2756 = vmatprep.mubr.msk.bf16.mxu1 %vm577_vm0, %v1364_v50  ;;  %v3587_v22 = vld [vmem:[#allocation2 + $0x80] sm:$0xff] }
  0xdb   : > { %v1367_v63 = vpack.c.bf16 %v3587_v22, %v976_v37  ;;  %v1492_v11 = vld [vmem:[#allocation2 + $0x81] sm:$0xff]  ;;  %v1755_v25 = vpack.c.bf16 %v1751_v24, %v3587_v22 }
  0xdc   : > { %v1621_v12 = vld [vmem:[#allocation2 + $0x82] sm:$0xff]  ;;  %v1496_v16 = vpack.c.bf16 %v1492_v11, %v3551_v29  ;;  %v984_v29 = vld [vmem:[#allocation3 + $0x18] sm:$0xff] }
  0xdd   : > { %v1625_v17 = vpack.c.bf16 %v1621_v12, %v1234_v20 }
  0xe0   : > { %2745 = vmatmul.mubr.msk.bf16.vlgmr.msra.gmra.mrb[8].mxu0 %vm577_vm0, %v3564_v52 }
  0xe1   : > { %2757 = vmatmul.mubr.msk.bf16.vlgmr.msra.gmra.mrb[8].mxu1 %vm577_vm0, %v1365_v43  ;;  %2748 = vmatprep.mubr.msk.bf16.mxu0 %vm577_vm0, %v3567_v33  ;;  %v985_v43 = vld [vmem:[#allocation3 + $0x20] sm:$0xff] }
  0xe2   : > { %2760 = vmatprep.mubr.msk.bf16.mxu1 %vm577_vm0, %v1366_v56  ;;  %2765 = vmatpush3.bf16.msra.mxu0 %v2898_v32  ;;  %v2161_v32 = vld [vmem:[%s558_s21 + $0x38] sm:$0xff] }
  0xe3   : > { %2777 = vmatpush3.bf16.msra.mxu1 %v2899_v34  ;;  %2842 = vmatprep.subr.msk.bf16.mxu0 %vm1013_vm3, %v2900_v48  ;;  %v983_v34 = vld [vmem:[#allocation3 + $0x10] sm:$0xff] }
  0xe4   : > { %2843 = vmatprep.subr.msk.bf16.mxu1 %vm1013_vm3, %v2901_v59 }
  0xe6   : > { %2767 = vmatpush3.bf16.msra.mxu0 %v1531_v60 }
  0xe7   : > { %2779 = vmatpush3.bf16.msra.mxu1 %v1660_v0  ;;  %2788 = vmatprep.subr.bf16.mxu0 %v2902_v57  ;;  %v986_v0 = vld [vmem:[#allocation3 + $0x28] sm:$0xff] }
  0xe8   : > { %2800 = vmatprep.subr.bf16.mxu1 %v2903_v18  ;;  %2749 = vmatmul.mubr.msk.bf16.gmra.mrb[12].mxu0 %vm577_vm0, %v3593_v61 }
  0xe9   : > { %2761 = vmatmul.mubr.msk.bf16.gmra.mrb[12].mxu1 %vm577_vm0, %v1367_v63  ;;  %2768 = vmatprep.mubr.msk.bf16.mxu0 %vm577_vm0, %v1493_v36 }
  0xea   : > { %2780 = vmatprep.mubr.msk.bf16.mxu1 %vm577_vm0, %v1622_v2 }
  0xf0   : > { %2769 = vmatmul.mubr.msk.bf16.vlgmr.msra.gmra.mrb[16].mxu0 %vm577_vm0, %v1494_v53 }
  0xf1   : > { %2781 = vmatmul.mubr.msk.bf16.vlgmr.msra.gmra.mrb[16].mxu1 %vm577_vm0, %v1623_v3  ;;  %2772 = vmatprep.mubr.msk.bf16.mxu0 %vm577_vm0, %v1495_v4 }
  0xf2   : > { %2784 = vmatprep.mubr.msk.bf16.mxu1 %vm577_vm0, %v1624_v5  ;;  %2789 = vmatpush3.bf16.msra.mxu0 %v2902_v57  ;;  %v988_v57 = vld [vmem:[#allocation3 + $0x38] sm:$0xff] }
  0xf3   : > { %2801 = vmatpush3.bf16.msra.mxu1 %v2903_v18  ;;  %2844 = vmatprep.subr.msk.bf16.mxu0 %vm1013_vm3, %v2904_v9 }
  0xf4   : > { %2845 = vmatprep.subr.msk.bf16.mxu1 %vm1013_vm3, %v2905_v10 }
  0xf6   : > { %2791 = vmatpush3.bf16.msra.mxu0 %v1790_v13 }
  0xf7   : > { %2803 = vmatpush3.bf16.msra.mxu1 %v1919_v14  ;;  %2812 = vmatprep.subr.bf16.mxu0 %v2906_v15 }
  0xf8   : > { %2824 = vmatprep.subr.msk.mxu1 %vm1013_vm3, %v2162_v54  ;;  %2773 = vmatmul.mubr.msk.bf16.gmra.mrb[20].mxu0 %vm577_vm0, %v1496_v16 }
  0xf9   : > { %2785 = vmatmul.mubr.msk.bf16.gmra.mrb[20].mxu1 %vm577_vm0, %v1625_v17  ;;  %2792 = vmatprep.mubr.msk.bf16.mxu0 %vm577_vm0, %v3506_v55  ;;  %v1880_v55 = vld [vmem:[#allocation2 + $0x91] sm:$0xff] }
  0xfa   : > { %2804 = vmatprep.mubr.msk.bf16.mxu1 %vm577_vm0, %v3510_v1  ;;  %v2048_v1 = vsel %vm1013_vm3, %v2907_v19, 0  ;;  %v1884_v7 = vpack.c.bf16 %v1880_v55, %v1492_v11 }
 0x100   : > { %2793 = vmatmul.mubr.msk.bf16.vlgmr.msra.gmra.mrb[24].mxu0 %vm577_vm0, %v3529_v23  ;;  %v2009_v23 = vld [vmem:[#allocation2 + $0x92] sm:$0xff] }
 0x101   : > { %2805 = vmatmul.mubr.msk.bf16.vlgmr.msra.gmra.mrb[24].mxu1 %vm577_vm0, %v3533_v27  ;;  %2796 = vmatprep.mubr.msk.bf16.mxu0 %vm577_vm0, %v3553_v44  ;;  %v2159_v27 = vld [vmem:[%s558_s21 + $0x28] sm:$0xff]  ;;  %v2013_v31 = vpack.c.bf16 %v2009_v23, %v1621_v12 }
 0x102   : > { %2808 = vmatprep.mubr.msk.bf16.mxu1 %vm577_vm0, %v3556_v45  ;;  %2813 = vmatpush3.bf16.msra.mxu0 %v2906_v15 }
 0x103   : > { %2825 = vmatpush3.msk.msra.mxu1 %vm1013_vm3, %v2162_v54  ;;  %2846 = vmatprep.subr.msk.bf16.mxu0 %vm1013_vm3, %v2907_v19 }
 0x106   : > { %2815 = vmatpush3.bf16.msra.mxu0 %v2048_v1 }
 0x108   : > { %2797 = vmatmul.mubr.msk.bf16.gmra.mrb[28].mxu0 %vm577_vm0, %v1755_v25 }
 0x109   : > { %2809 = vmatmul.mubr.msk.bf16.gmra.mrb[28].mxu1 %vm577_vm0, %v1884_v7  ;;  %2816 = vmatprep.mubr.msk.bf16.mxu0 %vm577_vm0, %v3564_v52 }
 0x10a   : > { %2826 = vmatprep.mubr.msk.f32.mxu1 %vm2163_vm6, %v2154_v62 }
 0x110   : > { %2817 = vmatmul.mubr.msk.bf16.vlgmr.msra.gmra.mrb[32].mxu0 %vm577_vm0, %v3567_v33 }
 0x111   : > { %2827 = vmatmul.mubr.msk.f32.vlgmr.msra.gmra.mrb[32].mxu1 %vm2163_vm6, %v2155_v21  ;;  %2820 = vmatprep.mubr.msk.bf16.mxu0 %vm577_vm0, %v3593_v61 }
 0x112   : > { %2829 = vmatprep.mubr.msk.f32.mxu1 %vm2163_vm6, %v2156_v8 }
 0x115   : > { %2830 = vmatmul.mubr.msk.f32.gmra.mrb[34].mxu1 %vm2163_vm6, %v2157_v26 }
 0x116   : > { %2832 = vmatprep.mubr.msk.f32.mxu1 %vm2163_vm6, %v2158_v58 }
 0x118   : > { %2821 = vmatmul.mubr.msk.bf16.gmra.mrb[36].mxu0 %vm577_vm0, %v2013_v31 }
 0x119   : > { %2833 = vmatmul.mubr.msk.f32.gmra.mrb[36].mxu1 %vm2163_vm6, %v2159_v27 }
 0x11a   : > { %2835 = vmatprep.mubr.msk.f32.mxu1 %vm2163_vm6, %v2160_v28 }
 0x11d   : > { %2836 = vmatmul.mubr.msk.f32.gmra.mrb[38].mxu1 %vm2163_vm6, %v2161_v32 }
 0x1a0   : > { %v2722_v35 = vpop.f32.mrb[0].mxu0 }
 0x1a1   : > { %v2734_v37 = vpop.f32.mrb[0].mxu1  ;;  %v1084_v38 = vadd.f32 %v2722_v35, %v983_v34  ;;  %v1051_v40 = vpop.f32.mrb[1].mxu0 }
 0x1a2   : > { %v1180_v41 = vpop.f32.mrb[1].mxu1  ;;  %v1082_v44 = vadd.f32 %v1051_v40, %v981_v6  ;;  %v2723_v45 = vpop.f32.mrb[2].mxu0 }
 0x1a3   : > { %v2735_v30 = vpop.f32.mrb[2].mxu1  ;;  %1092 = vst.msk [vmem:[#allocation3 + $0x10] sm:$0xff] %vm701_vm2, %v1084_v38  ;;  %v1085_v50 = vadd.f32 %v2723_v45, %v984_v29  ;;  %v1054_v39 = vpop.f32.mrb[3].mxu0 }
 0x1a4   : > { %v1183_v46 = vpop.f32.mrb[3].mxu1  ;;  %1090 = vst.msk [vmem:[#allocation3] sm:$0xff] %vm701_vm2, %v1082_v44  ;;  %v1083_v49 = vadd.f32 %v1054_v39, %v982_v42 }
 0x1a5   : > { %1093 = vst.msk [vmem:[#allocation3 + $0x18] sm:$0xff] %vm701_vm2, %v1085_v50 }
 0x1a6   : > { %1091 = vst.msk [vmem:[#allocation3 + $0x8] sm:$0xff] %vm701_vm2, %v1083_v49 }
 0x1aa   : > { %v1112_v52 = vld [vmem:[#allocation3 + $0x10] sm:$0xff] }
 0x1ab   : > { %v1213_v33 = vadd.f32 %v2734_v37, %v1112_v52  ;;  %v1110_v56 = vld [vmem:[#allocation3] sm:$0xff]  ;;  %v2726_v48 = vpop.f32.mrb[4].mxu0 }
 0x1ac   : > { %v2738_v59 = vpop.f32.mrb[4].mxu1  ;;  %v1211_v18 = vadd.f32 %v1180_v41, %v1110_v56  ;;  %v1113_v51 = vld [vmem:[#allocation3 + $0x18] sm:$0xff]  ;;  %v1088_v20 = vadd.f32 %v2726_v48, %v987_v47  ;;  %v1067_v22 = vpop.f32.mrb[5].mxu0 }
 0x1ad   : > { %v1196_v60 = vpop.f32.mrb[5].mxu1  ;;  %1221 = vst.msk [vmem:[#allocation3 + $0x10] sm:$0xff] %vm701_vm2, %v1213_v33  ;;  %v1214_v61 = vadd.f32 %v2735_v30, %v1113_v51  ;;  %v1111_v63 = vld [vmem:[#allocation3 + $0x8] sm:$0xff]  ;;  %v1086_v36 = vadd.f32 %v1067_v22, %v985_v43  ;;  %v2727_v2 = vpop.f32.mrb[6].mxu0 }
 0x1ae   : > { %v2739_v53 = vpop.f32.mrb[6].mxu1  ;;  %1219 = vst.msk [vmem:[#allocation3] sm:$0xff] %vm701_vm2, %v1211_v18  ;;  %v1212_v3 = vadd.f32 %v1183_v46, %v1111_v63  ;;  %1096 = vst.msk [vmem:[#allocation3 + $0x30] sm:$0xff] %vm701_vm2, %v1088_v20  ;;  %v1089_v4 = vadd.f32 %v2727_v2, %v988_v57  ;;  %v1070_v5 = vpop.f32.mrb[7].mxu0 }
 0x1af   : > { %v1199_v9 = vpop.f32.mrb[7].mxu1  ;;  %1222 = vst.msk [vmem:[#allocation3 + $0x18] sm:$0xff] %vm701_vm2, %v1214_v61  ;;  %1094 = vst.msk [vmem:[#allocation3 + $0x20] sm:$0xff] %vm701_vm2, %v1086_v36  ;;  %v1087_v10 = vadd.f32 %v1070_v5, %v986_v0 }
 0x1b0   : > { %1220 = vst.msk [vmem:[#allocation3 + $0x8] sm:$0xff] %vm701_vm2, %v1212_v3  ;;  %1097 = vst.msk [vmem:[#allocation3 + $0x38] sm:$0xff] %vm701_vm2, %v1089_v4 }
 0x1b1   : > { %1095 = vst.msk [vmem:[#allocation3 + $0x28] sm:$0xff] %vm701_vm2, %v1087_v10 }
 0x1b3   : > { %v2746_v11 = vpop.f32.mrb[8].mxu0 }
 0x1b4   : > { %v2758_v12 = vpop.f32.mrb[8].mxu1  ;;  %v1241_v13 = vld [vmem:[#allocation3 + $0x10] sm:$0xff]  ;;  %v1309_v14 = vpop.f32.mrb[9].mxu0 }
 0x1b5   : > { %v1438_v15 = vpop.f32.mrb[9].mxu1  ;;  %v1116_v54 = vld [vmem:[#allocation3 + $0x30] sm:$0xff]  ;;  %v1342_v16 = vadd.f32 %v2746_v11, %v1241_v13  ;;  %v1239_v17 = vld [vmem:[#allocation3] sm:$0xff]  ;;  %v2747_v19 = vpop.f32.mrb[10].mxu0 }
 0x1b6   : > { %v2759_v24 = vpop.f32.mrb[10].mxu1  ;;  %v1217_v55 = vadd.f32 %v2738_v59, %v1116_v54  ;;  %v1114_v1 = vld [vmem:[#allocation3 + $0x20] sm:$0xff]  ;;  %v1340_v25 = vadd.f32 %v1309_v14, %v1239_v17  ;;  %v1242_v7 = vld [vmem:[#allocation3 + $0x18] sm:$0xff]  ;;  %v1312_v62 = vpop.f32.mrb[11].mxu0 }
 0x1b7   : > { %v1441_v21 = vpop.f32.mrb[11].mxu1  ;;  %v1215_v8 = vadd.f32 %v1196_v60, %v1114_v1  ;;  %v1117_v26 = vld [vmem:[#allocation3 + $0x38] sm:$0xff]  ;;  %1350 = vst.msk [vmem:[#allocation3 + $0x10] sm:$0xff] %vm701_vm2, %v1342_v16  ;;  %v1343_v58 = vadd.f32 %v2747_v19, %v1242_v7  ;;  %v1240_v23 = vld [vmem:[#allocation3 + $0x8] sm:$0xff] }
 0x1b8   : > { %1225 = vst.msk [vmem:[#allocation3 + $0x30] sm:$0xff] %vm701_vm2, %v1217_v55  ;;  %v1218_v27 = vadd.f32 %v2739_v53, %v1117_v26  ;;  %v1115_v31 = vld [vmem:[#allocation3 + $0x28] sm:$0xff]  ;;  %1348 = vst.msk [vmem:[#allocation3] sm:$0xff] %vm701_vm2, %v1340_v25  ;;  %v1341_v28 = vadd.f32 %v1312_v62, %v1240_v23 }
 0x1b9   : > { %1223 = vst.msk [vmem:[#allocation3 + $0x20] sm:$0xff] %vm701_vm2, %v1215_v8  ;;  %v1216_v32 = vadd.f32 %v1199_v9, %v1115_v31  ;;  %1351 = vst.msk [vmem:[#allocation3 + $0x18] sm:$0xff] %vm701_vm2, %v1343_v58 }
 0x1ba   : > { %1226 = vst.msk [vmem:[#allocation3 + $0x38] sm:$0xff] %vm701_vm2, %v1218_v27  ;;  %1349 = vst.msk [vmem:[#allocation3 + $0x8] sm:$0xff] %vm701_vm2, %v1341_v28 }
 0x1bb   : > { %1224 = vst.msk [vmem:[#allocation3 + $0x28] sm:$0xff] %vm701_vm2, %v1216_v32  ;;  %v2750_v34 = vpop.f32.mrb[12].mxu0 }
 0x1bc   : > { %v2762_v6 = vpop.f32.mrb[12].mxu1  ;;  %v1325_v35 = vpop.f32.mrb[13].mxu0 }
 0x1bd   : > { %v1454_v37 = vpop.f32.mrb[13].mxu1  ;;  %v2751_v29 = vpop.f32.mrb[14].mxu0 }
 0x1be   : > { %v2763_v38 = vpop.f32.mrb[14].mxu1  ;;  %v1370_v40 = vld [vmem:[#allocation3 + $0x10] sm:$0xff]  ;;  %v1328_v41 = vpop.f32.mrb[15].mxu0 }
 0x1bf   : > { %v1457_v42 = vpop.f32.mrb[15].mxu1  ;;  %v1471_v44 = vadd.f32 %v2758_v12, %v1370_v40  ;;  %v1368_v45 = vld [vmem:[#allocation3] sm:$0xff]  ;;  %v1245_v30 = vld [vmem:[#allocation3 + $0x30] sm:$0xff] }
 0x1c0   : > { %v1469_v50 = vadd.f32 %v1438_v15, %v1368_v45  ;;  %v1371_v39 = vld [vmem:[#allocation3 + $0x18] sm:$0xff]  ;;  %v1346_v46 = vadd.f32 %v2750_v34, %v1245_v30  ;;  %v1243_v49 = vld [vmem:[#allocation3 + $0x20] sm:$0xff] }
 0x1c1   : > { %1479 = vst.msk [vmem:[#allocation3 + $0x10] sm:$0xff] %vm701_vm2, %v1471_v44  ;;  %v1472_v47 = vadd.f32 %v2759_v24, %v1371_v39  ;;  %v1369_v52 = vld [vmem:[#allocation3 + $0x8] sm:$0xff]  ;;  %v1344_v43 = vadd.f32 %v1325_v35, %v1243_v49  ;;  %v1246_v33 = vld [vmem:[#allocation3 + $0x38] sm:$0xff] }
 0x1c2   : > { %1477 = vst.msk [vmem:[#allocation3] sm:$0xff] %vm701_vm2, %v1469_v50  ;;  %v1470_v56 = vadd.f32 %v1441_v21, %v1369_v52  ;;  %1354 = vst.msk [vmem:[#allocation3 + $0x30] sm:$0xff] %vm701_vm2, %v1346_v46  ;;  %v1347_v48 = vadd.f32 %v2751_v29, %v1246_v33  ;;  %v1244_v59 = vld [vmem:[#allocation3 + $0x28] sm:$0xff] }
 0x1c3   : > { %1480 = vst.msk [vmem:[#allocation3 + $0x18] sm:$0xff] %vm701_vm2, %v1472_v47  ;;  %1352 = vst.msk [vmem:[#allocation3 + $0x20] sm:$0xff] %vm701_vm2, %v1344_v43  ;;  %v1345_v57 = vadd.f32 %v1328_v41, %v1244_v59  ;;  %v2770_v18 = vpop.f32.mrb[16].mxu0 }
 0x1c4   : > { %v2782_v51 = vpop.f32.mrb[16].mxu1  ;;  %1478 = vst.msk [vmem:[#allocation3 + $0x8] sm:$0xff] %vm701_vm2, %v1470_v56  ;;  %1355 = vst.msk [vmem:[#allocation3 + $0x38] sm:$0xff] %vm701_vm2, %v1347_v48  ;;  %v1567_v20 = vpop.f32.mrb[17].mxu0 }
 0x1c5   : > { %v1696_v22 = vpop.f32.mrb[17].mxu1  ;;  %1353 = vst.msk [vmem:[#allocation3 + $0x28] sm:$0xff] %vm701_vm2, %v1345_v57  ;;  %v2771_v60 = vpop.f32.mrb[18].mxu0 }
 0x1c6   : > { %v2783_v0 = vpop.f32.mrb[18].mxu1  ;;  %v1570_v61 = vpop.f32.mrb[19].mxu0 }
 0x1c7   : > { %v1699_v63 = vpop.f32.mrb[19].mxu1 }
 0x1c8   : > { %v1499_v36 = vld [vmem:[#allocation3 + $0x10] sm:$0xff] }
 0x1c9   : > { %v1374_v2 = vld [vmem:[#allocation3 + $0x30] sm:$0xff]  ;;  %v1600_v53 = vadd.f32 %v2770_v18, %v1499_v36  ;;  %v1497_v3 = vld [vmem:[#allocation3] sm:$0xff] }
 0x1ca   : > { %v1475_v4 = vadd.f32 %v2762_v6, %v1374_v2  ;;  %v1372_v5 = vld [vmem:[#allocation3 + $0x20] sm:$0xff]  ;;  %v1598_v9 = vadd.f32 %v1567_v20, %v1497_v3  ;;  %v1500_v10 = vld [vmem:[#allocation3 + $0x18] sm:$0xff] }
 0x1cb   : > { %v1473_v11 = vadd.f32 %v1454_v37, %v1372_v5  ;;  %v1375_v12 = vld [vmem:[#allocation3 + $0x38] sm:$0xff]  ;;  %1608 = vst.msk [vmem:[#allocation3 + $0x10] sm:$0xff] %vm701_vm2, %v1600_v53  ;;  %v1601_v13 = vadd.f32 %v2771_v60, %v1500_v10  ;;  %v1498_v14 = vld [vmem:[#allocation3 + $0x8] sm:$0xff]  ;;  %v2774_v15 = vpop.f32.mrb[20].mxu0 }
 0x1cc   : > { %v2786_v54 = vpop.f32.mrb[20].mxu1  ;;  %1483 = vst.msk [vmem:[#allocation3 + $0x30] sm:$0xff] %vm701_vm2, %v1475_v4  ;;  %v1476_v16 = vadd.f32 %v2763_v38, %v1375_v12  ;;  %v1373_v17 = vld [vmem:[#allocation3 + $0x28] sm:$0xff]  ;;  %1606 = vst.msk [vmem:[#allocation3] sm:$0xff] %vm701_vm2, %v1598_v9  ;;  %v1599_v19 = vadd.f32 %v1570_v61, %v1498_v14  ;;  %v1583_v24 = vpop.f32.mrb[21].mxu0 }
 0x1cd   : > { %v1712_v55 = vpop.f32.mrb[21].mxu1  ;;  %1481 = vst.msk [vmem:[#allocation3 + $0x20] sm:$0xff] %vm701_vm2, %v1473_v11  ;;  %v1474_v1 = vadd.f32 %v1457_v42, %v1373_v17  ;;  %1609 = vst.msk [vmem:[#allocation3 + $0x18] sm:$0xff] %vm701_vm2, %v1601_v13  ;;  %v2775_v25 = vpop.f32.mrb[22].mxu0 }
 0x1ce   : > { %v2787_v7 = vpop.f32.mrb[22].mxu1  ;;  %1484 = vst.msk [vmem:[#allocation3 + $0x38] sm:$0xff] %vm701_vm2, %v1476_v16  ;;  %1607 = vst.msk [vmem:[#allocation3 + $0x8] sm:$0xff] %vm701_vm2, %v1599_v19  ;;  %v1586_v62 = vpop.f32.mrb[23].mxu0 }
 0x1cf   : > { %v1715_v21 = vpop.f32.mrb[23].mxu1  ;;  %1482 = vst.msk [vmem:[#allocation3 + $0x28] sm:$0xff] %vm701_vm2, %v1474_v1 }
 0x1d2   : > { %v1628_v8 = vld [vmem:[#allocation3 + $0x10] sm:$0xff] }
 0x1d3   : > { %v1729_v26 = vadd.f32 %v2782_v51, %v1628_v8  ;;  %v1626_v58 = vld [vmem:[#allocation3] sm:$0xff]  ;;  %v1503_v23 = vld [vmem:[#allocation3 + $0x30] sm:$0xff]  ;;  %v2794_v27 = vpop.f32.mrb[24].mxu0 }
 0x1d4   : > { %v3706_v31 = vpop.f32.mrb[24].mxu1  ;;  %v1727_v28 = vadd.f32 %v1696_v22, %v1626_v58  ;;  %v1629_v32 = vld [vmem:[#allocation3 + $0x18] sm:$0xff]  ;;  %v1604_v34 = vadd.f32 %v2774_v15, %v1503_v23  ;;  %v1501_v6 = vld [vmem:[#allocation3 + $0x20] sm:$0xff]  ;;  %v1826_v35 = vpop.f32.mrb[25].mxu0 }
 0x1d5   : > { %v3708_v37 = vpop.f32.mrb[25].mxu1  ;;  %1737 = vst.msk [vmem:[#allocation3 + $0x10] sm:$0xff] %vm701_vm2, %v1729_v26  ;;  %v1730_v29 = vadd.f32 %v2783_v0, %v1629_v32  ;;  %v1627_v38 = vld [vmem:[#allocation3 + $0x8] sm:$0xff]  ;;  %v1602_v40 = vadd.f32 %v1583_v24, %v1501_v6  ;;  %v1504_v41 = vld [vmem:[#allocation3 + $0x38] sm:$0xff]  ;;  %v2795_v42 = vpop.f32.mrb[26].mxu0 }
 0x1d6   : > { %v3711_v44 = vpop.f32.mrb[26].mxu1  ;;  %1735 = vst.msk [vmem:[#allocation3] sm:$0xff] %vm701_vm2, %v1727_v28  ;;  %v1728_v45 = vadd.f32 %v1699_v63, %v1627_v38  ;;  %1612 = vst.msk [vmem:[#allocation3 + $0x30] sm:$0xff] %vm701_vm2, %v1604_v34  ;;  %v1605_v30 = vadd.f32 %v2775_v25, %v1504_v41  ;;  %v1502_v50 = vld [vmem:[#allocation3 + $0x28] sm:$0xff]  ;;  %v1829_v39 = vpop.f32.mrb[27].mxu0 }
 0x1d7   : > { %v1958_v46 = vpop.f32.mrb[27].mxu1  ;;  %1738 = vst.msk [vmem:[#allocation3 + $0x18] sm:$0xff] %vm701_vm2, %v1730_v29  ;;  %1610 = vst.msk [vmem:[#allocation3 + $0x20] sm:$0xff] %vm701_vm2, %v1602_v40  ;;  %v1603_v49 = vadd.f32 %v1586_v62, %v1502_v50 }
 0x1d8   : > { %1736 = vst.msk [vmem:[#allocation3 + $0x8] sm:$0xff] %vm701_vm2, %v1728_v45  ;;  %1613 = vst.msk [vmem:[#allocation3 + $0x38] sm:$0xff] %vm701_vm2, %v1605_v30 }
 0x1d9   : > { %1611 = vst.msk [vmem:[#allocation3 + $0x28] sm:$0xff] %vm701_vm2, %v1603_v49 }
 0x1db   : > { %v2798_v47 = vpop.f32.mrb[28].mxu0 }
 0x1dc   : > { %v3720_v52 = vpop.f32.mrb[28].mxu1  ;;  %v1758_v43 = vld [vmem:[#allocation3 + $0x10] sm:$0xff]  ;;  %v1842_v33 = vpop.f32.mrb[29].mxu0 }
 0x1dd   : > { %v3722_v56 = vpop.f32.mrb[29].mxu1  ;;  %v1632_v48 = vld [vmem:[#allocation3 + $0x30] sm:$0xff]  ;;  %v1859_v59 = vadd.f32 %v2794_v27, %v1758_v43  ;;  %v1756_v57 = vld [vmem:[#allocation3] sm:$0xff]  ;;  %v2799_v18 = vpop.f32.mrb[30].mxu0 }
 0x1de   : > { %v3724_v51 = vpop.f32.mrb[30].mxu1  ;;  %v1733_v20 = vadd.f32 %v2786_v54, %v1632_v48  ;;  %v1630_v22 = vld [vmem:[#allocation3 + $0x20] sm:$0xff]  ;;  %v1857_v60 = vadd.f32 %v1826_v35, %v1756_v57  ;;  %v1759_v0 = vld [vmem:[#allocation3 + $0x18] sm:$0xff]  ;;  %v1845_v61 = vpop.f32.mrb[31].mxu0 }
 0x1df   : > { %v3726_v63 = vpop.f32.mrb[31].mxu1  ;;  %v1731_v36 = vadd.f32 %v1712_v55, %v1630_v22  ;;  %v1633_v2 = vld [vmem:[#allocation3 + $0x38] sm:$0xff]  ;;  %1867 = vst.msk [vmem:[#allocation3 + $0x10] sm:$0xff] %vm701_vm2, %v1859_v59  ;;  %v1860_v53 = vadd.f32 %v2795_v42, %v1759_v0  ;;  %v1757_v3 = vld [vmem:[#allocation3 + $0x8] sm:$0xff] }
 0x1e0   : > { %1741 = vst.msk [vmem:[#allocation3 + $0x30] sm:$0xff] %vm701_vm2, %v1733_v20  ;;  %v1734_v4 = vadd.f32 %v2787_v7, %v1633_v2  ;;  %v1631_v5 = vld [vmem:[#allocation3 + $0x28] sm:$0xff]  ;;  %1865 = vst.msk [vmem:[#allocation3] sm:$0xff] %vm701_vm2, %v1857_v60  ;;  %v1858_v9 = vadd.f32 %v1829_v39, %v1757_v3 }
 0x1e1   : > { %1739 = vst.msk [vmem:[#allocation3 + $0x20] sm:$0xff] %vm701_vm2, %v1731_v36  ;;  %v1732_v10 = vadd.f32 %v1715_v21, %v1631_v5  ;;  %1868 = vst.msk [vmem:[#allocation3 + $0x18] sm:$0xff] %vm701_vm2, %v1860_v53 }
 0x1e2   : > { %1742 = vst.msk [vmem:[#allocation3 + $0x38] sm:$0xff] %vm701_vm2, %v1734_v4  ;;  %1866 = vst.msk [vmem:[#allocation3 + $0x8] sm:$0xff] %vm701_vm2, %v1858_v9 }
 0x1e3   : > { %1740 = vst.msk [vmem:[#allocation3 + $0x28] sm:$0xff] %vm701_vm2, %v1732_v10  ;;  %v2818_v11 = vpop.f32.mrb[32].mxu0 }
 0x1e4   : > { %v3736_v12 = vpop.f32.mrb[32].mxu1  ;;  %v2084_v13 = vpop.f32.mrb[33].mxu0 }
 0x1e5   : > { %v3738_v14 = vpop.f32.mrb[33].mxu1  ;;  %v2819_v15 = vpop.f32.mrb[34].mxu0 }
 0x1e6   : > { %v1887_v54 = vld [vmem:[#allocation3 + $0x10] sm:$0xff]  ;;  %v2087_v16 = vpop.f32.mrb[35].mxu0 }
 0x1e7   : > { %v1988_v17 = vadd.f32 %v3706_v31, %v1887_v54  ;;  %v1885_v19 = vld [vmem:[#allocation3] sm:$0xff]  ;;  %v1762_v24 = vld [vmem:[#allocation3 + $0x30] sm:$0xff] }
 0x1e8   : > { %v3741_v55 = vpop.f32.mrb[34].mxu1  ;;  %v1986_v1 = vadd.f32 %v3708_v37, %v1885_v19  ;;  %v1888_v25 = vld [vmem:[#allocation3 + $0x18] sm:$0xff]  ;;  %v1863_v7 = vadd.f32 %v2798_v47, %v1762_v24  ;;  %v1760_v62 = vld [vmem:[#allocation3 + $0x20] sm:$0xff] }
 0x1e9   : > { %v3744_v21 = vpop.f32.mrb[35].mxu1  ;;  %1996 = vst.msk [vmem:[#allocation3 + $0x10] sm:$0xff] %vm701_vm2, %v1988_v17  ;;  %v1989_v8 = vadd.f32 %v3711_v44, %v1888_v25  ;;  %v1886_v26 = vld [vmem:[#allocation3 + $0x8] sm:$0xff]  ;;  %v1861_v58 = vadd.f32 %v1842_v33, %v1760_v62  ;;  %v1763_v23 = vld [vmem:[#allocation3 + $0x38] sm:$0xff] }
 0x1ea   : > { %1994 = vst.msk [vmem:[#allocation3] sm:$0xff] %vm701_vm2, %v1986_v1  ;;  %v1987_v27 = vadd.f32 %v1958_v46, %v1886_v26  ;;  %1871 = vst.msk [vmem:[#allocation3 + $0x30] sm:$0xff] %vm701_vm2, %v1863_v7  ;;  %v1864_v31 = vadd.f32 %v2799_v18, %v1763_v23  ;;  %v1761_v28 = vld [vmem:[#allocation3 + $0x28] sm:$0xff] }
 0x1eb   : > { %1997 = vst.msk [vmem:[#allocation3 + $0x18] sm:$0xff] %vm701_vm2, %v1989_v8  ;;  %1869 = vst.msk [vmem:[#allocation3 + $0x20] sm:$0xff] %vm701_vm2, %v1861_v58  ;;  %v1862_v32 = vadd.f32 %v1845_v61, %v1761_v28  ;;  %v2822_v34 = vpop.f32.mrb[36].mxu0 }
 0x1ec   : > { %v3752_v6 = vpop.f32.mrb[36].mxu1  ;;  %1995 = vst.msk [vmem:[#allocation3 + $0x8] sm:$0xff] %vm701_vm2, %v1987_v27  ;;  %1872 = vst.msk [vmem:[#allocation3 + $0x38] sm:$0xff] %vm701_vm2, %v1864_v31  ;;  %v2100_v35 = vpop.f32.mrb[37].mxu0 }
 0x1ed   : > { %v3756_v37 = vpop.f32.mrb[37].mxu1  ;;  %1870 = vst.msk [vmem:[#allocation3 + $0x28] sm:$0xff] %vm701_vm2, %v1862_v32  ;;  %v2823_v29 = vpop.f32.mrb[38].mxu0 }
 0x1ee   : > { %v2103_v38 = vpop.f32.mrb[39].mxu0 }
 0x1f0   : > { %v3759_v40 = vpop.f32.mrb[38].mxu1  ;;  %v2016_v41 = vld [vmem:[#allocation3 + $0x10] sm:$0xff] }
 0x1f1   : > { %v3761_v42 = vpop.f32.mrb[39].mxu1  ;;  %v1891_v44 = vld [vmem:[#allocation3 + $0x30] sm:$0xff]  ;;  %v2117_v45 = vadd.f32 %v2818_v11, %v2016_v41  ;;  %v2014_v30 = vld [vmem:[#allocation3] sm:$0xff] }
 0x1f2   : > { %v1992_v50 = vadd.f32 %v3720_v52, %v1891_v44  ;;  %v1889_v39 = vld [vmem:[#allocation3 + $0x20] sm:$0xff]  ;;  %v2115_v46 = vadd.f32 %v2084_v13, %v2014_v30  ;;  %v2017_v49 = vld [vmem:[#allocation3 + $0x18] sm:$0xff] }
 0x1f3   : > { %v1990_v47 = vadd.f32 %v3722_v56, %v1889_v39  ;;  %v1892_v43 = vld [vmem:[#allocation3 + $0x38] sm:$0xff]  ;;  %2125 = vst.msk [vmem:[#allocation3 + $0x10] sm:$0xff] %vm701_vm2, %v2117_v45  ;;  %v2118_v33 = vadd.f32 %v2819_v15, %v2017_v49  ;;  %v2015_v48 = vld [vmem:[#allocation3 + $0x8] sm:$0xff]  ;;  %v2638_v56 = vld [vmem:[%s3836_s6] ss:$0 sm:$0xff] }
 0x1f4   : > { %2000 = vst.msk [vmem:[#allocation3 + $0x30] sm:$0xff] %vm701_vm2, %v1992_v50  ;;  %v1993_v59 = vadd.f32 %v3724_v51, %v1892_v43  ;;  %v1890_v57 = vld [vmem:[#allocation3 + $0x28] sm:$0xff]  ;;  %2123 = vst.msk [vmem:[#allocation3] sm:$0xff] %vm701_vm2, %v2115_v46  ;;  %v2116_v18 = vadd.f32 %v2087_v16, %v2015_v48 }
 0x1f5   : > { %1998 = vst.msk [vmem:[#allocation3 + $0x20] sm:$0xff] %vm701_vm2, %v1990_v47  ;;  %v1991_v52 = vadd.f32 %v3726_v63, %v1890_v57  ;;  %2126 = vst.msk [vmem:[#allocation3 + $0x18] sm:$0xff] %vm701_vm2, %v2118_v33  ;;  %v2648_v63 = vld [vmem:[%s3839_s9] ss:$0 sm:$0xff] }
 0x1f6   : > { %2001 = vst.msk [vmem:[#allocation3 + $0x38] sm:$0xff] %vm701_vm2, %v1993_v59  ;;  %2124 = vst.msk [vmem:[#allocation3 + $0x8] sm:$0xff] %vm701_vm2, %v2116_v18 }
 0x1f7   : > { %1999 = vst.msk [vmem:[#allocation3 + $0x28] sm:$0xff] %vm701_vm2, %v1991_v52 }
 0x1fa   : > { %v2133_v51 = vld [vmem:[#allocation3 + $0x10] sm:$0xff] }
 0x1fb   : > { %v2020_v20 = vld [vmem:[#allocation3 + $0x30] sm:$0xff]  ;;  %v2131_v22 = vld [vmem:[#allocation3] sm:$0xff]  ;;  %v2148_v60 = vadd.f32 %v2638_v56, %v2133_v51 }
 0x1fc   : > { %v2121_v0 = vadd.f32 %v2822_v34, %v2020_v20  ;;  %v2018_v61 = vld [vmem:[#allocation3 + $0x20] sm:$0xff]  ;;  %v2146_v36 = vadd.f32 %v2638_v56, %v2131_v22  ;;  %v2134_v2 = vld [vmem:[#allocation3 + $0x18] sm:$0xff] }
 0x1fd   : > { %v2119_v53 = vadd.f32 %v2100_v35, %v2018_v61  ;;  %v2021_v3 = vld [vmem:[#allocation3 + $0x38] sm:$0xff]  ;;  %v2132_v4 = vld [vmem:[#allocation3 + $0x8] sm:$0xff]  ;;  %v2149_v5 = vadd.f32 %v2638_v56, %v2134_v2  ;;  %v2298_v9 = vadd.f32 %v3744_v21, %v2148_v60 }
 0x1fe   : > { %2129 = vst.msk [vmem:[#allocation3 + $0x30] sm:$0xff] %vm701_vm2, %v2121_v0  ;;  %v2122_v10 = vadd.f32 %v2823_v29, %v2021_v3  ;;  %v2019_v11 = vld [vmem:[#allocation3 + $0x28] sm:$0xff]  ;;  %v2147_v13 = vadd.f32 %v2638_v56, %v2132_v4  ;;  %v2296_v15 = vadd.f32 %v3738_v14, %v2146_v36 }
 0x1ff   : > { %2127 = vst.msk [vmem:[#allocation3 + $0x20] sm:$0xff] %vm701_vm2, %v2119_v53  ;;  %v2120_v54 = vadd.f32 %v2103_v38, %v2019_v11  ;;  %v2299_v16 = vadd.f32 %v3741_v55, %v2149_v5  ;;  %v2313_v17 = vadd.f32 %v2648_v63, %v2298_v9 }
 0x200   : > { %2130 = vst.msk [vmem:[#allocation3 + $0x38] sm:$0xff] %vm701_vm2, %v2122_v10  ;;  %v2297_v19 = vadd.f32 %v3736_v12, %v2147_v13  ;;  %v2311_v24 = vadd.f32 %v2648_v63, %v2296_v15 }
 0x201   : > { %2128 = vst.msk [vmem:[#allocation3 + $0x28] sm:$0xff] %vm701_vm2, %v2120_v54  ;;  %v2314_v1 = vadd.f32 %v2648_v63, %v2299_v16  ;;  %2321 = vst.msk [vmem:[%s3787_s13 + $0x10] sm:$0xff] %vm701_vm2, %v2313_v17 }
 0x202   : > { %v2312_v25 = vadd.f32 %v2648_v63, %v2297_v19  ;;  %2319 = vst.msk [vmem:[%s3787_s13] sm:$0xff] %vm701_vm2, %v2311_v24 }
 0x203   : > { %2322 = vst.msk [vmem:[%s3787_s13 + $0x18] sm:$0xff] %vm701_vm2, %v2314_v1 }
 0x204   : > { %2320 = vst.msk [vmem:[%s3787_s13 + $0x8] sm:$0xff] %vm701_vm2, %v2312_v25 }
 0x205   : > { %v2137_v14 = vld [vmem:[#allocation3 + $0x30] sm:$0xff] }
 0x206   : > { %v2135_v55 = vld [vmem:[#allocation3 + $0x20] sm:$0xff]  ;;  %v2152_v7 = vadd.f32 %v2638_v56, %v2137_v14 }
 0x207   : > { %v2150_v12 = vadd.f32 %v2638_v56, %v2135_v55  ;;  %v2138_v62 = vld [vmem:[#allocation3 + $0x38] sm:$0xff] }
 0x208   : > { %v2136_v21 = vld [vmem:[#allocation3 + $0x28] sm:$0xff]  ;;  %v2153_v8 = vadd.f32 %v2638_v56, %v2138_v62  ;;  %v2302_v26 = vadd.f32 %v3761_v42, %v2152_v7 }
 0x209   : > { %v2151_v58 = vadd.f32 %v2638_v56, %v2136_v21  ;;  %v2300_v23 = vadd.f32 %v3756_v37, %v2150_v12 }
 0x20a   : > { %v2303_v27 = vadd.f32 %v3759_v40, %v2153_v8  ;;  %v2317_v31 = vadd.f32 %v2648_v63, %v2302_v26 }
 0x20b   : > { %v2301_v28 = vadd.f32 %v3752_v6, %v2151_v58  ;;  %v2315_v32 = vadd.f32 %v2648_v63, %v2300_v23 }
 0x20c   : > { %v2318_v34 = vadd.f32 %v2648_v63, %v2303_v27  ;;  %2325 = vst.msk [vmem:[%s3787_s13 + $0x30] sm:$0xff] %vm701_vm2, %v2317_v31 }
 0x20d   : > { %v2316_v35 = vadd.f32 %v2648_v63, %v2301_v28  ;;  %2323 = vst.msk [vmem:[%s3787_s13 + $0x20] sm:$0xff] %vm701_vm2, %v2315_v32 }
 0x20e   : > { %2326 = vst.msk [vmem:[%s3787_s13 + $0x38] sm:$0xff] %vm701_vm2, %v2318_v34 }
 0x20f   : > { %2324 = vst.msk [vmem:[%s3787_s13 + $0x28] sm:$0xff] %vm701_vm2, %v2316_v35 }
 0x210 PF: > { %s20_s17 = sadd.s32 1, %s3042_s17   ;;  %s3844_s13 = smov %s3034_s15 }
 0x211   : > { %p17_p11 = scmp.ge.s32.totalorder %s20_s17, 18   ;;  %s3845_s14 = smov %s3038_s16 }
 0x212   : > { %s3846_s15 = smov %s3849_s18  ;;  %s3847_s16 = smov %s3853_s19 }
 0x213   :  { %19 = sbr.rel (!%p17_p11) target bundleno = 3 (0x3), region = 115 }

</bundles_post_ra>
